<compile_context>
chip_gen: v5e
topology: v5e:2x2
jax: 0.10.0
libtpu: 0.0.40
codegen_flags: <defaults>
</compile_context>

<pallas_src>
import jax
import jax.numpy as jnp
from jax import lax
from jax.experimental import pallas as pl
from jax.experimental.pallas import tpu as pltpu


def _round_up(x: int, m: int) -> int:
    return ((x + m - 1) // m) * m


def _make_kernel(num_feats: int, offsets, has_perturb: bool):
    """Build the kernel body for a given number of categorical features."""

    def kernel(idx_ref, table_ref, *rest):
        if has_perturb:
            perturb_ref, out_ref = rest
        else:
            (out_ref,) = rest

        tile_n = idx_ref.shape[0]
        v_pad = table_ref.shape[0]

        idx = idx_ref[...]                                     # [tile_n, F] int32
        iota_v = lax.broadcasted_iota(jnp.int32, (tile_n, v_pad), 1)

        # Multi-hot over the concatenated vocab: accumulate in f32 (native on
        # every VPU generation, incl. v5e) and cast to the table dtype once.
        multihot = jnp.zeros((tile_n, v_pad), dtype=jnp.float32)
        for f in range(num_feats):                             # static unroll, F small
            idx_f = idx[:, f:f + 1] + offsets[f]               # [tile_n, 1]
            multihot = multihot + (iota_v == idx_f).astype(jnp.float32)
        multihot = multihot.astype(table_ref.dtype)

        # Gather + sum over features == one MXU matmul, f32 accumulation.
        h = jnp.dot(multihot, table_ref[...],
                    preferred_element_type=jnp.float32,
                    precision=lax.Precision.HIGHEST)

        if has_perturb:
            h = h + perturb_ref[...].astype(jnp.float32)

        out_ref[...] = h.astype(out_ref.dtype)

    return kernel


def _choose_tile_n(n, num_feats, v_pad, d_pad, table_bytes,
                   out_itemsize, perturb_itemsize, vmem_budget):
    """Largest node tile whose working set fits a conservative VMEM budget."""
    per_row = (
        2 * 4 * num_feats                                   # packed idx block (double-buffered)
        + 2 * out_itemsize * d_pad                          # output block (double-buffered)
        + (2 * perturb_itemsize * d_pad if perturb_itemsize else 0)
        + 2 * 4 * v_pad                                     # iota + multihot (f32 intermediates)
        + 4 * d_pad                                         # f32 accumulator
    )
    resident = 2 * table_bytes                              # constant table, still double-buffered
    tile = 128
    for cand in (2048, 1024, 512, 256, 128):
        if resident + cand * per_row <= vmem_budget:
            tile = cand
            break
    # Don't use a tile (much) larger than the row count; sublane dim stays a
    # multiple of 8 so the BlockSpec satisfies the (8, 128) constraint.
    tile = min(tile, max(8, _round_up(n, 8)))
    vmem_est = resident + tile * per_row
    return tile, vmem_est


def cikm_embedding_forward(x_cat, emb_tables, perturb=None, *, tile_n=None):
    """CIKMEmbedding.forward: sum of per-feature embedding lookups (+ perturb).

    x_cat:      [N, F] integer categorical node features.
    emb_tables: list of F arrays, emb_tables[f] has shape [num_emb_f, D].
    perturb:    optional [N, D] additive perturbation.
    """
    x_cat = jnp.asarray(x_cat).astype(jnp.int32)
    n, num_feats = x_cat.shape
    assert len(emb_tables) == num_feats
    d = int(emb_tables[0].shape[1])
    out_dtype = emb_tables[0].dtype

    # ---- concatenate embedding tables; per-feature row offsets (static) ----
    sizes = [int(t.shape[0]) for t in emb_tables]
    offsets, off = [], 0
    for s in sizes:
        offsets.append(off)
        off += s
    v = off

    table = jnp.concatenate([jnp.asarray(t) for t in emb_tables], axis=0)

    # ---- lane-dense padding of the (small, N-independent) table ----
    v_pad = _round_up(max(v, 1), 128)
    d_pad = _round_up(d, 128)
    if (v_pad, d_pad) != (v, d):
        table = jnp.pad(table, ((0, v_pad - v), (0, d_pad - d)))
    table_bytes = v_pad * d_pad * table.dtype.itemsize

    has_perturb = perturb is not None
    p = None
    perturb_itemsize = 0
    if has_perturb:
        p = jnp.asarray(perturb)
        if int(p.shape[1]) != d_pad:                        # only pad D if needed (not N)
            p = jnp.pad(p, ((0, 0), (0, d_pad - int(p.shape[1]))))
        perturb_itemsize = p.dtype.itemsize

    # ---- node tiling: auto-scale the tile against a conservative VMEM budget
    # (fits v7x's 32 MiB default scoped / 64 MiB physical VMEM; v5e/v6e have
    # more headroom). N is NOT padded: the partial last block is masked.
    vmem_budget = 24 * 1024 * 1024
    auto_tile, vmem_est = _choose_tile_n(
        n, num_feats, v_pad, d_pad, table_bytes,
        jnp.dtype(out_dtype).itemsize, perturb_itemsize, vmem_budget)
    if tile_n is None:
        tile_n = auto_tile
    grid = (int(pl.cdiv(n, tile_n)),)

    # Only raise the scoped-VMEM limit when the resident table requires it.
    vmem_limit = None
    if vmem_est > (30 << 20):
        vmem_limit = int(min(vmem_est + (4 << 20), 56 << 20))

    in_specs = [
        pl.BlockSpec((tile_n, num_feats), lambda i: (i, 0)),   # packed [N, F] indices
        pl.BlockSpec((v_pad, d_pad), lambda i: (0, 0)),        # VMEM-resident table
    ]
    inputs = [x_cat, table]
    if has_perturb:
        in_specs.append(pl.BlockSpec((tile_n, d_pad), lambda i: (i, 0)))
        inputs.append(p)

    out_spec = pl.BlockSpec((tile_n, d_pad), lambda i: (i, 0))
    out_shape = jax.ShapeDtypeStruct((n, d_pad), out_dtype)

    # Cost estimate: all fields must be Python ints.
    num_tiles = grid[0]
    flops = int(2 * num_tiles * tile_n * v_pad * d_pad)
    if has_perturb:
        flops += int(n * d_pad)
    bytes_accessed = int(
        sum(int(a.size) * int(a.dtype.itemsize) for a in inputs)
        + n * d_pad * int(jnp.dtype(out_dtype).itemsize))

    kernel = _make_kernel(num_feats, tuple(offsets), has_perturb)
    out = pl.pallas_call(
        kernel,
        out_shape=out_shape,
        grid=grid,
        in_specs=in_specs,
        out_specs=out_spec,
        compiler_params=pltpu.CompilerParams(
            dimension_semantics=("parallel",),                 # node axis -> megacore sharding
            vmem_limit_bytes=vmem_limit),
        cost_estimate=pl.CostEstimate(
            flops=flops, transcendentals=0, bytes_accessed=bytes_accessed),
    )(*inputs)

    if d_pad != d:
        out = out[:, :d]
    return out


if __name__ == "__main__":
    key = jax.random.PRNGKey(0)

    emb_dim = 128                         # lane-dense embedding dim
    num_node_emb_list = [7, 5, 11]        # vocab size of each categorical node feature
    num_feats = len(num_node_emb_list)
    N = 300                               # exercises the partial (masked) last node tile

    ks = jax.random.split(key, 2 * num_feats + 1)

    emb_tables = [
        0.1 * jax.random.normal(ks[f], (num_node_emb_list[f], emb_dim), jnp.float32)
        for f in range(num_feats)
    ]
    cols = [
        jax.random.randint(ks[num_feats + f], (N,), 0, num_node_emb_list[f],
                           dtype=jnp.int32)
        for f in range(num_feats)
    ]
    x_cat = jnp.stack(cols, axis=1)                           # [N, F] categorical features
    perturb = 0.05 * jax.random.normal(ks[2 * num_feats], (N, emb_dim), jnp.float32)

    # ---- run the Pallas kernel (with and without perturb, as in the module) ----
    h_perturb = cikm_embedding_forward(x_cat, emb_tables, perturb)
    h_plain = cikm_embedding_forward(x_cat, emb_tables, None)
    jax.block_until_ready((h_perturb, h_plain))

    # ---- pure-JAX reference (f32 tables, same math as the PyTorch module) ----
    ref = jnp.zeros((N, emb_dim), jnp.float32)
    for f in range(num_feats):
        ref = ref + emb_tables[f][x_cat[:, f]]
    ref_perturb = ref + perturb

    assert h_perturb.shape == (N, emb_dim)
    assert h_plain.shape == (N, emb_dim)
    # Tolerance leaves room for MXU f32-via-bf16-pass rounding of the table;
    # with Precision.HIGHEST the actual error is ~1e-6.
    assert jnp.allclose(h_plain, ref, atol=5e-3, rtol=5e-3), \
        float(jnp.max(jnp.abs(h_plain - ref)))
    assert jnp.allclose(h_perturb, ref_perturb, atol=5e-3, rtol=5e-3), \
        float(jnp.max(jnp.abs(h_perturb - ref_perturb)))
    print("KERNEL_OK")
</pallas_src>

<mosaic_0001>
module attributes {stable_mosaic.version = 11 : i64} {
  func.func @kernel(%arg0: i32, %arg1: memref<304x3xi32, #tpu.memory_space<vmem>>, %arg2: memref<128x128xf32, #tpu.memory_space<vmem>>, %arg3: memref<304x128xf32, #tpu.memory_space<vmem>>, %arg4: memref<304x128xf32, #tpu.memory_space<vmem>>) attributes {dimension_semantics = [#tpu.dimension_semantics<parallel>], iteration_bounds = array<i64: 1>, scalar_prefetch = 0 : i64, scratch_operands = 0 : i64, tpu.core_type = #tpu.core_type<tc>, window_params = [{transform_indices = @transform_0, window_bounds = array<i64: 304, 3>}, {pipeline_mode = #tpu.pipeline_mode<synchronous>, transform_indices = @transform_1, window_bounds = array<i64: 128, 128>}, {transform_indices = @transform_2, window_bounds = array<i64: 304, 128>}, {transform_indices = @transform_3, window_bounds = array<i64: 304, 128>}]} {
    %c0 = arith.constant 0 : index
    %c0_0 = arith.constant 0 : index
    %0 = vector.load %arg1[%c0, %c0_0] : memref<304x3xi32, #tpu.memory_space<vmem>>, vector<304x3xi32>
    %1 = tpu.iota {dimensions = array<i32: 1>} : vector<304x128xi32>
    %cst = arith.constant 0.000000e+00 : f32
    %2 = vector.broadcast %cst : f32 to vector<304x128xf32>
    %3 = vector.extract_strided_slice %0 {offsets = [0, 0], sizes = [304, 1], strides = [1, 1]} : vector<304x3xi32> to vector<304x1xi32>
    %c0_i32 = arith.constant 0 : i32
    %4 = vector.broadcast %c0_i32 : i32 to vector<304x1xi32>
    %5 = arith.addi %3, %4 : vector<304x1xi32>
    %6 = vector.broadcast %5 : vector<304x1xi32> to vector<304x128xi32>
    %7 = arith.cmpi eq, %1, %6 : vector<304x128xi32>
    %8 = arith.extui %7 : vector<304x128xi1> to vector<304x128xi32>
    %9 = arith.sitofp %8 : vector<304x128xi32> to vector<304x128xf32>
    %10 = arith.addf %2, %9 : vector<304x128xf32>
    %11 = vector.extract_strided_slice %0 {offsets = [0, 1], sizes = [304, 1], strides = [1, 1]} : vector<304x3xi32> to vector<304x1xi32>
    %c7_i32 = arith.constant 7 : i32
    %12 = vector.broadcast %c7_i32 : i32 to vector<304x1xi32>
    %13 = arith.addi %11, %12 : vector<304x1xi32>
    %14 = vector.broadcast %13 : vector<304x1xi32> to vector<304x128xi32>
    %15 = arith.cmpi eq, %1, %14 : vector<304x128xi32>
    %16 = arith.extui %15 : vector<304x128xi1> to vector<304x128xi32>
    %17 = arith.sitofp %16 : vector<304x128xi32> to vector<304x128xf32>
    %18 = arith.addf %10, %17 : vector<304x128xf32>
    %19 = vector.extract_strided_slice %0 {offsets = [0, 2], sizes = [304, 1], strides = [1, 1]} : vector<304x3xi32> to vector<304x1xi32>
    %c12_i32 = arith.constant 12 : i32
    %20 = vector.broadcast %c12_i32 : i32 to vector<304x1xi32>
    %21 = arith.addi %19, %20 : vector<304x1xi32>
    %22 = vector.broadcast %21 : vector<304x1xi32> to vector<304x128xi32>
    %23 = arith.cmpi eq, %1, %22 : vector<304x128xi32>
    %24 = arith.extui %23 : vector<304x128xi1> to vector<304x128xi32>
    %25 = arith.sitofp %24 : vector<304x128xi32> to vector<304x128xf32>
    %26 = arith.addf %18, %25 : vector<304x128xf32>
    %c0_1 = arith.constant 0 : index
    %c0_2 = arith.constant 0 : index
    %27 = vector.load %arg2[%c0_1, %c0_2] : memref<128x128xf32, #tpu.memory_space<vmem>>, vector<128x128xf32>
    %cst_3 = arith.constant dense<0.000000e+00> : vector<304x128xf32>
    %28 = tpu.matmul %26, %27, %cst_3 {dimension_numbers = #tpu.dot_dimension_numbers<[1], [0], [0], [1], [0, 0, 1, 1], [], []>, precision = #tpu.contract_precision<fp32>} : vector<304x128xf32>, vector<128x128xf32>, vector<304x128xf32> -> vector<304x128xf32>
    %c0_4 = arith.constant 0 : index
    %c0_5 = arith.constant 0 : index
    %29 = vector.load %arg3[%c0_4, %c0_5] : memref<304x128xf32, #tpu.memory_space<vmem>>, vector<304x128xf32>
    %30 = arith.addf %28, %29 : vector<304x128xf32>
    %c0_6 = arith.constant 0 : index
    %c0_7 = arith.constant 0 : index
    %31 = vector.load %arg4[%c0_6, %c0_7] : memref<304x128xf32, #tpu.memory_space<vmem>>, vector<304x128xf32>
    tpu.vector_store %arg4[%c0_6, %c0_7], %30 {strides = array<i32>} : memref<304x128xf32, #tpu.memory_space<vmem>>, vector<304x128xf32>,
    return
  }
  func.func @transform_0(%arg0: i32) -> (i32, i32) {
    %c0_i32 = arith.constant 0 : i32
    %c0_i32_0 = arith.constant 0 : i32
    return %arg0, %c0_i32 : i32, i32
  }
  func.func @transform_1(%arg0: i32) -> (i32, i32) {
    %c0_i32 = arith.constant 0 : i32
    %c0_i32_0 = arith.constant 0 : i32
    %c0_i32_1 = arith.constant 0 : i32
    return %c0_i32, %c0_i32_0 : i32, i32
  }
  func.func @transform_2(%arg0: i32) -> (i32, i32) {
    %c0_i32 = arith.constant 0 : i32
    %c0_i32_0 = arith.constant 0 : i32
    return %arg0, %c0_i32 : i32, i32
  }
  func.func @transform_3(%arg0: i32) -> (i32, i32) {
    %c0_i32 = arith.constant 0 : i32
    %c0_i32_0 = arith.constant 0 : i32
    return %arg0, %c0_i32 : i32, i32
  }
}

</mosaic_0001>

<bundles_post_ra>
// kernel: tpu_custom_call.1
= control target key start
LH: loop header
LB: loop body
LE: loop exit
PB: predicated region body
PF: predicated region fallthrough
CT: control target
= control target key end

     0   :  { %8 = vsyncpa [#allocation3], 0  ;;  %s4743_s0 = inlined_call_operand.vmem [shape: s32[300,3], index: 0, kind: input, shape index: {}]   ;;  %s4744_s1 = inlined_call_operand.hbm [shape: f32[128,128], index: 1, kind: input, shape index: {}]   ;;  %s4745_s2 = inlined_call_operand.vmem [shape: f32[300,128], index: 2, kind: input, shape index: {}]   ;;  %s4746_s3 = inlined_call_operand.hbm [shape: f32[300,128], index: 3, kind: output, shape index: {}]  }
   0x1   :  { %9 = vsyncpa [#allocation4], 0  ;;  %s16_s14 = sshll.u32 %s4744_s1, 4  ;;  %s2831_s15 = smov [#allocation2]   ;;  %s17_s14 = int_to_ptr.hbm [resolvable:$true] %s16_s14 }
   0x2   :  { %s18_s16 = sshll.u32 %s2831_s15, 4  ;;  %s2832_s17 = smov 128   ;;  %s19_s16 = int_to_ptr.vmem [resolvable:$true] %s18_s16 }
   0x3   :  { %s2833_s18 = smov 8  }
   0x4   :  { %24 = dma.hbm_to_vmem [thread:$0]  %s17_s14, 2048, %s19_s16, [#allocation3], %s2832_s17, %s2832_s17, %s2833_s18  }
   0x5   :  { %2827 = dma.done.wait [#allocation3], 2048  }
   0x6   :  { %2828 = vsyncadd [#allocation3], 4294965248  ;;  %v4781_v0 = vmov 0   ;;  %v4779_v1 = vmov 2   ;;  %v2871_v2 = vld [vmem:[%s4743_s0 + $0x20] sm:$0xff]  ;;  %v2876_v3 = vld [vmem:[%s4743_s0 + $0x10] sm:$0xff] }
   0x7   :  { %2699 = vset.pattern.permute.xlu2 %v4781_v0  ;;  %2698 = vset.pattern.permute.xlu1 %v4781_v0  ;;  %v50_v4 = vld [vmem:[%s4743_s0 + $0x98] sm:$0xff]  ;;  %v2886_v6 = vld [vmem:[%s4743_s0] sm:$0xff]  ;;  %v2891_v7 = vld [vmem:[%s4743_s0 + $0x28] sm:$0xff]  ;;  %v4793_v13 = vmov 1   ;;  %v339_v24 = vadd.s32 7, %v2876_v3  ;;  %v643_v36 = vadd.s32 12, %v2876_v3 }
   0x8   :  { %2701 = vset.pattern.permute.xlu0 %v4779_v1  ;;  %84 = vperm.xlu2 %2699, %v2871_v2   ;;  %v660_v5 = vadd.s32 12, %v50_v4  ;;  %v2896_v8 = vld [vmem:[%s4743_s0 + $0x18] sm:$0xff]  ;;  %v641_v9 = vadd.s32 12, %v2886_v6  ;;  %v2904_v10 = vld [vmem:[%s4743_s0 + $0xc0] sm:$0xff]  ;;  %v356_v11 = vadd.s32 7, %v50_v4  ;;  %v2914_v15 = vld [vmem:[%s4743_s0 + $0xc8] sm:$0xff] }
   0x9   :  { %78 = vperm.xlu1 %2698, %v2876_v3   ;;  %v665_v12 = vadd.s32 12, %v2904_v10  ;;  %v51_v14 = vld [vmem:[%s4743_s0 + $0xa0] sm:$0xff]  ;;  %v666_v17 = vadd.s32 12, %v2914_v15  ;;  %v2920_v18 = vld [vmem:[%s4743_s0 + $0x8] sm:$0xff]  ;;  %v337_v19 = vadd.s32 7, %v2886_v6  ;;  %v2936_v25 = vld [vmem:[%s4743_s0 + $0xd0] sm:$0xff] }
   0xa   :  { %737 = vperm.xlu0 %2701, %v660_v5   ;;  %v357_v16 = vadd.s32 7, %v51_v14  ;;  %v661_v20 = vadd.s32 12, %v51_v14  ;;  %v338_v21 = vadd.s32 7, %v2920_v18  ;;  %v52_v22 = vld [vmem:[%s4743_s0 + $0xa8] sm:$0xff]  ;;  %v363_v26 = vadd.s32 7, %v2936_v25  ;;  %v2945_v29 = vld [vmem:[%s4743_s0 + $0xd8] sm:$0xff] }
   0xb   :  { %v358_v23 = vadd.s32 7, %v52_v22  ;;  %v662_v27 = vadd.s32 12, %v52_v22  ;;  %v642_v28 = vadd.s32 12, %v2920_v18  ;;  %v53_v30 = vld [vmem:[%s4743_s0 + $0xb0] sm:$0xff]  ;;  %v364_v31 = vadd.s32 7, %v2945_v29  ;;  %v2956_v33 = vld [vmem:[%s4743_s0 + $0x40] sm:$0xff] }
   0xc   :  { %v359_v32 = vadd.s32 7, %v53_v30  ;;  %v345_v34 = vadd.s32 7, %v2956_v33  ;;  %v663_v35 = vadd.s32 12, %v53_v30  ;;  %v960_v37 = vld [vmem:[#allocation2 + $0x78] sm:$0xff]  ;;  %v2965_v39 = vld [vmem:[%s4743_s0 + $0xf0] sm:$0xff]  ;;  %v958_v43 = vld [vmem:[#allocation2 + $0x68] sm:$0xff] }
   0xd   :  { %v2960_v38 = vand.u32 4294901760, %v960_v37  ;;  %v959_v40 = vld [vmem:[#allocation2 + $0x70] sm:$0xff]  ;;  %v367_v44 = vadd.s32 7, %v2965_v39  ;;  %v2978_v45 = vld [vmem:[%s4743_s0 + $0xb8] sm:$0xff]  ;;  %v2984_v48 = vand.u32 4294901760, %v958_v43  ;;  %v957_v49 = vld [vmem:[#allocation2 + $0x60] sm:$0xff] }
   0xe   :  { %v2972_v42 = vand.u32 4294901760, %v959_v40  ;;  %v2995_v53 = vand.u32 4294901760, %v957_v49  ;;  %v360_v54 = vadd.s32 7, %v2978_v45  ;;  %v340_v55 = vadd.s32 7, %v2896_v8  ;;  %v956_v56 = vld [vmem:[#allocation2 + $0x58] sm:$0xff]  ;;  %v955_v62 = vld [vmem:[#allocation2 + $0x50] sm:$0xff] }
   0xf   :  { %v2970_v41 = vsub.f32 %v960_v37, %v2960_v38  ;;  %2658 = vmatpush.msra.mxu2 %v2960_v38  ;;  %1000 = vmatpush.msra.mxu0 %v2960_v38  ;;  %v2993_v52 = vsub.f32 %v958_v43, %v2984_v48  ;;  %v3009_v61 = vand.u32 4294901760, %v956_v56  ;;  %v3016_v5 = vand.u32 4294901760, %v955_v62  ;;  %v951_v37 = vld [vmem:[#allocation2 + $0x30] sm:$0xff]  ;;  %s2531_s13 = sshll.u32 %s4746_s3, 4  ;;  %s2532_s13 = int_to_ptr.hbm [resolvable:$true] %s2531_s13 }
  0x10   :  { %87 = vperm.xlu2 %2699, %v2891_v7   ;;  %v2982_v47 = vsub.f32 %v959_v40, %v2972_v42  ;;  %v3006_v60 = vsub.f32 %v957_v49, %v2995_v53  ;;  %v950_v49 = vld [vmem:[#allocation2 + $0x28] sm:$0xff] }
  0x11   :  { %81 = vperm.xlu1 %2698, %v2896_v8   ;;  %v1338_v46 = vand.u32 4294901760, %v2970_v41  ;;  %2659 = vmatpush.msra.mxu2 %v2972_v42  ;;  %v1350_v59 = vand.u32 4294901760, %v2993_v52 }
  0x12   :  { %680 = vperm.xlu0 %2701, %v641_v9   ;;  %v1344_v51 = vand.u32 4294901760, %v2982_v47  ;;  %1002 = vmatpush.msra.mxu0 %v2972_v42  ;;  %v3022_v9 = vsub.f32 %v956_v56, %v3009_v61  ;;  %v3078_v56 = vand.u32 4294901760, %v950_v49 }
  0x13   :  { %v1339_v50 = vsub.f32 %v2970_v41, %v1338_v46  ;;  %2660 = vmatpush.msra.mxu2 %v2984_v48  ;;  %v1351_v3 = vsub.f32 %v2993_v52, %v1350_v59 }
  0x14   :  { %v1345_v58 = vsub.f32 %v2982_v47, %v1344_v51  ;;  %1004 = vmatpush.msra.mxu0 %v2984_v48 }
  0x15   :  { %v1340_v57 = vand.u32 4294901760, %v1339_v50  ;;  %2661 = vmatpush.msra.mxu2 %v2995_v53 }
  0x16   :  { %v1346_v63 = vand.u32 4294901760, %v1345_v58  ;;  %1006 = vmatpush.msra.mxu0 %v2995_v53  ;;  %v949_v58 = vld [vmem:[#allocation2 + $0x20] sm:$0xff] }
  0x17   :  { %2674 = vmatpush.msra.mxu3 %v1340_v57  ;;  %2662 = vmatpush.msra.mxu2 %v3009_v61 }
  0x18   :  { %2700 = vset.pattern.permute.xlu2 %v4793_v13  ;;  %1341 = vmatpush.msra.mxu1 %v1340_v57 }
  0x19   :  { %129 = vperm.xlu1 %2698, %v50_v4   ;;  %433 = vperm.xlu2 %2700, %v356_v11   ;;  %v4755_v4 = vand.u32 4294901760, %v3006_v60  ;;  %v954_v11 = vld [vmem:[#allocation2 + $0x48] sm:$0xff] }
  0x1a   :  { %752 = vperm.xlu0 %2701, %v665_v12   ;;  %v1352_v12 = vand.u32 4294901760, %v1351_v3  ;;  %2675 = vmatpush.msra.mxu3 %v1346_v63  ;;  %v3092_v3 = vsub.f32 %v950_v49, %v3078_v56  ;;  %v341_v49 = vadd.s32 7, %v2871_v2 }
  0x1b   :  { %2663 = vmatpush.msra.mxu2 %v3016_v5  ;;  %1347 = vmatpush.msra.mxu1 %v1346_v63 }
  0x1c   :  { %2676 = vmatpush.msra.mxu3 %v1352_v12  ;;  %1008 = vmatpush.msra.mxu0 %v3009_v61 }
  0x1d   :  { %1353 = vmatpush.msra.mxu1 %v1352_v12 }
  0x1e   :  { %1010 = vmatpush.msra.mxu0 %v3016_v5 }
  0x21   :  { %132 = vperm.xlu1 %2698, %v51_v14   ;;  %436 = vperm.xlu2 %2700, %v357_v16   ;;  %v1357_v14 = vsub.f32 %v3006_v60, %v4755_v4  ;;  %v3028_v16 = vsub.f32 %v955_v62, %v3016_v5 }
  0x22   :  { %755 = vperm.xlu0 %2701, %v666_v17   ;;  %v3030_v17 = vand.u32 4294901760, %v954_v11 }
  0x24   :  { %2664 = vmatpush.msra.mxu2 %v3030_v17  ;;  %1012 = vmatpush.msra.mxu0 %v3030_v17 }
  0x29   :  { %2702 = vset.pattern.permute.xlu1 %v4793_v13  ;;  %2703 = vset.pattern.permute.xlu2 %v4779_v1 }
  0x2a   :  { %376 = vperm.xlu1 %2702, %v337_v19   ;;  %740 = vperm.xlu2 %2703, %v661_v20   ;;  %v4753_v19 = vand.u32 4294901760, %v3022_v9  ;;  %v953_v20 = vld [vmem:[#allocation2 + $0x40] sm:$0xff] }
  0x2b   :  { %2722 = vset.pattern.permute.xlu0 %v4793_v13 }
  0x2c   :  { %379 = vperm.xlu0 %2722, %v338_v21   ;;  %v1358_v21 = vand.u32 4294901760, %v1357_v14 }
  0x2e   :  { %2677 = vmatpush.msra.mxu3 %v1358_v21  ;;  %1359 = vmatpush.msra.mxu1 %v1358_v21 }
  0x32   :  { %2704 = vset.pattern.permute.xlu1 %v4781_v0  ;;  %2705 = vset.pattern.permute.xlu2 %v4793_v13 }
  0x33   :  { %135 = vperm.xlu1 %2704, %v52_v22   ;;  %439 = vperm.xlu2 %2705, %v358_v23   ;;  %v4752_v22 = vand.u32 4294901760, %v3028_v16  ;;  %v3036_v23 = vsub.f32 %v954_v11, %v3030_v17  ;;  %v3095_v11 = vand.u32 4294901760, %v949_v58 }
  0x34   :  { %382 = vperm.xlu0 %2722, %v339_v24   ;;  %v1363_v24 = vsub.f32 %v3022_v9, %v4753_v19 }
  0x35   :  { %v3113_v21 = vsub.f32 %v949_v58, %v3095_v11 }
  0x3b   :  { %2706 = vset.pattern.permute.xlu1 %v4779_v1  ;;  %2707 = vset.pattern.permute.xlu2 %v4779_v1 }
  0x3c   :  { %454 = vperm.xlu0 %2722, %v363_v26   ;;  %743 = vperm.xlu1 %2706, %v662_v27   ;;  %v3042_v26 = vand.u32 4294901760, %v953_v20  ;;  %v952_v27 = vld [vmem:[#allocation2 + $0x38] sm:$0xff] }
  0x3d   :  { %683 = vperm.xlu2 %2707, %v642_v28   ;;  %v1369_v28 = vsub.f32 %v3028_v16, %v4752_v22 }
  0x3e   :  { %2665 = vmatpush.msra.mxu2 %v3042_v26  ;;  %1014 = vmatpush.msra.mxu0 %v3042_v26 }
  0x3f   :  { %v1370_v40 = vand.u32 4294901760, %v1369_v28  ;;  %v4749_v28 = vand.u32 4294901760, %v3092_v3 }
  0x44   :  { %457 = vperm.xlu0 %2722, %v364_v31   ;;  %2708 = vset.pattern.permute.xlu1 %v4781_v0  ;;  %v3050_v31 = vand.u32 4294901760, %v952_v27 }
  0x45   :  { %2709 = vset.pattern.permute.xlu2 %v4793_v13  ;;  %138 = vperm.xlu1 %2708, %v53_v30   ;;  %v4751_v30 = vand.u32 4294901760, %v3036_v23 }
  0x46   :  { %442 = vperm.xlu2 %2709, %v359_v32   ;;  %v664_v32 = vadd.s32 12, %v2978_v45  ;;  %2666 = vmatpush.msra.mxu2 %v3050_v31 }
  0x47   :  { %v3061_v43 = vsub.f32 %v3036_v23, %v4751_v30  ;;  %1016 = vmatpush.msra.mxu0 %v3050_v31 }
  0x49   :  { %v1376_v50 = vand.u32 4294901760, %v3061_v43 }
  0x4c   :  { %400 = vperm.xlu0 %2722, %v345_v34   ;;  %v644_v34 = vadd.s32 12, %v2896_v8 }
  0x4d   :  { %2710 = vset.pattern.permute.xlu1 %v4779_v1 }
  0x4e   :  { %2711 = vset.pattern.permute.xlu2 %v4779_v1  ;;  %746 = vperm.xlu1 %2710, %v663_v35   ;;  %v1364_v35 = vand.u32 4294901760, %v1363_v24 }
  0x4f   :  { %686 = vperm.xlu2 %2711, %v643_v36   ;;  %v3056_v36 = vsub.f32 %v953_v20, %v3042_v26  ;;  %v948_v20 = vld [vmem:[#allocation2 + $0x18] sm:$0xff] }
  0x50   :  { %2678 = vmatpush.msra.mxu3 %v1364_v35  ;;  %1365 = vmatpush.msra.mxu1 %v1364_v35 }
  0x51   :  { %v4750_v8 = vand.u32 4294901760, %v3056_v36 }
  0x52   :  { %2679 = vmatpush.msra.mxu3 %v1370_v40  ;;  %1371 = vmatpush.msra.mxu1 %v1370_v40 }
  0x53   :  { %v3083_v57 = vsub.f32 %v3056_v36, %v4750_v8  ;;  %v945_v8 = vld [vmem:[#allocation2] sm:$0xff] }
  0x54   :  { %466 = vperm.xlu0 %2722, %v367_v44   ;;  %v3064_v44 = vsub.f32 %v952_v27, %v3050_v31  ;;  %2680 = vmatpush.msra.mxu3 %v1376_v50 }
  0x55   :  { %v1382_v14 = vand.u32 4294901760, %v3083_v57  ;;  %v3122_v57 = vsub.f32 %v3092_v3, %v4749_v28  ;;  %1377 = vmatpush.msra.mxu1 %v1376_v50 }
  0x56   :  { %2712 = vset.pattern.permute.xlu1 %v4793_v13 }
  0x57   :  { %2713 = vset.pattern.permute.xlu2 %v4793_v13  ;;  %445 = vperm.xlu1 %2712, %v360_v54   ;;  %v4748_v54 = vand.u32 4294901760, %v3064_v44 }
  0x58   :  { %385 = vperm.xlu2 %2713, %v340_v55   ;;  %2681 = vmatpush.msra.mxu3 %v1382_v14 }
  0x59   :  { %v3088_v62 = vsub.f32 %v3064_v44, %v4748_v54  ;;  %1383 = vmatpush.msra.mxu1 %v1382_v14 }
  0x5b   :  { %v1388_v24 = vand.u32 4294901760, %v3088_v62  ;;  %v4754_v62 = vand.u32 4294901760, %v3113_v21 }
  0x5c   :  { %2742 = vset.pattern.permute.xlu0 %v4781_v0 }
  0x5d   :  { %72 = vperm.xlu0 %2742, %v2886_v6   ;;  %v3066_v6 = vand.u32 4294901760, %v951_v37  ;;  %2682 = vmatpush.msra.mxu3 %v1388_v24  ;;  %v1405_v40 = vsub.f32 %v3113_v21, %v4754_v62 }
  0x5e   :  { %1389 = vmatpush.msra.mxu1 %v1388_v24  ;;  %v362_v24 = vadd.s32 7, %v2914_v15 }
  0x5f   :  { %2714 = vset.pattern.permute.xlu1 %v4779_v1  ;;  %v3076_v55 = vsub.f32 %v951_v37, %v3066_v6  ;;  %v361_v37 = vadd.s32 7, %v2904_v10  ;;  %2667 = vmatpush.msra.mxu2 %v3066_v6  ;;  %v1406_v62 = vand.u32 4294901760, %v1405_v40 }
  0x60   :  { %2715 = vset.pattern.permute.xlu2 %v4779_v1  ;;  %749 = vperm.xlu1 %2714, %v664_v32   ;;  %v3115_v32 = vand.u32 4294901760, %v948_v20 }
  0x61   :  { %689 = vperm.xlu2 %2715, %v644_v34   ;;  %v4747_v63 = vand.u32 4294901760, %v3076_v55  ;;  %v947_v34 = vld [vmem:[#allocation2 + $0x10] sm:$0xff]  ;;  %2668 = vmatpush.msra.mxu2 %v3078_v56 }
  0x62   :  { %v3097_v12 = vpop.permute.xlu2 %84  ;;  %v3130_v35 = vsub.f32 %v948_v20, %v3115_v32  ;;  %1018 = vmatpush.msra.mxu0 %v3066_v6 }
  0x63   :  { %v3107_v27 = vsub.f32 %v3076_v55, %v4747_v63  ;;  %v946_v63 = vld [vmem:[#allocation2 + $0x8] sm:$0xff]  ;;  %2669 = vmatpush.msra.mxu2 %v3095_v11 }
  0x64   :  { %v3137_v28 = vand.u32 4294901760, %v946_v63  ;;  %v4756_v20 = vand.u32 4294901760, %v3130_v35  ;;  %1020 = vmatpush.msra.mxu0 %v3078_v56 }
  0x65   :  { %75 = vperm.xlu0 %2742, %v2920_v18   ;;  %v3125_v18 = vand.u32 4294901760, %v947_v34  ;;  %v1394_v58 = vand.u32 4294901760, %v3107_v27  ;;  %v1400_v27 = vand.u32 4294901760, %v3122_v57  ;;  %v3155_v57 = vand.u32 4294901760, %v945_v8  ;;  %2670 = vmatpush.msra.mxu2 %v3115_v32 }
  0x66   :  { %v3153_v22 = vsub.f32 %v946_v63, %v3137_v28  ;;  %1022 = vmatpush.msra.mxu0 %v3095_v11 }
  0x67   :  { %v3134_v54 = vsub.f32 %v947_v34, %v3125_v18  ;;  %v3149_v34 = vld [vmem:[%s4743_s0 + $0x30] sm:$0xff]  ;;  %2683 = vmatpush.msra.mxu3 %v1394_v58  ;;  %v3172_v40 = vsub.f32 %v945_v8, %v3155_v57  ;;  %2671 = vmatpush.msra.mxu2 %v3125_v18 }
  0x68   :  { %2716 = vset.pattern.permute.xlu1 %v4793_v13  ;;  %v1422_v4 = vand.u32 4294901760, %v3153_v22  ;;  %1395 = vmatpush.msra.mxu1 %v1394_v58 }
  0x69   :  { %2717 = vset.pattern.permute.xlu2 %v4793_v13  ;;  %448 = vperm.xlu1 %2716, %v361_v37   ;;  %v4757_v30 = vand.u32 4294901760, %v3134_v54  ;;  %v1411_v37 = vsub.f32 %v3130_v35, %v4756_v20  ;;  %v1428_v43 = vand.u32 4294901760, %v3172_v40 }
  0x6a   :  { %388 = vperm.xlu2 %2717, %v341_v49   ;;  %v3157_v19 = vpop.permute.xlu2 %87  ;;  %2684 = vmatpush.msra.mxu3 %v1400_v27  ;;  %v1423_v20 = vsub.f32 %v3153_v22, %v1422_v4 }
  0x6b   :  { %v1417_v49 = vsub.f32 %v3134_v54, %v4757_v30  ;;  %v1412_v63 = vand.u32 4294901760, %v1411_v37  ;;  %v645_v30 = vadd.s32 12, %v2871_v2  ;;  %v1429_v8 = vsub.f32 %v3172_v40, %v1428_v43  ;;  %2672 = vmatpush.msra.mxu2 %v3137_v28  ;;  %1401 = vmatpush.msra.mxu1 %v1400_v27 }
  0x6c   :  { %2685 = vmatpush.msra.mxu3 %v1406_v62  ;;  %v1424_v2 = vand.u32 4294901760, %v1423_v20  ;;  %1024 = vmatpush.msra.mxu0 %v3115_v32  ;;  %v69_v27 = vlaneseq  ;;  %v3222_v20 = vld [vmem:[%s4743_s0 + $0x48] sm:$0xff] }
  0x6d   :  { %90 = vperm.xlu0 %2742, %v3149_v34   ;;  %v1418_v50 = vand.u32 4294901760, %v1417_v49  ;;  %v1430_v37 = vand.u32 4294901760, %v1429_v8  ;;  %2673 = vmatpush.msra.mxu2 %v3155_v57  ;;  %v3252_v8 = vld [vmem:[%s4743_s0 + $0xf8] sm:$0xff] }
  0x6e   :  { %2686 = vmatpush.msra.mxu3 %v1412_v63  ;;  %1407 = vmatpush.msra.mxu1 %v1406_v62  ;;  %v646_v62 = vadd.s32 12, %v2891_v7 }
  0x6f   :  { %1587 = vmatpush.msrb.mxu2 %v2970_v41  ;;  %1026 = vmatpush.msra.mxu0 %v3125_v18 }
  0x70   :  { %2687 = vmatpush.msra.mxu3 %v1418_v50  ;;  %1413 = vmatpush.msra.mxu1 %v1412_v63  ;;  %v3230_v63 = vand.u32 127, %v69_v27 }
  0x71   :  { %2718 = vset.pattern.permute.xlu1 %v4779_v1  ;;  %1590 = vmatpush.msrb.mxu2 %v2982_v47  ;;  %v667_v47 = vadd.s32 12, %v2936_v25 }
  0x72   :  { %2719 = vset.pattern.permute.xlu2 %v4781_v0  ;;  %692 = vperm.xlu1 %2718, %v645_v30   ;;  %v342_v30 = vadd.s32 7, %v2891_v7 }
  0x73   :  { %147 = vperm.xlu2 %2719, %v2914_v15   ;;  %v3189_v14 = vpop.permute.xlu2 %433  ;;  %2688 = vmatpush.msra.mxu3 %v1424_v2 }
  0x74   :  { %1419 = vmatpush.msra.mxu1 %v1418_v50  ;;  %1593 = vmatpush.msrb.mxu2 %v2993_v52  ;;  %vm508_vm0 = vcmp.eq.s32.totalorder %v3230_v63, %v3189_v14  ;;  %v343_v50 = vadd.s32 7, %v3149_v34  ;;  %v4862_v14 = vand.u32 4294901760, %v3022_v9 }
  0x75   :  { %141 = vperm.xlu0 %2742, %v2978_v45   ;;  %2689 = vmatpush.msra.mxu3 %v1430_v37 }
  0x76   :  { %1425 = vmatpush.msra.mxu1 %v1424_v2  ;;  %1596 = vmatpush.msrb.mxu2 %v3006_v60 }
  0x77   :  { %1825 = vmatpush.msrb.mxu3 %v2960_v38  ;;  %1028 = vmatpush.msra.mxu0 %v3137_v28 }
  0x78   :  { %1431 = vmatpush.msra.mxu1 %v1430_v37  ;;  %1599 = vmatpush.msrb.mxu2 %v3022_v9  ;;  %v647_v9 = vadd.s32 12, %v3149_v34 }
  0x79   :  { %1827 = vmatpush.msrb.mxu3 %v2972_v42  ;;  %1030 = vmatpush.msra.mxu0 %v3155_v57 }
  0x7a   :  { %2720 = vset.pattern.permute.xlu1 %v4793_v13  ;;  %2303 = vmatpush.msrb.mxu1 %v2960_v38  ;;  %v4790_v38 = vmov 0.0  }
  0x7b   :  { %v3202_v45 = vpop.permute.xlu1 %78  ;;  %2721 = vset.pattern.permute.xlu2 %v4793_v13  ;;  %451 = vperm.xlu1 %2720, %v362_v24   ;;  %v3205_v15 = vpop.permute.xlu2 %436  ;;  %v2601_v41 = vsel %vm508_vm0, 1.0, %v4790_v38  ;;  %v4863_v24 = vand.u32 4294901760, %v3028_v16 }
  0x7c   :  { %391 = vperm.xlu2 %2721, %v342_v30   ;;  %v738_v58 = vpop.permute.xlu0 %737  ;;  %1829 = vmatpush.msrb.mxu3 %v2984_v48  ;;  %vm509_vm3 = vcmp.eq.s32.totalorder %v3230_v63, %v3205_v15  ;;  %vm187_vm0 = vcmp.eq.s32.totalorder %v3230_v63, %v3202_v45 }
  0x7d   :  { %144 = vperm.xlu0 %2742, %v2904_v10   ;;  %2088 = vmatpush.msrb.mxu0 %v1338_v46  ;;  %vm812_vm1 = vcmp.eq.s32.totalorder %v3230_v63, %v738_v58  ;;  %v2602_v30 = vsel %vm509_vm3, 1.0, %v4790_v38 }
  0x7e   :  { %1831 = vmatpush.msrb.mxu3 %v2995_v53  ;;  %1602 = vmatpush.msrb.mxu2 %v3028_v16  ;;  %v4864_v16 = vand.u32 4294901760, %v3036_v23 }
  0x7f   :  { %2092 = vmatpush.msrb.mxu0 %v1344_v51  ;;  %2305 = vmatpush.msrb.mxu1 %v2972_v42  ;;  %v2639_v42 = vsel %vm812_vm1, 1.0, %v4790_v38 }
  0x80   :  { %1833 = vmatpush.msrb.mxu3 %v3009_v61  ;;  %1605 = vmatpush.msrb.mxu2 %v3036_v23 }
  0x81   :  { %2096 = vmatpush.msrb.mxu0 %v1350_v59  ;;  %2307 = vmatpush.msrb.mxu1 %v2984_v48  ;;  %v4861_v59 = vand.u32 4294901760, %v3006_v60 }
  0x82   :  { %1835 = vmatpush.msrb.mxu3 %v3016_v5  ;;  %1608 = vmatpush.msrb.mxu2 %v3056_v36 }
  0x83   :  { %v3217_v10 = vpop.permute.xlu1 %81  ;;  %2723 = vset.pattern.permute.xlu1 %v4779_v1  ;;  %2100 = vmatpush.msrb.mxu0 %v4861_v59 }
  0x84   :  { %2724 = vset.pattern.permute.xlu2 %v4781_v0  ;;  %695 = vperm.xlu1 %2723, %v646_v62   ;;  %v3228_v7 = vpop.permute.xlu0 %680  ;;  %v741_v49 = vpop.permute.xlu2 %740 }
  0x85   :  { %150 = vperm.xlu2 %2724, %v2936_v25   ;;  %99 = vperm.xlu0 %2742, %v3222_v20   ;;  %vm813_vm4 = vcmp.eq.s32.totalorder %v3230_v63, %v741_v49  ;;  %vm793_vm12 = vcmp.eq.s32.totalorder %v3230_v63, %v3228_v7 }
  0x86   :  { %1837 = vmatpush.msrb.mxu3 %v3030_v17  ;;  %2309 = vmatpush.msrb.mxu1 %v2995_v53  ;;  %v3287_v53 = vld [vmem:[%s4743_s0 + $0x110] sm:$0xff]  ;;  %v2640_v15 = vsel %vm813_vm4, 1.0, %v4790_v38 }
  0x87   :  { %2104 = vmatpush.msrb.mxu0 %v4862_v14  ;;  %1611 = vmatpush.msrb.mxu2 %v3064_v44  ;;  %v4869_v14 = vand.u32 4294901760, %v3113_v21 }
  0x88   :  { %1839 = vmatpush.msrb.mxu3 %v3042_v26  ;;  %2311 = vmatpush.msrb.mxu1 %v3009_v61 }
  0x89   :  { %2108 = vmatpush.msrb.mxu0 %v4863_v24  ;;  %1614 = vmatpush.msrb.mxu2 %v3076_v55 }
  0x8a   :  { %1841 = vmatpush.msrb.mxu3 %v3050_v31  ;;  %2313 = vmatpush.msrb.mxu1 %v3016_v5 }
  0x8b   :  { %v130_v46 = vpop.permute.xlu1 %129  ;;  %2112 = vmatpush.msrb.mxu0 %v4864_v16  ;;  %1617 = vmatpush.msrb.mxu2 %v3092_v3 }
  0x8c   :  { %vm204_vm2 = vcmp.eq.s32.totalorder %v3230_v63, %v130_v46  ;;  %2725 = vset.pattern.permute.xlu1 %v4793_v13  ;;  %v3265_v25 = vpop.permute.xlu0 %752  ;;  %1843 = vmatpush.msrb.mxu3 %v3066_v6 }
  0x8d   :  { %v2563_v51 = vsel %vm204_vm2, 1.0, %v4790_v38  ;;  %2726 = vset.pattern.permute.xlu2 %v4779_v1  ;;  %165 = vperm.xlu0 %2742, %v3252_v8   ;;  %v3268_v48 = vpop.permute.xlu2 %439 }
  0x8e   :  { %v622_v52 = vadd.f32 %v2601_v41, %v2563_v51  ;;  %394 = vperm.xlu1 %2725, %v343_v50   ;;  %758 = vperm.xlu2 %2726, %v667_v47   ;;  %v4865_v50 = vand.u32 4294901760, %v3056_v36  ;;  %v38_v47 = vld [vmem:[%s4743_s0 + $0x38] sm:$0xff]  ;;  %vm510_vm6 = vcmp.eq.s32.totalorder %v3230_v63, %v3268_v48 }
  0x8f   :  { %2315 = vmatpush.msrb.mxu1 %v3030_v17  ;;  %1845 = vmatpush.msrb.mxu3 %v3078_v56  ;;  %v4866_v17 = vand.u32 4294901760, %v3064_v44 }
  0x90   :  { %v926_v2 = vadd.f32 %v2639_v42, %v622_v52  ;;  %2116 = vmatpush.msrb.mxu0 %v4865_v50  ;;  %v668_v42 = vadd.s32 12, %v2945_v29  ;;  %1620 = vmatpush.msrb.mxu2 %v3113_v21  ;;  %v344_v52 = vadd.s32 7, %v38_v47  ;;  %v4871_v21 = vand.u32 4294901760, %v3134_v54 }
  0x91   :  { %2317 = vmatpush.msrb.mxu1 %v3042_v26  ;;  %v4867_v26 = vand.u32 4294901760, %v3076_v55  ;;  %1847 = vmatpush.msrb.mxu3 %v3095_v11 }
  0x92   :  { %v3280_v37 = vand.u32 4294901760, %v926_v2  ;;  %2120 = vmatpush.msrb.mxu0 %v4866_v17  ;;  %1623 = vmatpush.msrb.mxu2 %v3130_v35 }
  0x93   :  { %v133_v60 = vpop.permute.xlu1 %132  ;;  %2319 = vmatpush.msrb.mxu1 %v3050_v31  ;;  %1849 = vmatpush.msrb.mxu3 %v3115_v32 }
  0x94   :  { %vm205_vm5 = vcmp.eq.s32.totalorder %v3230_v63, %v133_v60  ;;  %1509 = vmatmul.f32.vlgmr.msra.gmra.mxu3 %v3280_v37  ;;  %v3296_v61 = vsub.f32 %v926_v2, %v3280_v37  ;;  %v3302_v58 = vpop.permute.xlu0 %755  ;;  %2124 = vmatpush.msrb.mxu0 %v4867_v26  ;;  %v4868_v2 = vand.u32 4294901760, %v3092_v3  ;;  %v4870_v3 = vand.u32 4294901760, %v3130_v35 }
  0x95   :  { %v2564_v34 = vsel %vm205_vm5, 1.0, %v4790_v38  ;;  %174 = vperm.xlu0 %2742, %v3287_v53   ;;  %2321 = vmatpush.msrb.mxu1 %v3066_v6 }
  0x96   :  { %v623_v62 = vadd.f32 %v2602_v30, %v2564_v34  ;;  %2727 = vset.pattern.permute.xlu1 %v4779_v1  ;;  %v4764_v5 = vand.u32 4294901760, %v3296_v61  ;;  %2728 = vset.pattern.permute.xlu2 %v4781_v0 }
  0x97   :  { %698 = vperm.xlu1 %2727, %v647_v9   ;;  %v3311_v27 = vpop.permute.xlu2 %683  ;;  %153 = vperm.xlu2 %2728, %v2945_v29   ;;  %v648_v9 = vadd.s32 12, %v38_v47 }
  0x98   :  { %v927_v49 = vadd.f32 %v2640_v15, %v623_v62  ;;  %v1186_v23 = vsub.f32 %v3296_v61, %v4764_v5  ;;  %2128 = vmatpush.msrb.mxu0 %v4868_v2  ;;  %2323 = vmatpush.msrb.mxu1 %v3078_v56  ;;  %v59_v56 = vld [vmem:[%s4743_s0 + $0xe0] sm:$0xff]  ;;  %vm794_vm4 = vcmp.eq.s32.totalorder %v3230_v63, %v3311_v27 }
  0x99   :  { %1626 = vmatpush.msrb.mxu2 %v3134_v54  ;;  %1851 = vmatpush.msrb.mxu3 %v3125_v18  ;;  %v365_v24 = vadd.s32 7, %v59_v56  ;;  %v669_v15 = vadd.s32 12, %v59_v56 }
  0x9a   :  { %v3321_v41 = vand.u32 4294901760, %v927_v49  ;;  %v1187_v46 = vand.u32 4294901760, %v1186_v23  ;;  %2132 = vmatpush.msrb.mxu0 %v4869_v14  ;;  %2325 = vmatpush.msrb.mxu1 %v3095_v11  ;;  %v60_v23 = vld [vmem:[%s4743_s0 + $0xe8] sm:$0xff] }
  0x9b   :  { %1629 = vmatpush.msrb.mxu2 %v3153_v22  ;;  %1853 = vmatpush.msrb.mxu3 %v3137_v28 }
  0x9c   :  { %1188 = vmatmul.f32.vlgmr.msra.gmra.mxu2 %v1187_v46  ;;  %1513 = vmatmul.f32.gmra.mxu3 %v3321_v41  ;;  %v3333_v36 = vpop.permute.xlu1 %376  ;;  %v3336_v51 = vsub.f32 %v927_v49, %v3321_v41 }
  0x9d   :  { %2758 = vset.pattern.permute.xlu0 %v4779_v1  ;;  %2136 = vmatpush.msrb.mxu0 %v4870_v3  ;;  %vm489_vm13 = vcmp.eq.s32.totalorder %v3230_v63, %v3333_v36 }
  0x9e   :  { %v3342_v29 = vpop.permute.xlu0 %379  ;;  %v4763_v44 = vand.u32 4294901760, %v3336_v51  ;;  %761 = vperm.xlu0 %2758, %v668_v42   ;;  %2327 = vmatpush.msrb.mxu1 %v3115_v32  ;;  %v2603_v32 = vsel %vm510_vm6, 1.0, %v4790_v38  ;;  %v366_v42 = vadd.s32 7, %v60_v23  ;;  %vm188_vm6 = vcmp.eq.s32.totalorder %v3230_v63, %v3217_v10 }
  0x9f   :  { %2729 = vset.pattern.permute.xlu1 %v4781_v0  ;;  %2730 = vset.pattern.permute.xlu2 %v4793_v13  ;;  %vm490_vm2 = vcmp.eq.s32.totalorder %v3230_v63, %v3342_v29  ;;  %v2547_v10 = vsel %vm188_vm6, 1.0, %v4790_v38 }
  0xa0   :  { %93 = vperm.xlu1 %2729, %v38_v47   ;;  %v3348_v59 = vpop.permute.xlu2 %442  ;;  %v1194_v31 = vsub.f32 %v3336_v51, %v4763_v44  ;;  %397 = vperm.xlu2 %2730, %v344_v52  }
  0xa1   :  { %1855 = vmatpush.msrb.mxu3 %v3155_v57  ;;  %2140 = vmatpush.msrb.mxu0 %v4871_v21  ;;  %vm511_vm9 = vcmp.eq.s32.totalorder %v3230_v63, %v3348_v59 }
  0xa2   :  { %v1195_v55 = vand.u32 4294901760, %v1194_v31  ;;  %2329 = vmatpush.msrb.mxu1 %v3125_v18  ;;  %1632 = vmatpush.msrb.mxu2 %v3172_v40  ;;  %v2604_v46 = vsel %vm511_vm9, 1.0, %v4790_v38  ;;  %vm189_vm9 = vcmp.eq.s32.totalorder %v3230_v63, %v3097_v12 }
  0xa3   :  { %2144 = vmatpush.msrb.mxu0 %v1422_v4 }
  0xa4   :  { %1196 = vmatmul.f32.gmra.mxu2 %v1195_v55  ;;  %2331 = vmatpush.msrb.mxu1 %v3137_v28 }
  0xa5   :  { %v136_v60 = vpop.permute.xlu1 %135  ;;  %2148 = vmatpush.msrb.mxu0 %v1428_v43  ;;  %v649_v43 = vadd.s32 12, %v2956_v33 }
  0xa6   :  { %v3363_v6 = vpop.permute.xlu0 %382  ;;  %vm206_vm7 = vcmp.eq.s32.totalorder %v3230_v63, %v136_v60  ;;  %2333 = vmatpush.msrb.mxu1 %v3155_v57  ;;  %v670_v60 = vadd.s32 12, %v60_v23 }
  0xa7   :  { %v2565_v35 = vsel %vm206_vm7, 1.0, %v4790_v38  ;;  %vm491_vm14 = vcmp.eq.s32.totalorder %v3230_v63, %v3363_v6 }
  0xa8   :  { %2731 = vset.pattern.permute.xlu1 %v4779_v1  ;;  %2732 = vset.pattern.permute.xlu2 %v4781_v0  ;;  %v624_v54 = vadd.f32 %v2603_v32, %v2565_v35 }
  0xa9   :  { %701 = vperm.xlu1 %2731, %v648_v9   ;;  %v3376_v11 = vpop.permute.xlu2 %686  ;;  %156 = vperm.xlu2 %2732, %v59_v56   ;;  %v346_v9 = vadd.s32 7, %v3222_v20 }
  0xaa   :  { %vm795_vm1 = vcmp.eq.s32.totalorder %v3230_v63, %v3376_v11 }
  0xab   :  { %v2622_v11 = vsel %vm795_vm1, 1.0, %v4790_v38  ;;  %vm190_vm1 = vcmp.eq.s32.totalorder %v3230_v63, %v3157_v19 }
  0xae   :  { %v3391_v48 = vpop.permute.xlu0 %454  ;;  %v744_v30 = vpop.permute.xlu1 %743 }
  0xaf   :  { %vm814_vm8 = vcmp.eq.s32.totalorder %v3230_v63, %v744_v30  ;;  %v2620_v30 = vsel %vm793_vm12, 1.0, %v4790_v38 }
  0xb0   :  { %v2641_v18 = vsel %vm814_vm8, 1.0, %v4790_v38 }
  0xb1   :  { %2733 = vset.pattern.permute.xlu1 %v4793_v13  ;;  %v928_v22 = vadd.f32 %v2641_v18, %v624_v54  ;;  %96 = vperm.xlu2 %2732, %v2956_v33   ;;  %v2582_v54 = vsel %vm489_vm13, 1.0, %v4790_v38  ;;  %v2584_v18 = vsel %vm491_vm14, 1.0, %v4790_v38  ;;  %vm817_vm14 = vcmp.eq.s32.totalorder %v3230_v63, %v3265_v25 }
  0xb2   :  { %460 = vperm.xlu1 %2733, %v365_v24   ;;  %v3400_v4 = vpop.permute.xlu2 %385 }
  0xb3   :  { %v3402_v28 = vand.u32 4294901760, %v928_v22  ;;  %vm492_vm3 = vcmp.eq.s32.totalorder %v3230_v63, %v3400_v4 }
  0xb5   :  { %v3405_v40 = vsub.f32 %v928_v22, %v3402_v28  ;;  %1517 = vmatmul.f32.gmra.mxu3 %v3402_v28  ;;  %v650_v22 = vadd.s32 12, %v3222_v20  ;;  %v3480_v20 = vld [vmem:[%s4743_s0 + $0x58] sm:$0xff] }
  0xb6   :  { %v3408_v57 = vpop.permute.xlu0 %457  ;;  %v652_v29 = vadd.s32 12, %v3480_v20 }
  0xb7   :  { %v139_v34 = vpop.permute.xlu1 %138  ;;  %v4760_v16 = vand.u32 4294901760, %v3405_v40 }
  0xb8   :  { %vm207_vm10 = vcmp.eq.s32.totalorder %v3230_v63, %v139_v34  ;;  %713 = vperm.xlu0 %2758, %v652_v29  }
  0xb9   :  { %2735 = vset.pattern.permute.xlu2 %v4779_v1  ;;  %v1202_v62 = vsub.f32 %v3405_v40, %v4760_v16  ;;  %v2566_v47 = vsel %vm207_vm10, 1.0, %v4790_v38 }
  0xba   :  { %2734 = vset.pattern.permute.xlu1 %v4779_v1  ;;  %704 = vperm.xlu2 %2735, %v649_v43   ;;  %v625_v52 = vadd.f32 %v2604_v46, %v2566_v47  ;;  %v2546_v43 = vsel %vm187_vm0, 1.0, %v4790_v38  ;;  %vm515_vm0 = vcmp.eq.s32.totalorder %v3230_v63, %v3391_v48 }
  0xbb   :  { %764 = vperm.xlu1 %2734, %v669_v15   ;;  %v3417_v49 = vpop.permute.xlu2 %689  ;;  %v1203_v33 = vand.u32 4294901760, %v1202_v62  ;;  %v605_v15 = vadd.f32 %v2584_v18, %v2546_v43  ;;  %v2583_v62 = vsel %vm490_vm2, 1.0, %v4790_v38 }
  0xbc   :  { %vm796_vm7 = vcmp.eq.s32.totalorder %v3230_v63, %v3417_v49 }
  0xbd   :  { %1204 = vmatmul.f32.gmra.mxu2 %v1203_v33  ;;  %v909_v47 = vadd.f32 %v2622_v11, %v605_v15 }
  0xbe   :  { %v3425_v50 = vpop.permute.xlu0 %400 }
  0xc0   :  { %v747_v17 = vpop.permute.xlu1 %746 }
  0xc1   :  { %vm815_vm11 = vcmp.eq.s32.totalorder %v3230_v63, %v747_v17  ;;  %v41_v17 = vld [vmem:[%s4743_s0 + $0x50] sm:$0xff] }
  0xc2   :  { %v2642_v26 = vsel %vm815_vm11, 1.0, %v4790_v38  ;;  %2737 = vset.pattern.permute.xlu2 %v4793_v13 }
  0xc3   :  { %2736 = vset.pattern.permute.xlu1 %v4781_v0  ;;  %v929_v59 = vadd.f32 %v2642_v26, %v625_v52  ;;  %463 = vperm.xlu2 %2737, %v366_v42   ;;  %v2585_v42 = vsel %vm492_vm3, 1.0, %v4790_v38  ;;  %v2621_v26 = vsel %vm794_vm4, 1.0, %v4790_v38 }
  0xc4   :  { %159 = vperm.xlu1 %2736, %v60_v23   ;;  %v3433_v31 = vpop.permute.xlu2 %388 }
  0xc5   :  { %v3435_v55 = vand.u32 4294901760, %v929_v59  ;;  %vm493_vm8 = vcmp.eq.s32.totalorder %v3230_v63, %v3433_v31 }
  0xc6   :  { %v3437_v2 = vpop.permute.xlu0 %466  ;;  %v2586_v31 = vsel %vm493_vm8, 1.0, %v4790_v38 }
  0xc7   :  { %4872 = vst [vmem:[#allocation8_spill] sm:$0xff] %v3435_v55  ;;  %v3440_v14 = vsub.f32 %v929_v59, %v3435_v55  ;;  %1521 = vmatmul.f32.gmra.mxu3 %v3435_v55  ;;  %v347_v59 = vadd.s32 7, %v41_v17 }
  0xc9   :  { %v3444_v3 = vpop.permute.xlu1 %445  ;;  %v4759_v56 = vand.u32 4294901760, %v3440_v14 }
  0xca   :  { %vm512_vm10 = vcmp.eq.s32.totalorder %v3230_v63, %v3444_v3 }
  0xcb   :  { %2739 = vset.pattern.permute.xlu2 %v4779_v1  ;;  %v1210_v21 = vsub.f32 %v3440_v14, %v4759_v56 }
  0xcc   :  { %2738 = vset.pattern.permute.xlu1 %v4793_v13  ;;  %767 = vperm.xlu2 %2739, %v670_v60   ;;  %v2623_v60 = vsel %vm796_vm7, 1.0, %v4790_v38 }
  0xcd   :  { %403 = vperm.xlu1 %2738, %v346_v9   ;;  %v3452_v32 = vpop.permute.xlu2 %147  ;;  %v1211_v35 = vand.u32 4294901760, %v1210_v21 }
  0xce   :  { %vm210_vm2 = vcmp.eq.s32.totalorder %v3230_v63, %v3452_v32 }
  0xcf   :  { %v73_v24 = vpop.permute.xlu0 %72  ;;  %1212 = vmatmul.f32.gmra.mxu2 %v1211_v35  ;;  %v3517_v35 = vand.u32 4294901760, %v909_v47 }
  0xd0   :  { %vm185_vm15 = vcmp.eq.s32.totalorder %v3230_v63, %v73_v24  ;;  %v606_v24 = vadd.f32 %v2585_v42, %v2547_v10 }
  0xd1   :  { %v2544_v7 = vsel %vm185_vm15, 1.0, %v4790_v38  ;;  %v3538_v15 = vsub.f32 %v909_v47, %v3517_v35  ;;  %vm818_vm15 = vcmp.eq.s32.totalorder %v3230_v63, %v3302_v58 }
  0xd2   :  { %v603_v36 = vadd.f32 %v2582_v54, %v2544_v7  ;;  %v3470_v6 = vpop.permute.xlu1 %749  ;;  %v2645_v48 = vsel %vm818_vm15, 1.0, %v4790_v38  ;;  %vm497_vm15 = vcmp.eq.s32.totalorder %v3230_v63, %v3425_v50 }
  0xd3   :  { %v4770_v42 = vand.u32 4294901760, %v3538_v15  ;;  %vm816_vm12 = vcmp.eq.s32.totalorder %v3230_v63, %v3470_v6  ;;  %v3603_v6 = vld [vmem:[%s4743_s0 + $0x118] sm:$0xff] }
  0xd4   :  { %v907_v45 = vadd.f32 %v2620_v30, %v603_v36  ;;  %2741 = vset.pattern.permute.xlu2 %v4781_v0  ;;  %v3522_v30 = vld [vmem:[%s4743_s0 + $0x100] sm:$0xff]  ;;  %v910_v36 = vadd.f32 %v2623_v60, %v606_v24  ;;  %v2643_v3 = vsel %vm816_vm12, 1.0, %v4790_v38  ;;  %vm516_vm12 = vcmp.eq.s32.totalorder %v3230_v63, %v3408_v57 }
  0xd5   :  { %2740 = vset.pattern.permute.xlu1 %v4779_v1  ;;  %162 = vperm.xlu2 %2741, %v2965_v39   ;;  %v673_v18 = vadd.s32 12, %v3522_v30  ;;  %v2609_v57 = vsel %vm516_vm12, 1.0, %v4790_v38 }
  0xd6   :  { %v3483_v34 = vand.u32 4294901760, %v907_v45  ;;  %707 = vperm.xlu1 %2740, %v650_v22   ;;  %v3490_v33 = vpop.permute.xlu2 %391  ;;  %v3543_v29 = vand.u32 4294901760, %v910_v36 }
  0xd7   :  { %v76_v23 = vpop.permute.xlu0 %75  ;;  %776 = vperm.xlu0 %2758, %v673_v18   ;;  %vm494_vm6 = vcmp.eq.s32.totalorder %v3230_v63, %v3490_v33  ;;  %v3665_v33 = vld [vmem:[%s4743_s0 + $0x108] sm:$0xff] }
  0xd8   :  { %vm186_vm5 = vcmp.eq.s32.totalorder %v3230_v63, %v76_v23  ;;  %1433 = vmatmul.f32.vlgmr.msra.gmra.mxu1 %v3483_v34  ;;  %v3497_v46 = vsub.f32 %v907_v45, %v3483_v34  ;;  %v671_v23 = vadd.s32 12, %v2965_v39  ;;  %v2548_v39 = vsel %vm189_vm9, 1.0, %v4790_v38 }
  0xd9   :  { %v2545_v4 = vsel %vm186_vm5, 1.0, %v4790_v38 }
  0xda   :  { %v604_v27 = vadd.f32 %v2583_v62, %v2545_v4  ;;  %v4777_v52 = vand.u32 4294901760, %v3497_v46  ;;  %v3548_v62 = vld [vmem:[%s4743_s0 + $0x70] sm:$0xff] }
  0xdb   :  { %v3512_v49 = vpop.permute.xlu1 %448  ;;  %v655_v12 = vadd.s32 12, %v3548_v62 }
  0xdc   :  { %v908_v9 = vadd.f32 %v2621_v26, %v604_v27  ;;  %v1034_v21 = vsub.f32 %v3497_v46, %v4777_v52  ;;  %v651_v27 = vadd.s32 12, %v41_v17  ;;  %vm513_vm3 = vcmp.eq.s32.totalorder %v3230_v63, %v3512_v49 }
  0xdd   :  { %2744 = vset.pattern.permute.xlu2 %v4793_v13 }
  0xde   :  { %v3524_v54 = vand.u32 4294901760, %v908_v9  ;;  %2743 = vset.pattern.permute.xlu1 %v4781_v0  ;;  %v1035_v7 = vand.u32 4294901760, %v1034_v21  ;;  %406 = vperm.xlu2 %2744, %v347_v59   ;;  %v3564_v59 = vsub.f32 %v910_v36, %v3543_v29 }
  0xdf   :  { %102 = vperm.xlu1 %2743, %v41_v17   ;;  %v3529_v22 = vpop.permute.xlu0 %90  ;;  %v3531_v43 = vpop.permute.xlu2 %150  ;;  %v607_v17 = vadd.f32 %v2586_v31, %v2548_v39  ;;  %722 = vperm.xlu0 %2758, %v655_v12   ;;  %v368_v31 = vadd.s32 7, %v3252_v8  ;;  %v2569_v12 = vsel %vm210_vm2, 1.0, %v4790_v38 }
  0xe0   :  { %1036 = vmatmul.f32.vlgmr.msra.gmra.mxu0 %v1035_v7  ;;  %1437 = vmatmul.f32.gmra.mxu1 %v3524_v54  ;;  %v3535_v45 = vsub.f32 %v908_v9, %v3524_v54  ;;  %v2605_v9 = vsel %vm512_vm10, 1.0, %v4790_v38  ;;  %v1050_v7 = vsub.f32 %v3538_v15, %v4770_v42  ;;  %v4769_v36 = vand.u32 4294901760, %v3564_v59 }
  0xe1   :  { %vm211_vm4 = vcmp.eq.s32.totalorder %v3230_v63, %v3531_v43  ;;  %vm191_vm10 = vcmp.eq.s32.totalorder %v3230_v63, %v3529_v22 }
  0xe2   :  { %v4771_v11 = vand.u32 4294901760, %v3535_v45 }
  0xe4   :  { %v1042_v47 = vsub.f32 %v3535_v45, %v4771_v11  ;;  %v693_v4 = vpop.permute.xlu1 %692 }
  0xe5   :  { %vm797_vm11 = vcmp.eq.s32.totalorder %v3230_v63, %v693_v4  ;;  %v1051_v4 = vand.u32 4294901760, %v1050_v7 }
  0xe6   :  { %v1043_v26 = vand.u32 4294901760, %v1042_v47  ;;  %v2624_v10 = vsel %vm797_vm11, 1.0, %v4790_v38  ;;  %2746 = vset.pattern.permute.xlu2 %v4779_v1  ;;  %v2608_v47 = vsel %vm515_vm0, 1.0, %v4790_v38 }
  0xe7   :  { %2745 = vset.pattern.permute.xlu1 %v4779_v1  ;;  %v142_v60 = vpop.permute.xlu0 %141  ;;  %710 = vperm.xlu2 %2746, %v651_v27   ;;  %v911_v25 = vadd.f32 %v2624_v10, %v607_v17  ;;  %v1058_v10 = vsub.f32 %v3564_v59, %v4769_v36 }
  0xe8   :  { %vm208_vm13 = vcmp.eq.s32.totalorder %v3230_v63, %v142_v60  ;;  %770 = vperm.xlu1 %2745, %v671_v23   ;;  %1044 = vmatmul.f32.gmra.mxu0 %v1043_v26  ;;  %v759_v24 = vpop.permute.xlu2 %758  ;;  %v2644_v23 = vsel %vm817_vm14, 1.0, %v4790_v38  ;;  %v676_v60 = vadd.s32 12, %v3603_v6 }
  0xe9   :  { %v2567_v21 = vsel %vm208_vm13, 1.0, %v4790_v38  ;;  %1441 = vmatmul.f32.gmra.mxu1 %v3517_v35  ;;  %v3607_v27 = vand.u32 4294901760, %v911_v25  ;;  %vm819_vm8 = vcmp.eq.s32.totalorder %v3230_v63, %v759_v24  ;;  %v2587_v24 = vsel %vm494_vm6, 1.0, %v4790_v38 }
  0xea   :  { %v626_v18 = vadd.f32 %v2605_v9, %v2567_v21  ;;  %v2606_v9 = vsel %vm513_vm3, 1.0, %v4790_v38  ;;  %v2570_v21 = vsel %vm211_vm4, 1.0, %v4790_v38  ;;  %785 = vperm.xlu0 %2758, %v676_v60   ;;  %v348_v60 = vadd.s32 7, %v3480_v20 }
  0xec   :  { %v930_v58 = vadd.f32 %v2643_v3, %v626_v18  ;;  %v3635_v3 = vsub.f32 %v911_v25, %v3607_v27  ;;  %v2549_v25 = vsel %vm190_vm1, 1.0, %v4790_v38 }
  0xed   :  { %v452_v26 = vpop.permute.xlu1 %451 }
  0xee   :  { %v3611_v32 = vand.u32 4294901760, %v930_v58  ;;  %vm514_vm5 = vcmp.eq.s32.totalorder %v3230_v63, %v452_v26 }
  0xef   :  { %v145_v39 = vpop.permute.xlu0 %144  ;;  %v2607_v17 = vsel %vm514_vm5, 1.0, %v4790_v38  ;;  %2748 = vset.pattern.permute.xlu2 %v4781_v0 }
  0xf0   :  { %4873 = vst [vmem:[#allocation9_spill] sm:$0xff] %v3611_v32  ;;  %vm209_vm7 = vcmp.eq.s32.totalorder %v3230_v63, %v145_v39  ;;  %2747 = vset.pattern.permute.xlu1 %v4793_v13  ;;  %1052 = vmatmul.f32.gmra.mxu0 %v1051_v4  ;;  %v3625_v43 = vsub.f32 %v930_v58, %v3611_v32 }
  0xf1   :  { %v628_v7 = vadd.f32 %v2607_v17, %v2569_v12  ;;  %v2568_v18 = vsel %vm209_vm7, 1.0, %v4790_v38  ;;  %469 = vperm.xlu1 %2747, %v368_v31   ;;  %1445 = vmatmul.f32.gmra.mxu1 %v3543_v29  ;;  %v3639_v4 = vpop.permute.xlu2 %153  ;;  %v629_v39 = vadd.f32 %v2608_v47, %v2570_v21  ;;  %v1059_v17 = vand.u32 4294901760, %v1058_v10 }
  0xf2   :  { %v627_v58 = vadd.f32 %v2606_v9, %v2568_v18  ;;  %1525 = vmatmul.f32.gmra.mxu3 %v3611_v32  ;;  %v4758_v49 = vand.u32 4294901760, %v3625_v43  ;;  %105 = vperm.xlu2 %2748, %v3480_v20   ;;  %v4768_v18 = vand.u32 4294901760, %v3635_v3  ;;  %v672_v10 = vadd.s32 12, %v3252_v8 }
  0xf3   :  { %v932_v26 = vadd.f32 %v2645_v48, %v628_v7  ;;  %v2646_v48 = vsel %vm819_vm8, 1.0, %v4790_v38  ;;  %v370_v21 = vadd.s32 7, %v3665_v33  ;;  %2764 = vset.pattern.permute.xlu0 %v4793_v13  ;;  %vm212_vm13 = vcmp.eq.s32.totalorder %v3230_v63, %v3639_v4 }
  0xf4   :  { %v931_v31 = vadd.f32 %v2644_v23, %v627_v58  ;;  %v1218_v12 = vsub.f32 %v3625_v43, %v4758_v49  ;;  %v608_v23 = vadd.f32 %v2587_v24, %v2549_v25  ;;  %v1066_v24 = vsub.f32 %v3635_v3, %v4768_v18 }
  0xf5   :  { %v3657_v9 = vand.u32 4294901760, %v932_v26  ;;  %475 = vperm.xlu0 %2764, %v370_v21   ;;  %v2571_v4 = vsel %vm212_vm13, 1.0, %v4790_v38 }
  0xf6   :  { %v3659_v19 = vand.u32 4294901760, %v931_v31  ;;  %v1219_v7 = vand.u32 4294901760, %v1218_v12  ;;  %v696_v58 = vpop.permute.xlu1 %695  ;;  %v933_v12 = vadd.f32 %v2646_v48, %v629_v39 }
  0xf7   :  { %4874 = vst [vmem:[#allocation10_spill] sm:$0xff] %v3657_v9  ;;  %vm798_vm9 = vcmp.eq.s32.totalorder %v3230_v63, %v696_v58  ;;  %v3668_v47 = vpop.permute.xlu0 %99 }
  0xf8   :  { %4875 = vst [vmem:[#allocation11_spill] sm:$0xff] %v3659_v19  ;;  %1060 = vmatmul.f32.gmra.mxu0 %v1059_v17  ;;  %1220 = vmatmul.f32.gmra.mxu2 %v1219_v7  ;;  %v3671_v20 = vsub.f32 %v931_v31, %v3659_v19  ;;  %v2625_v49 = vsel %vm798_vm9, 1.0, %v4790_v38  ;;  %v3683_v17 = vsub.f32 %v932_v26, %v3657_v9  ;;  %v3694_v48 = vand.u32 4294901760, %v933_v12 }
  0xf9   :  { %409 = vperm.xlu1 %2747, %v348_v60   ;;  %1449 = vmatmul.f32.gmra.mxu1 %v3607_v27  ;;  %v912_v25 = vadd.f32 %v2625_v49, %v608_v23  ;;  %v1067_v26 = vand.u32 4294901760, %v1066_v24  ;;  %vm194_vm12 = vcmp.eq.s32.totalorder %v3230_v63, %v3668_v47 }
  0xfa   :  { %1529 = vmatmul.f32.gmra.mxu3 %v3659_v19  ;;  %v4761_v31 = vand.u32 4294901760, %v3671_v20  ;;  %4876 = vst [vmem:[#allocation12_spill] sm:$0xff] %v3683_v17  ;;  %v3685_v8 = vpop.permute.xlu2 %397  ;;  %2749 = vset.pattern.permute.xlu2 %v4779_v1  ;;  %v4762_v23 = vand.u32 4294901760, %v3683_v17  ;;  %v3707_v21 = vsub.f32 %v933_v12, %v3694_v48 }
  0xfb   :  { %v3689_v39 = vand.u32 4294901760, %v912_v25  ;;  %773 = vperm.xlu2 %2749, %v672_v10   ;;  %4877 = vst [vmem:[#allocation13_spill] sm:$0xff] %v3694_v48  ;;  %v369_v10 = vadd.s32 7, %v3522_v30  ;;  %vm496_vm2 = vcmp.eq.s32.totalorder %v3230_v63, %v3685_v8 }
  0xfc   :  { %v1226_v49 = vsub.f32 %v3671_v20, %v4761_v31  ;;  %4878 = vst [vmem:[#allocation14_spill] sm:$0xff] %v3707_v21  ;;  %v1234_v24 = vsub.f32 %v3683_v17, %v4762_v23  ;;  %v43_v23 = vld [vmem:[%s4743_s0 + $0x60] sm:$0xff]  ;;  %v2589_v8 = vsel %vm496_vm2, 1.0, %v4790_v38 }
  0xfd   :  { %v3697_v60 = vsub.f32 %v912_v25, %v3689_v39 }
  0xfe   :  { %v1227_v7 = vand.u32 4294901760, %v1226_v49 }
  0xff   :  { %v3700_v56 = vpop.permute.xlu0 %165  ;;  %v4765_v16 = vand.u32 4294901760, %v3697_v60 }
 0x100   :  { %v395_v58 = vpop.permute.xlu1 %394  ;;  %1068 = vmatmul.f32.gmra.mxu0 %v1067_v26  ;;  %1228 = vmatmul.f32.gmra.mxu2 %v1227_v7  ;;  %v4766_v26 = vand.u32 4294901760, %v3707_v21  ;;  %v2550_v7 = vsel %vm191_vm10, 1.0, %v4790_v38 }
 0x101   :  { %2750 = vset.pattern.permute.xlu1 %v4781_v0  ;;  %1453 = vmatmul.f32.gmra.mxu1 %v3689_v39  ;;  %v1074_v25 = vsub.f32 %v3697_v60, %v4765_v16  ;;  %vm495_vm11 = vcmp.eq.s32.totalorder %v3230_v63, %v395_v58  ;;  %v630_v16 = vadd.f32 %v2609_v57, %v2571_v4 }
 0x102   :  { %1533 = vmatmul.f32.gmra.mxu3 %v3657_v9  ;;  %168 = vperm.xlu1 %2750, %v3522_v30   ;;  %v1235_v30 = vand.u32 4294901760, %v1234_v24  ;;  %v2588_v31 = vsel %vm495_vm11, 1.0, %v4790_v38  ;;  %v1242_v24 = vsub.f32 %v3707_v21, %v4766_v26 }
 0x103   :  { %v3720_v49 = vpop.permute.xlu2 %156  ;;  %2751 = vset.pattern.permute.xlu2 %v4793_v13  ;;  %v1075_v12 = vand.u32 4294901760, %v1074_v25  ;;  %v609_v25 = vadd.f32 %v2588_v31, %v2550_v7  ;;  %v653_v7 = vadd.s32 12, %v43_v23 }
 0x104   :  { %472 = vperm.xlu2 %2751, %v369_v10   ;;  %v349_v10 = vadd.s32 7, %v43_v23  ;;  %v1243_v31 = vand.u32 4294901760, %v1242_v24  ;;  %vm213_vm7 = vcmp.eq.s32.totalorder %v3230_v63, %v3720_v49 }
 0x107   :  { %v3729_v22 = vpop.permute.xlu0 %174 }
 0x108   :  { %1076 = vmatmul.f32.gmra.mxu0 %v1075_v12  ;;  %1236 = vmatmul.f32.gmra.mxu2 %v1235_v30 }
 0x109   :  { %v699_v58 = vpop.permute.xlu1 %698 }
 0x10a   :  { %1537 = vmatmul.f32.gmra.mxu3 %v3694_v48  ;;  %vm799_vm14 = vcmp.eq.s32.totalorder %v3230_v63, %v699_v58  ;;  %108 = vperm.xlu1 %2750, %v43_v23  }
 0x10b   :  { %v2626_v12 = vsel %vm799_vm14, 1.0, %v4790_v38  ;;  %v97_v44 = vpop.permute.xlu2 %96 }
 0x10c   :  { %v913_v30 = vadd.f32 %v2626_v12, %v609_v25  ;;  %412 = vperm.xlu2 %2751, %v349_v10   ;;  %vm193_vm0 = vcmp.eq.s32.totalorder %v3230_v63, %v97_v44 }
 0x10d   :  { %v2552_v44 = vsel %vm193_vm0, 1.0, %v4790_v38 }
 0x10e   :  { %v3743_v5 = vand.u32 4294901760, %v913_v30 }
 0x110   :  { %v3746_v58 = vsub.f32 %v913_v30, %v3743_v5  ;;  %1457 = vmatmul.f32.gmra.mxu1 %v3743_v5  ;;  %1244 = vmatmul.f32.gmra.mxu2 %v1243_v31  ;;  %v762_v26 = vpop.permute.xlu0 %761  ;;  %v2590_v30 = vsel %vm497_vm15, 1.0, %v4790_v38 }
 0x111   :  { %vm820_vm1 = vcmp.eq.s32.totalorder %v3230_v63, %v762_v26  ;;  %v611_v57 = vadd.f32 %v2590_v30, %v2552_v44 }
 0x112   :  { %2752 = vset.pattern.permute.xlu1 %v4779_v1  ;;  %v94_v10 = vpop.permute.xlu1 %93  ;;  %v4767_v23 = vand.u32 4294901760, %v3746_v58  ;;  %v2647_v25 = vsel %vm820_vm1, 1.0, %v4790_v38 }
 0x113   :  { %716 = vperm.xlu1 %2752, %v653_v7   ;;  %v934_v24 = vadd.f32 %v2647_v25, %v630_v16  ;;  %vm192_vm3 = vcmp.eq.s32.totalorder %v3230_v63, %v94_v10  ;;  %v44_v10 = vld [vmem:[%s4743_s0 + $0x68] sm:$0xff] }
 0x114   :  { %v1082_v12 = vsub.f32 %v3746_v58, %v4767_v23  ;;  %v705_v50 = vpop.permute.xlu2 %704  ;;  %2753 = vset.pattern.permute.xlu2 %v4781_v0  ;;  %v2551_v31 = vsel %vm192_vm3, 1.0, %v4790_v38  ;;  %vm519_vm3 = vcmp.eq.s32.totalorder %v3230_v63, %v3437_v2 }
 0x115   :  { %v3764_v26 = vand.u32 4294901760, %v934_v24  ;;  %vm801_vm4 = vcmp.eq.s32.totalorder %v3230_v63, %v705_v50  ;;  %171 = vperm.xlu2 %2753, %v3665_v33   ;;  %v610_v30 = vadd.f32 %v2589_v8, %v2551_v31 }
 0x116   :  { %v1083_v16 = vand.u32 4294901760, %v1082_v12  ;;  %v2628_v7 = vsel %vm801_vm4, 1.0, %v4790_v38 }
 0x117   :  { %4879 = vst [vmem:[#allocation15_spill] sm:$0xff] %v3764_v26  ;;  %v3770_v4 = vsub.f32 %v934_v24, %v3764_v26  ;;  %1541 = vmatmul.f32.gmra.mxu3 %v3764_v26  ;;  %v350_v24 = vadd.s32 7, %v44_v10  ;;  %v915_v44 = vadd.f32 %v2628_v7, %v611_v57  ;;  %v674_v57 = vadd.s32 12, %v3665_v33 }
 0x118   :  { %1084 = vmatmul.f32.gmra.mxu0 %v1083_v16 }
 0x119   :  { %4880 = vst [vmem:[#allocation16_spill] sm:$0xff] %v3770_v4  ;;  %v4772_v25 = vand.u32 4294901760, %v3770_v4  ;;  %v3787_v42 = vand.u32 4294901760, %v915_v44 }
 0x11b   :  { %2754 = vset.pattern.permute.xlu1 %v4781_v0  ;;  %v702_v12 = vpop.permute.xlu1 %701  ;;  %v1250_v50 = vsub.f32 %v3770_v4, %v4772_v25  ;;  %v3797_v31 = vsub.f32 %v915_v44, %v3787_v42  ;;  %v351_v25 = vadd.s32 7, %v3548_v62 }
 0x11c   :  { %vm800_vm5 = vcmp.eq.s32.totalorder %v3230_v63, %v702_v12  ;;  %111 = vperm.xlu1 %2754, %v44_v10  }
 0x11d   :  { %v2627_v16 = vsel %vm800_vm5, 1.0, %v4790_v38  ;;  %v1251_v18 = vand.u32 4294901760, %v1250_v50  ;;  %2755 = vset.pattern.permute.xlu2 %v4793_v13  ;;  %v464_v36 = vpop.permute.xlu2 %463  ;;  %vm216_vm5 = vcmp.eq.s32.totalorder %v3230_v63, %v3700_v56 }
 0x11e   :  { %v914_v23 = vadd.f32 %v2627_v16, %v610_v30  ;;  %415 = vperm.xlu2 %2755, %v350_v24   ;;  %v654_v24 = vadd.s32 12, %v44_v10  ;;  %v371_v10 = vadd.s32 7, %v3287_v53  ;;  %v2572_v16 = vsel %vm213_vm7, 1.0, %v4790_v38 }
 0x11f   :  { %1252 = vmatmul.f32.gmra.mxu2 %v1251_v18  ;;  %vm518_vm9 = vcmp.eq.s32.totalorder %v3230_v63, %v464_v36 }
 0x120   :  { %v3789_v11 = vand.u32 4294901760, %v914_v23 }
 0x122   :  { %v3793_v8 = vsub.f32 %v914_v23, %v3789_v11  ;;  %1461 = vmatmul.f32.gmra.mxu1 %v3789_v11  ;;  %v4773_v23 = vand.u32 4294901760, %v3797_v31 }
 0x124   :  { %2756 = vset.pattern.permute.xlu1 %v4779_v1  ;;  %v461_v7 = vpop.permute.xlu1 %460  ;;  %v4774_v12 = vand.u32 4294901760, %v3793_v8  ;;  %v1098_v50 = vsub.f32 %v3797_v31, %v4773_v23 }
 0x125   :  { %779 = vperm.xlu1 %2756, %v674_v57   ;;  %vm517_vm6 = vcmp.eq.s32.totalorder %v3230_v63, %v461_v7 }
 0x126   :  { %v1090_v18 = vsub.f32 %v3793_v8, %v4774_v12  ;;  %2757 = vset.pattern.permute.xlu2 %v4779_v1  ;;  %v768_v30 = vpop.permute.xlu2 %767  ;;  %v2610_v44 = vsel %vm517_vm6, 1.0, %v4790_v38 }
 0x127   :  { %719 = vperm.xlu2 %2757, %v654_v24   ;;  %v631_v7 = vadd.f32 %v2610_v44, %v2572_v16  ;;  %vm822_vm10 = vcmp.eq.s32.totalorder %v3230_v63, %v768_v30 }
 0x128   :  { %v1091_v33 = vand.u32 4294901760, %v1090_v18  ;;  %v1099_v18 = vand.u32 4294901760, %v1098_v50 }
 0x12a   :  { %1092 = vmatmul.f32.gmra.mxu0 %v1091_v33  ;;  %1465 = vmatmul.f32.gmra.mxu1 %v3787_v42 }
 0x12d   :  { %2759 = vset.pattern.permute.xlu1 %v4793_v13  ;;  %v765_v57 = vpop.permute.xlu1 %764 }
 0x12e   :  { %vm821_vm8 = vcmp.eq.s32.totalorder %v3230_v63, %v765_v57  ;;  %478 = vperm.xlu1 %2759, %v371_v10   ;;  %v3834_v10 = vld [vmem:[%s4743_s0 + $0x120] sm:$0xff]  ;;  %v675_v57 = vadd.s32 12, %v3287_v53 }
 0x12f   :  { %v2648_v49 = vsel %vm821_vm8, 1.0, %v4790_v38  ;;  %2760 = vset.pattern.permute.xlu2 %v4781_v0  ;;  %v3825_v23 = vpop.permute.xlu2 %162  ;;  %v373_v50 = vadd.s32 7, %v3834_v10 }
 0x130   :  { %v935_v24 = vadd.f32 %v2648_v49, %v631_v7  ;;  %114 = vperm.xlu2 %2760, %v3548_v62   ;;  %v2611_v62 = vsel %vm518_vm9, 1.0, %v4790_v38  ;;  %v2649_v7 = vsel %vm822_vm10, 1.0, %v4790_v38  ;;  %vm215_vm2 = vcmp.eq.s32.totalorder %v3230_v63, %v3825_v23 }
 0x131   :  { %484 = vperm.xlu0 %2764, %v373_v50  }
 0x132   :  { %v3821_v33 = vand.u32 4294901760, %v935_v24  ;;  %1100 = vmatmul.f32.gmra.mxu0 %v1099_v18 }
 0x134   :  { %4881 = vst [vmem:[#allocation17_spill] sm:$0xff] %v3821_v33  ;;  %v3828_v44 = vsub.f32 %v935_v24, %v3821_v33  ;;  %1545 = vmatmul.f32.gmra.mxu3 %v3821_v33 }
 0x136   :  { %4882 = vst [vmem:[#allocation18_spill] sm:$0xff] %v3828_v44  ;;  %418 = vperm.xlu1 %2759, %v351_v25   ;;  %v160_v36 = vpop.permute.xlu1 %159  ;;  %v4776_v16 = vand.u32 4294901760, %v3828_v44 }
 0x137   :  { %vm214_vm11 = vcmp.eq.s32.totalorder %v3230_v63, %v160_v36 }
 0x138   :  { %v2573_v49 = vsel %vm214_vm11, 1.0, %v4790_v38  ;;  %v1258_v30 = vsub.f32 %v3828_v44, %v4776_v16  ;;  %2761 = vset.pattern.permute.xlu2 %v4779_v1  ;;  %v407_v12 = vpop.permute.xlu2 %406 }
 0x139   :  { %v632_v24 = vadd.f32 %v2611_v62, %v2573_v49  ;;  %782 = vperm.xlu2 %2761, %v675_v57   ;;  %v372_v62 = vadd.s32 7, %v3603_v6  ;;  %2771 = vset.pattern.permute.xlu0 %v4781_v0  ;;  %vm499_vm15 = vcmp.eq.s32.totalorder %v3230_v63, %v407_v12 }
 0x13a   :  { %v1259_v25 = vand.u32 4294901760, %v1258_v30 }
 0x13b   :  { %v936_v18 = vadd.f32 %v2649_v7, %v632_v24  ;;  %v2553_v24 = vsel %vm194_vm12, 1.0, %v4790_v38 }
 0x13c   :  { %1260 = vmatmul.f32.gmra.mxu2 %v1259_v25 }
 0x13d   :  { %v3848_v53 = vand.u32 4294901760, %v936_v18 }
 0x13e   :  { %2762 = vset.pattern.permute.xlu1 %v4781_v0 }
 0x13f   :  { %4883 = vst [vmem:[#allocation19_spill] sm:$0xff] %v3848_v53  ;;  %177 = vperm.xlu1 %2762, %v3603_v6   ;;  %1549 = vmatmul.f32.gmra.mxu3 %v3848_v53  ;;  %v404_v50 = vpop.permute.xlu1 %403  ;;  %v3854_v36 = vsub.f32 %v936_v18, %v3848_v53  ;;  %v46_v6 = vld [vmem:[%s4743_s0 + $0x78] sm:$0xff]  ;;  %v677_v53 = vadd.s32 12, %v3834_v10 }
 0x140   :  { %vm498_vm13 = vcmp.eq.s32.totalorder %v3230_v63, %v404_v50  ;;  %v352_v47 = vadd.s32 7, %v46_v6  ;;  %v656_v16 = vadd.s32 12, %v46_v6 }
 0x141   :  { %4884 = vst [vmem:[#allocation20_spill] sm:$0xff] %v3854_v36  ;;  %v4775_v57 = vand.u32 4294901760, %v3854_v36  ;;  %2763 = vset.pattern.permute.xlu2 %v4793_v13  ;;  %v711_v30 = vpop.permute.xlu2 %710  ;;  %v2591_v25 = vsel %vm498_vm13, 1.0, %v4790_v38 }
 0x142   :  { %481 = vperm.xlu2 %2763, %v372_v62   ;;  %v612_v50 = vadd.f32 %v2591_v25, %v2553_v24  ;;  %v3875_v62 = vld [vmem:[%s4743_s0 + $0x128] sm:$0xff]  ;;  %vm803_vm0 = vcmp.eq.s32.totalorder %v3230_v63, %v711_v30 }
 0x143   :  { %v1266_v7 = vsub.f32 %v3854_v36, %v4775_v57  ;;  %183 = vperm.xlu0 %2771, %v3875_v62  }
 0x145   :  { %v1267_v49 = vand.u32 4294901760, %v1266_v7 }
 0x147   :  { %117 = vperm.xlu1 %2762, %v46_v6   ;;  %1268 = vmatmul.f32.gmra.mxu2 %v1267_v49 }
 0x148   :  { %v708_v18 = vpop.permute.xlu1 %707 }
 0x149   :  { %vm802_vm14 = vcmp.eq.s32.totalorder %v3230_v63, %v708_v18 }
 0x14a   :  { %v2629_v57 = vsel %vm802_vm14, 1.0, %v4790_v38  ;;  %421 = vperm.xlu2 %2763, %v352_v47   ;;  %v2630_v47 = vsel %vm803_vm0, 1.0, %v4790_v38 }
 0x14b   :  { %v916_v7 = vadd.f32 %v2629_v57, %v612_v50  ;;  %v2592_v57 = vsel %vm499_vm15, 1.0, %v4790_v38  ;;  %2775 = vset.pattern.permute.xlu0 %v4779_v1 }
 0x14c   :  { %v3881_v49 = vpop.permute.xlu2 %105 }
 0x14d   :  { %v3879_v52 = vand.u32 4294901760, %v916_v7  ;;  %vm196_vm8 = vcmp.eq.s32.totalorder %v3230_v63, %v3881_v49 }
 0x14f   :  { %v3885_v24 = vsub.f32 %v916_v7, %v3879_v52  ;;  %2765 = vset.pattern.permute.xlu1 %v4779_v1  ;;  %1469 = vmatmul.f32.gmra.mxu1 %v3879_v52 }
 0x150   :  { %725 = vperm.xlu1 %2765, %v656_v16   ;;  %v3903_v16 = vld [vmem:[%s4743_s0 + $0x88] sm:$0xff] }
 0x151   :  { %v103_v25 = vpop.permute.xlu1 %102  ;;  %v4778_v6 = vand.u32 4294901760, %v3885_v24  ;;  %v658_v50 = vadd.s32 12, %v3903_v16 }
 0x152   :  { %vm195_vm1 = vcmp.eq.s32.totalorder %v3230_v63, %v103_v25  ;;  %2766 = vset.pattern.permute.xlu2 %v4781_v0 }
 0x153   :  { %v2554_v12 = vsel %vm195_vm1, 1.0, %v4790_v38  ;;  %v1106_v18 = vsub.f32 %v3885_v24, %v4778_v6  ;;  %180 = vperm.xlu2 %2766, %v3834_v10   ;;  %v47_v6 = vld [vmem:[%s4743_s0 + $0x80] sm:$0xff]  ;;  %731 = vperm.xlu0 %2775, %v658_v50  }
 0x154   :  { %v613_v30 = vadd.f32 %v2592_v57, %v2554_v12  ;;  %v2574_v57 = vsel %vm215_vm2, 1.0, %v4790_v38  ;;  %v353_v23 = vadd.s32 7, %v47_v6  ;;  %v657_v10 = vadd.s32 12, %v47_v6 }
 0x155   :  { %v1107_v7 = vand.u32 4294901760, %v1106_v18  ;;  %v774_v1 = vpop.permute.xlu2 %773 }
 0x156   :  { %v917_v25 = vadd.f32 %v2630_v47, %v613_v30  ;;  %v2612_v47 = vsel %vm519_vm3, 1.0, %v4790_v38  ;;  %vm824_vm6 = vcmp.eq.s32.totalorder %v3230_v63, %v774_v1  ;;  %v714_v1 = vpop.permute.xlu0 %713 }
 0x157   :  { %1108 = vmatmul.f32.gmra.mxu0 %v1107_v7  ;;  %v633_v50 = vadd.f32 %v2612_v47, %v2574_v57  ;;  %vm804_vm9 = vcmp.eq.s32.totalorder %v3230_v63, %v714_v1 }
 0x158   :  { %v3915_v12 = vand.u32 4294901760, %v917_v25  ;;  %2767 = vset.pattern.permute.xlu1 %v4781_v0 }
 0x159   :  { %120 = vperm.xlu1 %2767, %v47_v6  }
 0x15a   :  { %v3920_v18 = vsub.f32 %v917_v25, %v3915_v12  ;;  %1473 = vmatmul.f32.gmra.mxu1 %v3915_v12  ;;  %v771_v30 = vpop.permute.xlu1 %770 }
 0x15b   :  { %vm823_vm4 = vcmp.eq.s32.totalorder %v3230_v63, %v771_v30  ;;  %2768 = vset.pattern.permute.xlu2 %v4793_v13  ;;  %v4887_v30 = vmov 2  }
 0x15c   :  { %v2650_v2 = vsel %vm823_vm4, 1.0, %v4790_v38  ;;  %v4789_v7 = vand.u32 4294901760, %v3920_v18  ;;  %424 = vperm.xlu2 %2768, %v353_v23  }
 0x15d   :  { %v937_v0 = vadd.f32 %v2650_v2, %v633_v50  ;;  %v4185_v21 = vpop.f32.mrf.mxu0 }
 0x15e   :  { %v1114_v25 = vsub.f32 %v3920_v18, %v4789_v7  ;;  %v473_v26 = vpop.permute.xlu2 %472 }
 0x15f   :  { %v3931_v33 = vand.u32 4294901760, %v937_v0  ;;  %vm521_vm11 = vcmp.eq.s32.totalorder %v3230_v63, %v473_v26 }
 0x160   :  { %v1115_v57 = vand.u32 4294901760, %v1114_v25  ;;  %v2651_v25 = vsel %vm824_vm6, 1.0, %v4790_v38 }
 0x161   :  { %4885 = vst [vmem:[#allocation21_spill] sm:$0xff] %v3931_v33  ;;  %v3934_v47 = vsub.f32 %v937_v0, %v3931_v33  ;;  %2769 = vset.pattern.permute.xlu1 %v4887_v30  ;;  %1553 = vmatmul.f32.gmra.mxu3 %v3931_v33  ;;  %v2575_v0 = vsel %vm216_vm5, 1.0, %v4790_v38 }
 0x162   :  { %788 = vperm.xlu1 %2769, %v677_v53   ;;  %1116 = vmatmul.f32.gmra.mxu0 %v1115_v57  ;;  %v374_v57 = vadd.s32 7, %v3875_v62 }
 0x163   :  { %4886 = vst [vmem:[#allocation22_spill] sm:$0xff] %v3934_v47  ;;  %v470_v23 = vpop.permute.xlu1 %469  ;;  %v4792_v50 = vand.u32 4294901760, %v3934_v47 }
 0x164   :  { %vm520_vm7 = vcmp.eq.s32.totalorder %v3230_v63, %v470_v23  ;;  %2770 = vset.pattern.permute.xlu2 %v4887_v30 }
 0x165   :  { %v2613_v2 = vsel %vm520_vm7, 1.0, %v4790_v38  ;;  %v1274_v56 = vsub.f32 %v3934_v47, %v4792_v50  ;;  %728 = vperm.xlu2 %2770, %v657_v10   ;;  %v777_v50 = vpop.permute.xlu0 %776  ;;  %vm219_vm7 = vcmp.eq.s32.totalorder %v3230_v63, %v3729_v22 }
 0x166   :  { %v634_v53 = vadd.f32 %v2613_v2, %v2575_v0  ;;  %v3951_v7 = vpop.permute.xlu2 %412  ;;  %v4890_v2 = vmov 0.0   ;;  %vm825_vm12 = vcmp.eq.s32.totalorder %v3230_v63, %v777_v50 }
 0x167   :  { %v1275_v6 = vand.u32 4294901760, %v1274_v56  ;;  %v2631_v56 = vsel %vm804_vm9, 1.0, %v4890_v2  ;;  %v2652_v26 = vsel %vm825_vm12, 1.0, %v4890_v2  ;;  %vm501_vm15 = vcmp.eq.s32.totalorder %v3230_v63, %v3951_v7 }
 0x168   :  { %v938_v23 = vadd.f32 %v2651_v25, %v634_v53  ;;  %v2555_v25 = vsel %vm196_vm8, 1.0, %v4890_v2 }
 0x169   :  { %1276 = vmatmul.f32.gmra.mxu2 %v1275_v6  ;;  %v4891_v6 = vmov 0  }
 0x16a   :  { %v3955_v38 = vand.u32 4294901760, %v938_v23  ;;  %2772 = vset.pattern.permute.xlu1 %v4793_v13 }
 0x16b   :  { %487 = vperm.xlu1 %2772, %v374_v57   ;;  %v410_v0 = vpop.permute.xlu1 %409  ;;  %v354_v57 = vadd.s32 7, %v3903_v16 }
 0x16c   :  { %4888 = vst [vmem:[#allocation23_spill] sm:$0xff] %v3955_v38  ;;  %v3960_v10 = vsub.f32 %v938_v23, %v3955_v38  ;;  %vm500_vm10 = vcmp.eq.s32.totalorder %v3230_v63, %v410_v0  ;;  %1557 = vmatmul.f32.gmra.mxu3 %v3955_v38 }
 0x16d   :  { %v2593_v49 = vsel %vm500_vm10, 1.0, %v4890_v2  ;;  %2773 = vset.pattern.permute.xlu2 %v4891_v6 }
 0x16e   :  { %4889 = vst [vmem:[#allocation24_spill] sm:$0xff] %v3960_v10  ;;  %v614_v53 = vadd.f32 %v2593_v49, %v2555_v25  ;;  %v4796_v1 = vand.u32 4294901760, %v3960_v10  ;;  %123 = vperm.xlu2 %2773, %v3903_v16   ;;  %v2614_v49 = vsel %vm521_vm11, 1.0, %v4890_v2 }
 0x16f   :  { %v3975_v13 = vpop.permute.xlu2 %171 }
 0x170   :  { %v918_v23 = vadd.f32 %v2631_v56, %v614_v53  ;;  %v1282_v0 = vsub.f32 %v3960_v10, %v4796_v1  ;;  %v678_v53 = vadd.s32 12, %v3875_v62  ;;  %v49_v62 = vld [vmem:[%s4743_s0 + $0x90] sm:$0xff]  ;;  %vm218_vm4 = vcmp.eq.s32.totalorder %v3230_v63, %v3975_v13 }
 0x172   :  { %v3977_v38 = vand.u32 4294901760, %v918_v23  ;;  %v1283_v25 = vand.u32 4294901760, %v1282_v0 }
 0x173   :  { %427 = vperm.xlu1 %2772, %v354_v57  }
 0x174   :  { %1284 = vmatmul.f32.gmra.mxu2 %v1283_v25  ;;  %1477 = vmatmul.f32.gmra.mxu1 %v3977_v38  ;;  %v169_v16 = vpop.permute.xlu1 %168  ;;  %v3983_v56 = vsub.f32 %v918_v23, %v3977_v38 }
 0x175   :  { %vm217_vm13 = vcmp.eq.s32.totalorder %v3230_v63, %v169_v16  ;;  %v3997_v16 = vpop.permute.xlu0 %722 }
 0x176   :  { %v2576_v0 = vsel %vm217_vm13, 1.0, %v4890_v2  ;;  %v4799_v50 = vand.u32 4294901760, %v3983_v56  ;;  %2774 = vset.pattern.permute.xlu2 %v4887_v30  ;;  %vm807_vm11 = vcmp.eq.s32.totalorder %v3230_v63, %v3997_v16 }
 0x177   :  { %v635_v57 = vadd.f32 %v2614_v49, %v2576_v0  ;;  %791 = vperm.xlu2 %2774, %v678_v53  }
 0x178   :  { %v1122_v25 = vsub.f32 %v3983_v56, %v4799_v50  ;;  %v416_v49 = vpop.permute.xlu2 %415  ;;  %v4894_v50 = vmov 1  }
 0x179   :  { %v939_v23 = vadd.f32 %v2652_v26, %v635_v57  ;;  %v355_v26 = vadd.s32 7, %v49_v62  ;;  %vm502_vm1 = vcmp.eq.s32.totalorder %v3230_v63, %v416_v49 }
 0x17a   :  { %v1123_v1 = vand.u32 4294901760, %v1122_v25  ;;  %v659_v25 = vadd.s32 12, %v49_v62 }
 0x17b   :  { %v3999_v33 = vand.u32 4294901760, %v939_v23  ;;  %2776 = vset.pattern.permute.xlu1 %v4891_v6 }
 0x17c   :  { %126 = vperm.xlu1 %2776, %v49_v62   ;;  %1124 = vmatmul.f32.gmra.mxu0 %v1123_v1  ;;  %v109_v0 = vpop.permute.xlu1 %108 }
 0x17d   :  { %4892 = vst [vmem:[#allocation25_spill] sm:$0xff] %v3999_v33  ;;  %1561 = vmatmul.f32.gmra.mxu3 %v3999_v33  ;;  %v4004_v53 = vsub.f32 %v939_v23, %v3999_v33  ;;  %vm197_vm14 = vcmp.eq.s32.totalorder %v3230_v63, %v109_v0  ;;  %v4015_v33 = vpop.permute.xlu0 %785  ;;  %v2594_v0 = vsel %vm501_vm15, 1.0, %v4890_v2 }
 0x17e   :  { %v2556_v1 = vsel %vm197_vm14, 1.0, %v4890_v2  ;;  %vm828_vm14 = vcmp.eq.s32.totalorder %v3230_v63, %v4015_v33 }
 0x17f   :  { %4893 = vst [vmem:[#allocation26_spill] sm:$0xff] %v4004_v53  ;;  %v4804_v57 = vand.u32 4294901760, %v4004_v53  ;;  %2777 = vset.pattern.permute.xlu2 %v4894_v50  ;;  %v615_v10 = vadd.f32 %v2594_v0, %v2556_v1 }
 0x180   :  { %430 = vperm.xlu2 %2777, %v355_v26  }
 0x181   :  { %v1290_v6 = vsub.f32 %v4004_v53, %v4804_v57  ;;  %v720_v62 = vpop.permute.xlu2 %719  ;;  %v2577_v53 = vsel %vm218_vm4, 1.0, %v4890_v2 }
 0x182   :  { %vm806_vm2 = vcmp.eq.s32.totalorder %v3230_v63, %v720_v62 }
 0x183   :  { %v1291_v23 = vand.u32 4294901760, %v1290_v6  ;;  %v2633_v49 = vsel %vm806_vm2, 1.0, %v4890_v2 }
 0x184   :  { %2778 = vset.pattern.permute.xlu1 %v4887_v30 }
 0x185   :  { %734 = vperm.xlu1 %2778, %v659_v25   ;;  %1292 = vmatmul.f32.gmra.mxu2 %v1291_v23  ;;  %v717_v50 = vpop.permute.xlu1 %716  ;;  %v2595_v25 = vsel %vm502_vm1, 1.0, %v4890_v2  ;;  %v476_v0 = vpop.permute.xlu0 %475 }
 0x186   :  { %vm805_vm0 = vcmp.eq.s32.totalorder %v3230_v63, %v717_v50  ;;  %vm522_vm5 = vcmp.eq.s32.totalorder %v3230_v63, %v476_v0 }
 0x187   :  { %v2632_v26 = vsel %vm805_vm0, 1.0, %v4890_v2 }
 0x188   :  { %v919_v57 = vadd.f32 %v2632_v26, %v615_v10 }
 0x18a   :  { %v4021_v7 = vand.u32 4294901760, %v919_v57  ;;  %v115_v30 = vpop.permute.xlu2 %114 }
 0x18b   :  { %vm199_vm10 = vcmp.eq.s32.totalorder %v3230_v63, %v115_v30 }
 0x18c   :  { %v4025_v6 = vsub.f32 %v919_v57, %v4021_v7  ;;  %1481 = vmatmul.f32.gmra.mxu1 %v4021_v7 }
 0x18e   :  { %v112_v1 = vpop.permute.xlu1 %111  ;;  %v4811_v23 = vand.u32 4294901760, %v4025_v6 }
 0x18f   :  { %vm198_vm3 = vcmp.eq.s32.totalorder %v3230_v63, %v112_v1  ;;  %v2615_v1 = vsel %vm522_vm5, 1.0, %v4890_v2 }
 0x190   :  { %v2557_v10 = vsel %vm198_vm3, 1.0, %v4890_v2  ;;  %v1130_v57 = vsub.f32 %v4025_v6, %v4811_v23  ;;  %v636_v23 = vadd.f32 %v2615_v1, %v2577_v53 }
 0x191   :  { %v616_v50 = vadd.f32 %v2595_v25, %v2557_v10 }
 0x192   :  { %v1131_v62 = vand.u32 4294901760, %v1130_v57 }
 0x193   :  { %v920_v26 = vadd.f32 %v2633_v49, %v616_v50  ;;  %v783_v10 = vpop.permute.xlu2 %782 }
 0x194   :  { %1132 = vmatmul.f32.gmra.mxu0 %v1131_v62  ;;  %vm827_vm8 = vcmp.eq.s32.totalorder %v3230_v63, %v783_v10 }
 0x195   :  { %v4042_v47 = vand.u32 4294901760, %v920_v26 }
 0x197   :  { %v4045_v48 = vsub.f32 %v920_v26, %v4042_v47  ;;  %1485 = vmatmul.f32.gmra.mxu1 %v4042_v47  ;;  %v780_v25 = vpop.permute.xlu1 %779 }
 0x198   :  { %vm826_vm6 = vcmp.eq.s32.totalorder %v3230_v63, %v780_v25  ;;  %v2578_v25 = vsel %vm219_vm7, 1.0, %v4890_v2 }
 0x199   :  { %v2653_v13 = vsel %vm826_vm6, 1.0, %v4890_v2  ;;  %v4812_v0 = vand.u32 4294901760, %v4045_v48 }
 0x19a   :  { %v940_v49 = vadd.f32 %v2653_v13, %v636_v23 }
 0x19b   :  { %v1138_v57 = vsub.f32 %v4045_v48, %v4812_v0 }
 0x19c   :  { %v4054_v50 = vand.u32 4294901760, %v940_v49  ;;  %v482_v53 = vpop.permute.xlu2 %481 }
 0x19d   :  { %v1139_v62 = vand.u32 4294901760, %v1138_v57  ;;  %vm524_vm13 = vcmp.eq.s32.totalorder %v3230_v63, %v482_v53 }
 0x19e   :  { %4895 = vst [vmem:[#allocation27_spill] sm:$0xff] %v4054_v50  ;;  %v4057_v26 = vsub.f32 %v940_v49, %v4054_v50  ;;  %1565 = vmatmul.f32.gmra.mxu3 %v4054_v50  ;;  %v2654_v49 = vsel %vm827_vm8, 1.0, %v4890_v2 }
 0x19f   :  { %1140 = vmatmul.f32.gmra.mxu0 %v1139_v62 }
 0x1a0   :  { %4896 = vst [vmem:[#allocation28_spill] sm:$0xff] %v4057_v26  ;;  %v479_v23 = vpop.permute.xlu1 %478  ;;  %v4815_v1 = vand.u32 4294901760, %v4057_v26 }
 0x1a1   :  { %vm523_vm9 = vcmp.eq.s32.totalorder %v3230_v63, %v479_v23 }
 0x1a2   :  { %v2616_v13 = vsel %vm523_vm9, 1.0, %v4890_v2  ;;  %v1298_v57 = vsub.f32 %v4057_v26, %v4815_v1 }
 0x1a3   :  { %v637_v22 = vadd.f32 %v2616_v13, %v2578_v25  ;;  %v2558_v25 = vsel %vm199_vm10, 1.0, %v4890_v2 }
 0x1a4   :  { %v1299_v62 = vand.u32 4294901760, %v1298_v57  ;;  %v422_v1 = vpop.permute.xlu2 %421  ;;  %v2634_v57 = vsel %vm807_vm11, 1.0, %v4890_v2 }
 0x1a5   :  { %v941_v0 = vadd.f32 %v2654_v49, %v637_v22  ;;  %vm504_vm1 = vcmp.eq.s32.totalorder %v3230_v63, %v422_v1 }
 0x1a6   :  { %1300 = vmatmul.f32.gmra.mxu2 %v1299_v62  ;;  %v2617_v62 = vsel %vm524_vm13, 1.0, %v4890_v2 }
 0x1a7   :  { %v4072_v10 = vand.u32 4294901760, %v941_v0 }
 0x1a8   :  { %v419_v50 = vpop.permute.xlu1 %418 }
 0x1a9   :  { %4897 = vst [vmem:[#allocation29_spill] sm:$0xff] %v4072_v10  ;;  %v4077_v23 = vsub.f32 %v941_v0, %v4072_v10  ;;  %vm503_vm12 = vcmp.eq.s32.totalorder %v3230_v63, %v419_v50  ;;  %1569 = vmatmul.f32.gmra.mxu3 %v4072_v10 }
 0x1aa   :  { %v2596_v13 = vsel %vm503_vm12, 1.0, %v4890_v2 }
 0x1ab   :  { %4898 = vst [vmem:[#allocation30_spill] sm:$0xff] %v4077_v23  ;;  %v617_v49 = vadd.f32 %v2596_v13, %v2558_v25  ;;  %v4816_v30 = vand.u32 4294901760, %v4077_v23 }
 0x1ad   :  { %v921_v22 = vadd.f32 %v2634_v57, %v617_v49  ;;  %v1306_v16 = vsub.f32 %v4077_v23, %v4816_v30  ;;  %v181_v57 = vpop.permute.xlu2 %180  ;;  %v2655_v30 = vsel %vm828_vm14, 1.0, %v4890_v2 }
 0x1ae   :  { %vm221_vm6 = vcmp.eq.s32.totalorder %v3230_v63, %v181_v57 }
 0x1af   :  { %v4089_v0 = vand.u32 4294901760, %v921_v22  ;;  %v1307_v50 = vand.u32 4294901760, %v1306_v16 }
 0x1b1   :  { %1308 = vmatmul.f32.gmra.mxu2 %v1307_v50  ;;  %1489 = vmatmul.f32.gmra.mxu1 %v4089_v0  ;;  %v178_v25 = vpop.permute.xlu1 %177  ;;  %v4094_v13 = vsub.f32 %v921_v22, %v4089_v0 }
 0x1b2   :  { %vm220_vm15 = vcmp.eq.s32.totalorder %v3230_v63, %v178_v25 }
 0x1b3   :  { %v2579_v49 = vsel %vm220_vm15, 1.0, %v4890_v2  ;;  %v4823_v53 = vand.u32 4294901760, %v4094_v13 }
 0x1b4   :  { %v638_v16 = vadd.f32 %v2617_v62, %v2579_v49 }
 0x1b5   :  { %v1146_v50 = vsub.f32 %v4094_v13, %v4823_v53 }
 0x1b6   :  { %v942_v10 = vadd.f32 %v2655_v30, %v638_v16  ;;  %v425_v62 = vpop.permute.xlu2 %424 }
 0x1b7   :  { %v1147_v22 = vand.u32 4294901760, %v1146_v50  ;;  %v2597_v50 = vsel %vm504_vm1, 1.0, %v4890_v2  ;;  %vm505_vm3 = vcmp.eq.s32.totalorder %v3230_v63, %v425_v62 }
 0x1b8   :  { %v4105_v23 = vand.u32 4294901760, %v942_v10 }
 0x1b9   :  { %1148 = vmatmul.f32.gmra.mxu0 %v1147_v22  ;;  %v118_v33 = vpop.permute.xlu1 %117 }
 0x1ba   :  { %4899 = vst [vmem:[#allocation31_spill] sm:$0xff] %v4105_v23  ;;  %1573 = vmatmul.f32.gmra.mxu3 %v4105_v23  ;;  %v4109_v25 = vsub.f32 %v942_v10, %v4105_v23  ;;  %vm200_vm0 = vcmp.eq.s32.totalorder %v3230_v63, %v118_v33 }
 0x1bb   :  { %v2559_v30 = vsel %vm200_vm0, 1.0, %v4890_v2 }
 0x1bc   :  { %4900 = vst [vmem:[#allocation32_spill] sm:$0xff] %v4109_v25  ;;  %v4828_v26 = vand.u32 4294901760, %v4109_v25  ;;  %v618_v10 = vadd.f32 %v2597_v50, %v2559_v30  ;;  %v485_v50 = vpop.permute.xlu0 %484 }
 0x1bd   :  { %vm525_vm7 = vcmp.eq.s32.totalorder %v3230_v63, %v485_v50  ;;  %v4150_v50 = vpop.f32.mrf.mxu2 }
 0x1be   :  { %v1314_v49 = vsub.f32 %v4109_v25, %v4828_v26  ;;  %v4139_v25 = vpop.f32.mrf.mxu3  ;;  %v2618_v9 = vsel %vm525_vm7, 1.0, %v4890_v2  ;;  %4902 = vst [vmem:[#allocation34_spill] sm:$0xff] %v4150_v50 }
 0x1bf   :  { %v729_v36 = vpop.permute.xlu2 %728  ;;  %4901 = vst [vmem:[#allocation33_spill] sm:$0xff] %v4139_v25 }
 0x1c0   :  { %v1315_v16 = vand.u32 4294901760, %v1314_v49  ;;  %vm809_vm4 = vcmp.eq.s32.totalorder %v3230_v63, %v729_v36  ;;  %v2598_v49 = vsel %vm505_vm3, 1.0, %v4890_v2 }
 0x1c2   :  { %1316 = vmatmul.f32.gmra.mxu2 %v1315_v16  ;;  %v726_v22 = vpop.permute.xlu1 %725 }
 0x1c3   :  { %vm808_vm2 = vcmp.eq.s32.totalorder %v3230_v63, %v726_v22  ;;  %v2636_v22 = vsel %vm809_vm4, 1.0, %v4890_v2 }
 0x1c4   :  { %v2635_v53 = vsel %vm808_vm2, 1.0, %v4890_v2 }
 0x1c5   :  { %v922_v33 = vadd.f32 %v2635_v53, %v618_v10 }
 0x1c7   :  { %v4121_v23 = vand.u32 4294901760, %v922_v33 }
 0x1c9   :  { %v4125_v1 = vsub.f32 %v922_v33, %v4121_v23  ;;  %1493 = vmatmul.f32.gmra.mxu1 %v4121_v23  ;;  %v124_v33 = vpop.permute.xlu2 %123 }
 0x1ca   :  { %vm202_vm12 = vcmp.eq.s32.totalorder %v3230_v63, %v124_v33 }
 0x1cb   :  { %v121_v30 = vpop.permute.xlu1 %120  ;;  %v4837_v16 = vand.u32 4294901760, %v4125_v1 }
 0x1cc   :  { %vm201_vm5 = vcmp.eq.s32.totalorder %v3230_v63, %v121_v30  ;;  %v2580_v30 = vsel %vm221_vm6, 1.0, %v4890_v2 }
 0x1cd   :  { %v2560_v53 = vsel %vm201_vm5, 1.0, %v4890_v2  ;;  %v1154_v62 = vsub.f32 %v4125_v1, %v4837_v16 }
 0x1ce   :  { %v619_v10 = vadd.f32 %v2598_v49, %v2560_v53  ;;  %v639_v49 = vadd.f32 %v2618_v9, %v2580_v30  ;;  %v4160_v9 = vpop.f32.mrf.mxu3 }
 0x1cf   :  { %v1155_v36 = vand.u32 4294901760, %v1154_v62  ;;  %4904 = vst [vmem:[#allocation36_spill] sm:$0xff] %v4160_v9 }
 0x1d0   :  { %v923_v26 = vadd.f32 %v2636_v22, %v619_v10  ;;  %v184_v10 = vpop.permute.xlu0 %183 }
 0x1d1   :  { %1156 = vmatmul.f32.gmra.mxu0 %v1155_v36  ;;  %v792_v16 = vpop.permute.xlu2 %791  ;;  %vm222_vm9 = vcmp.eq.s32.totalorder %v3230_v63, %v184_v10 }
 0x1d2   :  { %v4143_v44 = vand.u32 4294901760, %v923_v26  ;;  %vm830_vm10 = vcmp.eq.s32.totalorder %v3230_v63, %v792_v16 }
 0x1d4   :  { %v4146_v19 = vsub.f32 %v923_v26, %v4143_v44  ;;  %1497 = vmatmul.f32.gmra.mxu1 %v4143_v44  ;;  %v789_v57 = vpop.permute.xlu1 %788 }
 0x1d5   :  { %vm829_vm8 = vcmp.eq.s32.totalorder %v3230_v63, %v789_v57  ;;  %v2581_v57 = vsel %vm222_vm9, 1.0, %v4890_v2 }
 0x1d6   :  { %v2656_v53 = vsel %vm829_vm8, 1.0, %v4890_v2  ;;  %v4838_v22 = vand.u32 4294901760, %v4146_v19  ;;  %v4179_v4 = vpop.f32.mrf.mxu3 }
 0x1d7   :  { %v943_v62 = vadd.f32 %v2656_v53, %v639_v49  ;;  %4907 = vst [vmem:[#allocation39_spill] sm:$0xff] %v4179_v4 }
 0x1d8   :  { %v1162_v36 = vsub.f32 %v4146_v19, %v4838_v22  ;;  %v2657_v22 = vsel %vm830_vm10, 1.0, %v4890_v2  ;;  %v732_v9 = vpop.permute.xlu0 %731 }
 0x1d9   :  { %v4157_v26 = vand.u32 4294901760, %v943_v62  ;;  %vm810_vm13 = vcmp.eq.s32.totalorder %v3230_v63, %v732_v9 }
 0x1da   :  { %v1163_v25 = vand.u32 4294901760, %v1162_v36  ;;  %v4170_v36 = vpop.f32.mrf.mxu1  ;;  %v2637_v33 = vsel %vm810_vm13, 1.0, %v4890_v2 }
 0x1db   :  { %4903 = vst [vmem:[#allocation35_spill] sm:$0xff] %v4157_v26  ;;  %v4163_v30 = vsub.f32 %v943_v62, %v4157_v26  ;;  %1577 = vmatmul.f32.gmra.mxu3 %v4157_v26 }
 0x1dc   :  { %1164 = vmatmul.f32.gmra.mxu0 %v1163_v25  ;;  %v4177_v25 = vpop.f32.mrf.mxu2 }
 0x1dd   :  { %4905 = vst [vmem:[#allocation37_spill] sm:$0xff] %v4163_v30  ;;  %v488_v49 = vpop.permute.xlu1 %487  ;;  %v4847_v53 = vand.u32 4294901760, %v4163_v30 }
 0x1de   :  { %vm526_vm11 = vcmp.eq.s32.totalorder %v3230_v63, %v488_v49  ;;  %4906 = vst [vmem:[#allocation38_spill] sm:$0xff] %v4177_v25 }
 0x1df   :  { %v2619_v10 = vsel %vm526_vm11, 1.0, %v4890_v2  ;;  %v1322_v62 = vsub.f32 %v4163_v30, %v4847_v53 }
 0x1e0   :  { %v640_v16 = vadd.f32 %v2619_v10, %v2581_v57 }
 0x1e1   :  { %v1323_v26 = vand.u32 4294901760, %v1322_v62 }
 0x1e2   :  { %v944_v50 = vadd.f32 %v2657_v22, %v640_v16  ;;  %v2561_v22 = vsel %vm202_vm12, 1.0, %v4890_v2  ;;  %v4198_v62 = vpop.f32.mrf.mxu1 }
 0x1e3   :  { %1324 = vmatmul.f32.gmra.mxu2 %v1323_v26 }
 0x1e4   :  { %v4182_v49 = vand.u32 4294901760, %v944_v50  ;;  %v4195_v57 = vpop.f32.mrf.mxu2 }
 0x1e5   :  { %v428_v32 = vpop.permute.xlu1 %427  ;;  %4910 = vst [vmem:[#allocation42_spill] sm:$0xff] %v4195_v57  ;;  %v4912_v57 = vand.u32 4294901760, %v3497_v46 }
 0x1e6   :  { %4908 = vst [vmem:[#allocation40_spill] sm:$0xff] %v4182_v49  ;;  %v4188_v53 = vsub.f32 %v944_v50, %v4182_v49  ;;  %vm506_vm14 = vcmp.eq.s32.totalorder %v3230_v63, %v428_v32  ;;  %1581 = vmatmul.f32.gmra.mxu3 %v4182_v49  ;;  %v4203_v50 = vpop.f32.mrf.mxu3 }
 0x1e7   :  { %v2599_v26 = vsel %vm506_vm14, 1.0, %v4890_v2  ;;  %4911 = vst [vmem:[#allocation43_spill] sm:$0xff] %v4203_v50 }
 0x1e8   :  { %4909 = vst [vmem:[#allocation41_spill] sm:$0xff] %v4188_v53  ;;  %v620_v10 = vadd.f32 %v2599_v26, %v2561_v22  ;;  %v4850_v9 = vand.u32 4294901760, %v4188_v53  ;;  %v431_v26 = vpop.permute.xlu2 %430 }
 0x1e9   :  { %vm507_vm15 = vcmp.eq.s32.totalorder %v3230_v63, %v431_v26  ;;  %v4915_v26 = vand.u32 4294901760, %v3535_v45 }
 0x1ea   :  { %v924_v16 = vadd.f32 %v2637_v33, %v620_v10  ;;  %v1330_v32 = vsub.f32 %v4188_v53, %v4850_v9  ;;  %v4215_v10 = vpop.f32.mrf.mxu0 }
 0x1ec   :  { %v4205_v49 = vand.u32 4294901760, %v924_v16  ;;  %v1331_v4 = vand.u32 4294901760, %v1330_v32  ;;  %v4213_v33 = vpop.f32.mrf.mxu2 }
 0x1ed   :  { %4913 = vst [vmem:[#allocation44_spill] sm:$0xff] %v4213_v33 }
 0x1ee   :  { %v4208_v25 = vsub.f32 %v924_v16, %v4205_v49  ;;  %1332 = vmatmul.f32.gmra.mxu2 %v1331_v4  ;;  %1501 = vmatmul.f32.gmra.mxu1 %v4205_v49  ;;  %v127_v22 = vpop.permute.xlu1 %126  ;;  %v4223_v16 = vpop.f32.mrf.mxu1 }
 0x1ef   :  { %1859 = vmatmul.f32.vlgmr.msrb.gmra.mxu3 %v4912_v57  ;;  %vm203_vm0 = vcmp.eq.s32.totalorder %v3230_v63, %v127_v22  ;;  %v4225_v32 = vpop.f32.mrf.mxu3  ;;  %v2600_v57 = vsel %vm507_vm15, 1.0, %v4890_v2 }
 0x1f0   :  { %v4855_v9 = vand.u32 4294901760, %v4208_v25  ;;  %4914 = vst [vmem:[#allocation45_spill] sm:$0xff] %v4225_v32  ;;  %v2562_v33 = vsel %vm203_vm0, 1.0, %v4890_v2 }
 0x1f1   :  { %v621_v30 = vadd.f32 %v2600_v57, %v2562_v33 }
 0x1f2   :  { %v1170_v4 = vsub.f32 %v4208_v25, %v4855_v9  ;;  %v4236_v32 = vpop.f32.mrf.mxu0 }
 0x1f4   :  { %v1171_v50 = vand.u32 4294901760, %v1170_v4  ;;  %v4232_v53 = vpop.f32.mrf.mxu2 }
 0x1f5   :  { %4916 = vst [vmem:[#allocation46_spill] sm:$0xff] %v4232_v53 }
 0x1f6   :  { %1172 = vmatmul.f32.gmra.mxu0 %v1171_v50  ;;  %1635 = vmatmul.f32.vlgmr.msrb.gmra.mxu2 %v3497_v46  ;;  %v4240_v17 = vpop.f32.mrf.mxu1 }
 0x1f7   :  { %1865 = vmatmul.f32.gmra.mxu3 %v4915_v26  ;;  %v735_v22 = vpop.permute.xlu1 %734  ;;  %v4242_v50 = vpop.f32.mrf.mxu3 }
 0x1f8   :  { %vm811_vm1 = vcmp.eq.s32.totalorder %v3230_v63, %v735_v22  ;;  %4917 = vst [vmem:[#allocation47_spill] sm:$0xff] %v4242_v50  ;;  %v4918_v63 = vand.u32 4294901760, %v3538_v15  ;;  %v4921_v22 = vand.u32 4294901760, %v3564_v59 }
 0x1f9   :  { %v2638_v9 = vsel %vm811_vm1, 1.0, %v4890_v2 }
 0x1fa   :  { %v925_v4 = vadd.f32 %v2638_v9, %v621_v30  ;;  %v4257_v9 = vpop.f32.mrf.mxu0 }
 0x1fc   :  { %v4238_v55 = vand.u32 4294901760, %v925_v4  ;;  %v4252_v33 = vpop.f32.mrf.mxu2 }
 0x1fd   :  { %4919 = vst [vmem:[#allocation48_spill] sm:$0xff] %v4252_v33 }
 0x1fe   :  { %v4245_v46 = vsub.f32 %v925_v4, %v4238_v55  ;;  %1505 = vmatmul.f32.gmra.mxu1 %v4238_v55  ;;  %1640 = vmatmul.f32.gmra.mxu2 %v3535_v45  ;;  %v4260_v26 = vpop.f32.mrf.mxu1 }
 0x1ff   :  { %1871 = vmatmul.f32.gmra.mxu3 %v4918_v63  ;;  %v4262_v45 = vpop.f32.mrf.mxu3 }
 0x200   :  { %v4860_v2 = vand.u32 4294901760, %v4245_v46  ;;  %4920 = vst [vmem:[#allocation49_spill] sm:$0xff] %v4262_v45 }
 0x202   :  { %v1178_v30 = vsub.f32 %v4245_v46, %v4860_v2  ;;  %v4269_v63 = vpop.f32.mrf.mxu0  ;;  %v4926_v2 = vand.u32 4294901760, %v3697_v60 }
 0x204   :  { %v1179_v57 = vand.u32 4294901760, %v1178_v30  ;;  %v4267_v4 = vpop.f32.mrf.mxu2  ;;  %v4923_v30 = vand.u32 4294901760, %v3635_v3 }
 0x205   :  { %4922 = vst [vmem:[#allocation50_spill] sm:$0xff] %v4267_v4 }
 0x206   :  { %1180 = vmatmul.f32.gmra.mxu0 %v1179_v57  ;;  %1645 = vmatmul.f32.gmra.mxu2 %v3538_v15  ;;  %v4276_v15 = vpop.f32.mrf.mxu1 }
 0x207   :  { %1877 = vmatmul.f32.gmra.mxu3 %v4921_v22  ;;  %2335 = vmatmul.f32.vlgmr.msrb.gmra.mxu1 %v3483_v34  ;;  %v4278_v57 = vpop.f32.mrf.mxu3 }
 0x208   :  { %4924 = vst [vmem:[#allocation51_spill] sm:$0xff] %v4278_v57 }
 0x20c   :  { %v4280_v22 = vpop.f32.mrf.mxu2 }
 0x20d   :  { %4925 = vst [vmem:[#allocation52_spill] sm:$0xff] %v4280_v22 }
 0x20e   :  { %1650 = vmatmul.f32.gmra.mxu2 %v3564_v59  ;;  %2150 = vmatmul.f32.vlgmr.msrb.gmra.mxu0 %v3483_v34  ;;  %v4287_v34 = vpop.f32.mrf.mxu0  ;;  %v4289_v59 = vpop.f32.mrf.mxu1 }
 0x20f   :  { %1883 = vmatmul.f32.gmra.mxu3 %v4923_v30  ;;  %2339 = vmatmul.f32.gmra.mxu1 %v3524_v54  ;;  %v4291_v30 = vpop.f32.mrf.mxu3 }
 0x210   :  { %4927 = vst [vmem:[#allocation53_spill] sm:$0xff] %v4291_v30 }
 0x214   :  { %v4293_v45 = vpop.f32.mrf.mxu2 }
 0x215   :  { %4928 = vst [vmem:[#allocation54_spill] sm:$0xff] %v4293_v45 }
 0x216   :  { %1655 = vmatmul.f32.gmra.mxu2 %v3635_v3  ;;  %2154 = vmatmul.f32.gmra.mxu0 %v3524_v54  ;;  %v4929_v3 = vand.u32 4294901760, %v3746_v58  ;;  %v4300_v54 = vpop.f32.mrf.mxu0 }
 0x217   :  { %1889 = vmatmul.f32.gmra.mxu3 %v4926_v2  ;;  %2343 = vmatmul.f32.gmra.mxu1 %v3517_v35  ;;  %v4302_v2 = vpop.f32.mrf.mxu1  ;;  %v4304_v57 = vpop.f32.mrf.mxu3 }
 0x218   :  { %4930 = vst [vmem:[#allocation55_spill] sm:$0xff] %v4304_v57 }
 0x21c   :  { %v4306_v22 = vpop.f32.mrf.mxu2 }
 0x21d   :  { %4931 = vst [vmem:[#allocation56_spill] sm:$0xff] %v4306_v22 }
 0x21e   :  { %1660 = vmatmul.f32.gmra.mxu2 %v3697_v60  ;;  %2158 = vmatmul.f32.gmra.mxu0 %v3517_v35  ;;  %v4932_v60 = vand.u32 4294901760, %v3793_v8  ;;  %v4313_v35 = vpop.f32.mrf.mxu0 }
 0x21f   :  { %1895 = vmatmul.f32.gmra.mxu3 %v4929_v3  ;;  %2347 = vmatmul.f32.gmra.mxu1 %v3543_v29  ;;  %v4315_v3 = vpop.f32.mrf.mxu3  ;;  %v4317_v30 = vpop.f32.mrf.mxu1 }
 0x220   :  { %4933 = vst [vmem:[#allocation57_spill] sm:$0xff] %v4315_v3 }
 0x224   :  { %v4319_v45 = vpop.f32.mrf.mxu2 }
 0x225   :  { %4934 = vst [vmem:[#allocation58_spill] sm:$0xff] %v4319_v45 }
 0x226   :  { %1665 = vmatmul.f32.gmra.mxu2 %v3746_v58  ;;  %2162 = vmatmul.f32.gmra.mxu0 %v3543_v29  ;;  %v4935_v58 = vand.u32 4294901760, %v3797_v31 }
 0x227   :  { %1901 = vmatmul.f32.gmra.mxu3 %v4932_v60  ;;  %2351 = vmatmul.f32.gmra.mxu1 %v3607_v27  ;;  %v4326_v29 = vpop.f32.mrf.mxu3  ;;  %v4328_v60 = vpop.f32.mrf.mxu0 }
 0x228   :  { %4936 = vst [vmem:[#allocation59_spill] sm:$0xff] %v4326_v29  ;;  %v4330_v57 = vpop.f32.mrf.mxu1 }
 0x22c   :  { %v4332_v3 = vpop.f32.mrf.mxu2 }
 0x22d   :  { %4937 = vst [vmem:[#allocation60_spill] sm:$0xff] %v4332_v3 }
 0x22e   :  { %1670 = vmatmul.f32.gmra.mxu2 %v3793_v8  ;;  %2166 = vmatmul.f32.gmra.mxu0 %v3607_v27  ;;  %v4938_v8 = vand.u32 4294901760, %v3885_v24 }
 0x22f   :  { %1907 = vmatmul.f32.gmra.mxu3 %v4935_v58  ;;  %2355 = vmatmul.f32.gmra.mxu1 %v3689_v39  ;;  %v4339_v27 = vpop.f32.mrf.mxu3  ;;  %v4341_v58 = vpop.f32.mrf.mxu0 }
 0x230   :  { %4939 = vst [vmem:[#allocation61_spill] sm:$0xff] %v4339_v27  ;;  %v4343_v29 = vpop.f32.mrf.mxu1 }
 0x234   :  { %v4345_v45 = vpop.f32.mrf.mxu2 }
 0x235   :  { %4940 = vst [vmem:[#allocation62_spill] sm:$0xff] %v4345_v45 }
 0x236   :  { %1675 = vmatmul.f32.gmra.mxu2 %v3797_v31  ;;  %2170 = vmatmul.f32.gmra.mxu0 %v3689_v39  ;;  %v4941_v31 = vand.u32 4294901760, %v3920_v18 }
 0x237   :  { %1913 = vmatmul.f32.gmra.mxu3 %v4938_v8  ;;  %2359 = vmatmul.f32.gmra.mxu1 %v3743_v5  ;;  %v4352_v39 = vpop.f32.mrf.mxu3  ;;  %v4354_v8 = vpop.f32.mrf.mxu0 }
 0x238   :  { %4942 = vst [vmem:[#allocation63_spill] sm:$0xff] %v4352_v39  ;;  %v4356_v27 = vpop.f32.mrf.mxu1 }
 0x23c   :  { %v4358_v3 = vpop.f32.mrf.mxu2 }
 0x23d   :  { %4943 = vst [vmem:[#allocation64_spill] sm:$0xff] %v4358_v3 }
 0x23e   :  { %1680 = vmatmul.f32.gmra.mxu2 %v3885_v24  ;;  %2174 = vmatmul.f32.gmra.mxu0 %v3743_v5  ;;  %v4944_v24 = vand.u32 4294901760, %v3983_v56 }
 0x23f   :  { %1919 = vmatmul.f32.gmra.mxu3 %v4941_v31  ;;  %2363 = vmatmul.f32.gmra.mxu1 %v3789_v11  ;;  %v4365_v5 = vpop.f32.mrf.mxu3  ;;  %v4367_v31 = vpop.f32.mrf.mxu0 }
 0x240   :  { %4945 = vst [vmem:[#allocation65_spill] sm:$0xff] %v4365_v5  ;;  %v4369_v39 = vpop.f32.mrf.mxu1 }
 0x244   :  { %v4371_v45 = vpop.f32.mrf.mxu2 }
 0x245   :  { %4946 = vst [vmem:[#allocation66_spill] sm:$0xff] %v4371_v45 }
 0x246   :  { %1685 = vmatmul.f32.gmra.mxu2 %v3920_v18  ;;  %2178 = vmatmul.f32.gmra.mxu0 %v3789_v11  ;;  %v4947_v18 = vand.u32 4294901760, %v4025_v6 }
 0x247   :  { %1925 = vmatmul.f32.gmra.mxu3 %v4944_v24  ;;  %2367 = vmatmul.f32.gmra.mxu1 %v3787_v42  ;;  %v4378_v11 = vpop.f32.mrf.mxu3  ;;  %v4380_v24 = vpop.f32.mrf.mxu0 }
 0x248   :  { %4948 = vst [vmem:[#allocation67_spill] sm:$0xff] %v4378_v11  ;;  %v4382_v5 = vpop.f32.mrf.mxu1 }
 0x24c   :  { %v4384_v3 = vpop.f32.mrf.mxu2 }
 0x24d   :  { %4949 = vst [vmem:[#allocation68_spill] sm:$0xff] %v4384_v3 }
 0x24e   :  { %1690 = vmatmul.f32.gmra.mxu2 %v3983_v56  ;;  %2182 = vmatmul.f32.gmra.mxu0 %v3787_v42  ;;  %v4950_v56 = vand.u32 4294901760, %v4045_v48 }
 0x24f   :  { %1931 = vmatmul.f32.gmra.mxu3 %v4947_v18  ;;  %2371 = vmatmul.f32.gmra.mxu1 %v3879_v52  ;;  %v4391_v42 = vpop.f32.mrf.mxu3  ;;  %v4393_v18 = vpop.f32.mrf.mxu0 }
 0x250   :  { %4951 = vst [vmem:[#allocation69_spill] sm:$0xff] %v4391_v42  ;;  %v4395_v11 = vpop.f32.mrf.mxu1  ;;  %v997_v42 = vld [vmem:[%s4745_s2 + $0x120] sm:$0xff] }
 0x254   :  { %v4397_v45 = vpop.f32.mrf.mxu2 }
 0x255   :  { %4952 = vst [vmem:[#allocation70_spill] sm:$0xff] %v4397_v45 }
 0x256   :  { %1695 = vmatmul.f32.gmra.mxu2 %v4025_v6  ;;  %2186 = vmatmul.f32.gmra.mxu0 %v3879_v52  ;;  %v4953_v6 = vand.u32 4294901760, %v4094_v13 }
 0x257   :  { %1937 = vmatmul.f32.gmra.mxu3 %v4950_v56  ;;  %2375 = vmatmul.f32.gmra.mxu1 %v3915_v12  ;;  %v4404_v56 = vpop.f32.mrf.mxu0 }
 0x258   :  { %v4406_v3 = vpop.f32.mrf.mxu1 }
 0x25e   :  { %1700 = vmatmul.f32.gmra.mxu2 %v4045_v48  ;;  %2190 = vmatmul.f32.gmra.mxu0 %v3915_v12  ;;  %v1578_v52 = vpop.f32.mrf.mxu3  ;;  %v4954_v12 = vand.u32 4294901760, %v4125_v1 }
 0x25f   :  { %1943 = vmatmul.f32.gmra.mxu3 %v4953_v6  ;;  %2379 = vmatmul.f32.gmra.mxu1 %v3977_v38  ;;  %v4418_v4 = vpop.f32.mrf.mxu0 }
 0x260   :  { %v4420_v50 = vpop.f32.mrf.mxu1 }
 0x266   :  { %v1325_v22 = vpop.f32.mrf.mxu2  ;;  %1705 = vmatmul.f32.gmra.mxu2 %v4094_v13  ;;  %2194 = vmatmul.f32.gmra.mxu0 %v3977_v38  ;;  %v4956_v13 = vand.u32 4294901760, %v4146_v19  ;;  %v998_v38 = vld [vmem:[%s4745_s2 + $0x128] sm:$0xff] }
 0x267   :  { %v1326_v48 = vadd.f32 %v1325_v22, %v997_v42  ;;  %1949 = vmatmul.f32.gmra.mxu3 %v4954_v12  ;;  %2383 = vmatmul.f32.gmra.mxu1 %v4021_v7 }
 0x269   :  { %v1582_v6 = vpop.f32.mrf.mxu3  ;;  %v4416_v45 = vadd.f32 %v1578_v52, %v1326_v48  ;;  %v4430_v48 = vpop.f32.mrf.mxu0 }
 0x26b   :  { %4955 = vst [vmem:[#allocation71_spill] sm:$0xff] %v4416_v45  ;;  %v4432_v12 = vpop.f32.mrf.mxu1 }
 0x26c   :  { %4957 = vst [vmem:[#allocation72_spill] sm:$0xff] %v4432_v12 }
 0x26e   :  { %1710 = vmatmul.f32.gmra.mxu2 %v4125_v1  ;;  %2198 = vmatmul.f32.gmra.mxu0 %v4021_v7  ;;  %v4959_v7 = vand.u32 4294901760, %v4208_v25 }
 0x26f   :  { %1955 = vmatmul.f32.gmra.mxu3 %v4956_v13  ;;  %2387 = vmatmul.f32.gmra.mxu1 %v4042_v47 }
 0x271   :  { %v1333_v22 = vpop.f32.mrf.mxu2 }
 0x272   :  { %v1334_v42 = vadd.f32 %v1333_v22, %v998_v38  ;;  %v1860_v52 = vpop.f32.mrf.mxu3 }
 0x273   :  { %v4441_v33 = vpop.f32.mrf.mxu0 }
 0x274   :  { %v4434_v45 = vadd.f32 %v1582_v6, %v1334_v42  ;;  %4960 = vst [vmem:[#allocation74_spill] sm:$0xff] %v4441_v33  ;;  %v961_v6 = vld [vmem:[%s4745_s2] sm:$0xff] }
 0x276   :  { %4958 = vst [vmem:[#allocation73_spill] sm:$0xff] %v4434_v45  ;;  %1715 = vmatmul.f32.gmra.mxu2 %v4146_v19  ;;  %2202 = vmatmul.f32.gmra.mxu0 %v4042_v47  ;;  %v4962_v19 = vand.u32 4294901760, %v4245_v46  ;;  %v1038_v47 = vadd.f32 %v4185_v21, %v961_v6 }
 0x277   :  { %1961 = vmatmul.f32.gmra.mxu3 %v4959_v7  ;;  %2391 = vmatmul.f32.gmra.mxu1 %v4089_v0 }
 0x278   :  { %v1435_v45 = vadd.f32 %v4170_v36, %v1038_v47 }
 0x279   :  { %v1636_v1 = vpop.f32.mrf.mxu2 }
 0x27a   :  { %v1866_v13 = vpop.f32.mrf.mxu3 }
 0x27b   :  { %v4443_v38 = vpop.f32.mrf.mxu1 }
 0x27c   :  { %4961 = vst [vmem:[#allocation75_spill] sm:$0xff] %v4443_v38  ;;  %v1637_v38 = vadd.f32 %v1636_v1, %v1435_v45 }
 0x27e   :  { %1720 = vmatmul.f32.gmra.mxu2 %v4208_v25  ;;  %2206 = vmatmul.f32.gmra.mxu0 %v4089_v0  ;;  %v962_v25 = vld [vmem:[%s4745_s2 + $0x8] sm:$0xff]  ;;  %v4964_v0 = vand.u32 4294901760, %v3296_v61  ;;  %v1861_v36 = vadd.f32 %v1860_v52, %v1637_v38 }
 0x27f   :  { %1967 = vmatmul.f32.gmra.mxu3 %v4962_v19  ;;  %2395 = vmatmul.f32.gmra.mxu1 %v4121_v23  ;;  %v1046_v21 = vadd.f32 %v4215_v10, %v962_v25  ;;  %v4965_v10 = vand.u32 4294901760, %v3336_v51 }
 0x281   :  { %v1641_v22 = vpop.f32.mrf.mxu2 }
 0x282   :  { %v1872_v42 = vpop.f32.mrf.mxu3 }
 0x283   :  { %v4454_v7 = vpop.f32.mrf.mxu0 }
 0x284   :  { %4963 = vst [vmem:[#allocation76_spill] sm:$0xff] %v4454_v7  ;;  %v2336_v53 = vpop.f32.mrf.mxu1  ;;  %v1439_v7 = vadd.f32 %v4198_v62, %v1046_v21 }
 0x286   :  { %1725 = vmatmul.f32.gmra.mxu2 %v4245_v46  ;;  %2210 = vmatmul.f32.gmra.mxu0 %v4121_v23  ;;  %v963_v46 = vld [vmem:[%s4745_s2 + $0x10] sm:$0xff]  ;;  %v1642_v23 = vadd.f32 %v1641_v22, %v1439_v7 }
 0x287   :  { %1973 = vmatmul.f32.gmra.mxu3 %v4964_v0  ;;  %2399 = vmatmul.f32.gmra.mxu1 %v4143_v44  ;;  %v1054_v52 = vadd.f32 %v4236_v32, %v963_v46  ;;  %v4966_v32 = vand.u32 4294901760, %v3405_v40 }
 0x288   :  { %v1867_v38 = vadd.f32 %v1866_v13, %v1642_v23 }
 0x289   :  { %v1646_v6 = vpop.f32.mrf.mxu2  ;;  %v1443_v0 = vadd.f32 %v4223_v16, %v1054_v52 }
 0x28a   :  { %v1878_v19 = vpop.f32.mrf.mxu3 }
 0x28b   :  { %v2151_v47 = vpop.f32.mrf.mxu0 }
 0x28c   :  { %v2152_v12 = vadd.f32 %v2151_v47, %v1861_v36  ;;  %v2340_v33 = vpop.f32.mrf.mxu1 }
 0x28e   :  { %v2337_v45 = vadd.f32 %v2336_v53, %v2152_v12  ;;  %1730 = vmatmul.f32.gmra.mxu2 %v3296_v61  ;;  %2214 = vmatmul.f32.gmra.mxu0 %v4143_v44  ;;  %v964_v61 = vld [vmem:[%s4745_s2 + $0x18] sm:$0xff]  ;;  %v1647_v44 = vadd.f32 %v1646_v6, %v1443_v0 }
 0x28f   :  { %1979 = vmatmul.f32.gmra.mxu3 %v4965_v10  ;;  %2403 = vmatmul.f32.gmra.mxu1 %v4205_v49  ;;  %v1062_v13 = vadd.f32 %v4257_v9, %v964_v61  ;;  %v4967_v9 = vand.u32 4294901760, %v3440_v14 }
 0x290   :  { %2487 = vst [vmem:[#allocation5] sm:$0xff] %v2337_v45  ;;  %v1873_v21 = vadd.f32 %v1872_v42, %v1647_v44 }
 0x291   :  { %v1651_v62 = vpop.f32.mrf.mxu2  ;;  %v1447_v47 = vadd.f32 %v4240_v17, %v1062_v13 }
 0x292   :  { %v1884_v1 = vpop.f32.mrf.mxu3 }
 0x293   :  { %v2155_v25 = vpop.f32.mrf.mxu0 }
 0x294   :  { %v2156_v22 = vadd.f32 %v2155_v25, %v1867_v38  ;;  %v2344_v53 = vpop.f32.mrf.mxu1 }
 0x296   :  { %v2341_v12 = vadd.f32 %v2340_v33, %v2156_v22  ;;  %1735 = vmatmul.f32.gmra.mxu2 %v3336_v51  ;;  %2218 = vmatmul.f32.gmra.mxu0 %v4205_v49  ;;  %v965_v51 = vld [vmem:[%s4745_s2 + $0x20] sm:$0xff]  ;;  %v1652_v49 = vadd.f32 %v1651_v62, %v1447_v47 }
 0x297   :  { %1985 = vmatmul.f32.gmra.mxu3 %v4966_v32  ;;  %2407 = vmatmul.f32.gmra.mxu1 %v4238_v55  ;;  %v1070_v42 = vadd.f32 %v4269_v63, %v965_v51  ;;  %v4968_v63 = vand.u32 4294901760, %v3625_v43 }
 0x298   :  { %2488 = vst [vmem:[#allocation5 + $0x8] sm:$0xff] %v2341_v12  ;;  %v1879_v45 = vadd.f32 %v1878_v19, %v1652_v49  ;;  %v4972_v49 = vld [vmem:[#allocation8_spill] sm:$0xff] }
 0x299   :  { %v1656_v16 = vpop.f32.mrf.mxu2  ;;  %v1451_v52 = vadd.f32 %v4260_v26, %v1070_v42 }
 0x29a   :  { %v1890_v7 = vpop.f32.mrf.mxu3 }
 0x29b   :  { %v2159_v36 = vpop.f32.mrf.mxu0 }
 0x29c   :  { %v2160_v6 = vadd.f32 %v2159_v36, %v1873_v21  ;;  %v2348_v33 = vpop.f32.mrf.mxu1 }
 0x29e   :  { %v2345_v46 = vadd.f32 %v2344_v53, %v2160_v6  ;;  %1740 = vmatmul.f32.gmra.mxu2 %v3405_v40  ;;  %2222 = vmatmul.f32.gmra.mxu0 %v4238_v55  ;;  %v966_v40 = vld [vmem:[%s4745_s2 + $0x28] sm:$0xff]  ;;  %v1657_v55 = vadd.f32 %v1656_v16, %v1451_v52 }
 0x29f   :  { %1991 = vmatmul.f32.gmra.mxu3 %v4967_v9  ;;  %2411 = vmatmul.f32.gmra.mxu1 %v3280_v37  ;;  %v1078_v19 = vadd.f32 %v4287_v34, %v966_v40  ;;  %v4969_v34 = vand.u32 4294901760, %v3671_v20 }
 0x2a0   :  { %2489 = vst [vmem:[#allocation5 + $0x10] sm:$0xff] %v2345_v46  ;;  %v1885_v22 = vadd.f32 %v1884_v1, %v1657_v55 }
 0x2a1   :  { %v1661_v17 = vpop.f32.mrf.mxu2  ;;  %v1455_v61 = vadd.f32 %v4276_v15, %v1078_v19 }
 0x2a2   :  { %v1896_v23 = vpop.f32.mrf.mxu3 }
 0x2a3   :  { %v2163_v10 = vpop.f32.mrf.mxu0 }
 0x2a4   :  { %v2164_v62 = vadd.f32 %v2163_v10, %v1879_v45  ;;  %v2352_v38 = vpop.f32.mrf.mxu1 }
 0x2a6   :  { %v2349_v25 = vadd.f32 %v2348_v33, %v2164_v62  ;;  %1745 = vmatmul.f32.gmra.mxu2 %v3440_v14  ;;  %2226 = vmatmul.f32.gmra.mxu0 %v3280_v37  ;;  %v967_v37 = vld [vmem:[%s4745_s2 + $0x30] sm:$0xff]  ;;  %v1662_v14 = vadd.f32 %v1661_v17, %v1455_v61 }
 0x2a7   :  { %1997 = vmatmul.f32.gmra.mxu3 %v4968_v63  ;;  %2415 = vmatmul.f32.gmra.mxu1 %v3321_v41  ;;  %v1086_v1 = vadd.f32 %v4300_v54, %v967_v37  ;;  %v4970_v54 = vld [vmem:[#allocation12_spill] sm:$0xff] }
 0x2a8   :  { %2490 = vst [vmem:[#allocation5 + $0x18] sm:$0xff] %v2349_v25  ;;  %v1891_v16 = vadd.f32 %v1890_v7, %v1662_v14  ;;  %v4971_v51 = vand.u32 4294901760, %v4970_v54 }
 0x2a9   :  { %v1666_v26 = vpop.f32.mrf.mxu2  ;;  %v1459_v36 = vadd.f32 %v4289_v59, %v1086_v1 }
 0x2aa   :  { %v1902_v0 = vpop.f32.mrf.mxu3 }
 0x2ab   :  { %v2167_v53 = vpop.f32.mrf.mxu0 }
 0x2ac   :  { %v2168_v44 = vadd.f32 %v2167_v53, %v1885_v22  ;;  %v2356_v12 = vpop.f32.mrf.mxu1  ;;  %v970_v22 = vld [vmem:[%s4745_s2 + $0x48] sm:$0xff] }
 0x2ae   :  { %v2353_v32 = vadd.f32 %v2352_v38, %v2168_v44  ;;  %1750 = vmatmul.f32.gmra.mxu2 %v3625_v43  ;;  %2230 = vmatmul.f32.gmra.mxu0 %v3321_v41  ;;  %v968_v41 = vld [vmem:[%s4745_s2 + $0x38] sm:$0xff]  ;;  %v1667_v43 = vadd.f32 %v1666_v26, %v1459_v36 }
 0x2af   :  { %2003 = vmatmul.f32.gmra.mxu3 %v4969_v34  ;;  %2419 = vmatmul.f32.gmra.mxu1 %v3402_v28  ;;  %v1094_v7 = vadd.f32 %v4313_v35, %v968_v41  ;;  %v4973_v35 = vld [vmem:[#allocation14_spill] sm:$0xff]  ;;  %v4975_v38 = vld [vmem:[#allocation9_spill] sm:$0xff] }
 0x2b0   :  { %2491 = vst [vmem:[#allocation5 + $0x20] sm:$0xff] %v2353_v32  ;;  %v1897_v9 = vadd.f32 %v1896_v23, %v1667_v43  ;;  %v4974_v62 = vand.u32 4294901760, %v4973_v35 }
 0x2b1   :  { %v1671_v15 = vpop.f32.mrf.mxu2  ;;  %v1463_v17 = vadd.f32 %v4302_v2, %v1094_v7  ;;  %v972_v7 = vld [vmem:[%s4745_s2 + $0x58] sm:$0xff] }
 0x2b2   :  { %v1908_v13 = vpop.f32.mrf.mxu3 }
 0x2b3   :  { %v2171_v21 = vpop.f32.mrf.mxu0 }
 0x2b4   :  { %v2172_v47 = vadd.f32 %v2171_v21, %v1891_v16  ;;  %v2360_v6 = vpop.f32.mrf.mxu1  ;;  %v971_v16 = vld [vmem:[%s4745_s2 + $0x50] sm:$0xff] }
 0x2b6   :  { %v2357_v33 = vadd.f32 %v2356_v12, %v2172_v47  ;;  %1755 = vmatmul.f32.gmra.mxu2 %v3671_v20  ;;  %2234 = vmatmul.f32.gmra.mxu0 %v3402_v28  ;;  %v969_v28 = vld [vmem:[%s4745_s2 + $0x40] sm:$0xff]  ;;  %v1672_v20 = vadd.f32 %v1671_v15, %v1463_v17  ;;  %v4978_v12 = vld [vmem:[#allocation11_spill] sm:$0xff]  ;;  %v4984_v17 = vld [vmem:[#allocation13_spill] sm:$0xff] }
 0x2b7   :  { %2009 = vmatmul.f32.gmra.mxu3 %v4971_v51  ;;  %2423 = vmatmul.f32.gmra.mxu1 %v4972_v49  ;;  %v1102_v23 = vadd.f32 %v4328_v60, %v969_v28  ;;  %v4976_v60 = vld [vmem:[#allocation16_spill] sm:$0xff] }
 0x2b8   :  { %2492 = vst [vmem:[#allocation5 + $0x28] sm:$0xff] %v2357_v33  ;;  %v1903_v55 = vadd.f32 %v1902_v0, %v1672_v20  ;;  %v4977_v44 = vand.u32 4294901760, %v4976_v60  ;;  %v1110_v0 = vadd.f32 %v4341_v58, %v970_v22  ;;  %v4979_v58 = vld [vmem:[#allocation18_spill] sm:$0xff] }
 0x2b9   :  { %v1676_v59 = vpop.f32.mrf.mxu2  ;;  %v1467_v63 = vadd.f32 %v4317_v30, %v1102_v23  ;;  %v4980_v47 = vand.u32 4294901760, %v4979_v58 }
 0x2ba   :  { %v1914_v46 = vpop.f32.mrf.mxu3  ;;  %v1471_v34 = vadd.f32 %v4330_v57, %v1110_v0  ;;  %v4990_v0 = vld [vmem:[#allocation17_spill] sm:$0xff] }
 0x2bb   :  { %v2175_v42 = vpop.f32.mrf.mxu0  ;;  %v1677_v53 = vadd.f32 %v1676_v59, %v1467_v63 }
 0x2bc   :  { %v2176_v45 = vadd.f32 %v2175_v42, %v1897_v9  ;;  %v2364_v10 = vpop.f32.mrf.mxu1 }
 0x2bd   :  { %v1909_v14 = vadd.f32 %v1908_v13, %v1677_v53  ;;  %v1118_v13 = vadd.f32 %v4354_v8, %v971_v16  ;;  %v4982_v8 = vld [vmem:[#allocation20_spill] sm:$0xff] }
 0x2be   :  { %v2361_v52 = vadd.f32 %v2360_v6, %v2176_v45  ;;  %1760 = vmatmul.f32.gmra.mxu2 %v4970_v54  ;;  %2238 = vmatmul.f32.gmra.mxu0 %v4972_v49  ;;  %v4981_v6 = vld [vmem:[#allocation10_spill] sm:$0xff]  ;;  %v4983_v42 = vand.u32 4294901760, %v4982_v8  ;;  %v975_v16 = vld [vmem:[%s4745_s2 + $0x70] sm:$0xff] }
 0x2bf   :  { %2015 = vmatmul.f32.gmra.mxu3 %v4974_v62  ;;  %2427 = vmatmul.f32.gmra.mxu1 %v4975_v38  ;;  %v1475_v54 = vadd.f32 %v4343_v29, %v1118_v13  ;;  %v973_v62 = vld [vmem:[%s4745_s2 + $0x60] sm:$0xff] }
 0x2c0   :  { %2493 = vst [vmem:[#allocation5 + $0x30] sm:$0xff] %v2361_v52 }
 0x2c1   :  { %v1681_v2 = vpop.f32.mrf.mxu2 }
 0x2c2   :  { %v1920_v40 = vpop.f32.mrf.mxu3  ;;  %v1682_v21 = vadd.f32 %v1681_v2, %v1471_v34 }
 0x2c3   :  { %v2179_v25 = vpop.f32.mrf.mxu0 }
 0x2c4   :  { %v2180_v19 = vadd.f32 %v2179_v25, %v1903_v55  ;;  %v2368_v26 = vpop.f32.mrf.mxu1  ;;  %v1915_v43 = vadd.f32 %v1914_v46, %v1682_v21  ;;  %v1126_v46 = vadd.f32 %v4367_v31, %v972_v7  ;;  %v4985_v31 = vld [vmem:[#allocation22_spill] sm:$0xff]  ;;  %v4987_v55 = vld [vmem:[#allocation15_spill] sm:$0xff] }
 0x2c5   :  { %v4986_v2 = vand.u32 4294901760, %v4985_v31 }
 0x2c6   :  { %v2365_v61 = vadd.f32 %v2364_v10, %v2180_v19  ;;  %1765 = vmatmul.f32.gmra.mxu2 %v4973_v35  ;;  %2242 = vmatmul.f32.gmra.mxu0 %v4975_v38  ;;  %v1479_v20 = vadd.f32 %v4356_v27, %v1126_v46 }
 0x2c7   :  { %2021 = vmatmul.f32.gmra.mxu3 %v4977_v44  ;;  %2431 = vmatmul.f32.gmra.mxu1 %v4978_v12 }
 0x2c8   :  { %2494 = vst [vmem:[#allocation5 + $0x38] sm:$0xff] %v2365_v61  ;;  %v974_v61 = vld [vmem:[%s4745_s2 + $0x68] sm:$0xff] }
 0x2c9   :  { %v1686_v30 = vpop.f32.mrf.mxu2 }
 0x2ca   :  { %v1926_v37 = vpop.f32.mrf.mxu3  ;;  %v1687_v59 = vadd.f32 %v1686_v30, %v1475_v54  ;;  %v1142_v30 = vadd.f32 %v4393_v18, %v974_v61  ;;  %v4991_v18 = vld [vmem:[#allocation26_spill] sm:$0xff] }
 0x2cb   :  { %v2183_v32 = vpop.f32.mrf.mxu0 }
 0x2cc   :  { %v2184_v1 = vadd.f32 %v2183_v32, %v1909_v14  ;;  %v2372_v15 = vpop.f32.mrf.mxu1  ;;  %v1921_v10 = vadd.f32 %v1920_v40, %v1687_v59  ;;  %v1134_v40 = vadd.f32 %v4380_v24, %v973_v62  ;;  %v4988_v24 = vld [vmem:[#allocation24_spill] sm:$0xff]  ;;  %v1487_v34 = vadd.f32 %v4382_v5, %v1142_v30  ;;  %v4999_v62 = vld [vmem:[#allocation23_spill] sm:$0xff] }
 0x2ce   :  { %v2369_v36 = vadd.f32 %v2368_v26, %v2184_v1  ;;  %1770 = vmatmul.f32.gmra.mxu2 %v4976_v60  ;;  %2246 = vmatmul.f32.gmra.mxu0 %v4978_v12  ;;  %v1483_v26 = vadd.f32 %v4369_v39, %v1134_v40  ;;  %v4989_v12 = vand.u32 4294901760, %v4988_v24 }
 0x2cf   :  { %2027 = vmatmul.f32.gmra.mxu3 %v4980_v47  ;;  %2435 = vmatmul.f32.gmra.mxu1 %v4981_v6  ;;  %v4993_v47 = vld [vmem:[#allocation19_spill] sm:$0xff] }
 0x2d0   :  { %2495 = vst [vmem:[#allocation5 + $0x40] sm:$0xff] %v2369_v36 }
 0x2d1   :  { %v1691_v57 = vpop.f32.mrf.mxu2 }
 0x2d2   :  { %v1932_v41 = vpop.f32.mrf.mxu3  ;;  %v1692_v38 = vadd.f32 %v1691_v57, %v1479_v20 }
 0x2d3   :  { %v2187_v33 = vpop.f32.mrf.mxu0 }
 0x2d4   :  { %v2188_v51 = vadd.f32 %v2187_v33, %v1915_v43  ;;  %v2376_v49 = vpop.f32.mrf.mxu1  ;;  %v1927_v63 = vadd.f32 %v1926_v37, %v1692_v38 }
 0x2d6   :  { %v2373_v9 = vadd.f32 %v2372_v15, %v2188_v51  ;;  %1775 = vmatmul.f32.gmra.mxu2 %v4979_v58  ;;  %2250 = vmatmul.f32.gmra.mxu0 %v4981_v6  ;;  %v4992_v58 = vand.u32 4294901760, %v4991_v18  ;;  %v1150_v6 = vadd.f32 %v4404_v56, %v975_v16  ;;  %v976_v51 = vld [vmem:[%s4745_s2 + $0x78] sm:$0xff]  ;;  %v4994_v56 = vld [vmem:[#allocation28_spill] sm:$0xff] }
 0x2d7   :  { %2033 = vmatmul.f32.gmra.mxu3 %v4983_v42  ;;  %2439 = vmatmul.f32.gmra.mxu1 %v4984_v17  ;;  %v4995_v59 = vand.u32 4294901760, %v4994_v56  ;;  %v5008_v16 = vld [vmem:[#allocation76_spill] sm:$0xff] }
 0x2d8   :  { %2496 = vst [vmem:[#allocation5 + $0x48] sm:$0xff] %v2373_v9  ;;  %v1491_v43 = vadd.f32 %v4395_v11, %v1150_v6  ;;  %v4996_v9 = vld [vmem:[#allocation21_spill] sm:$0xff]  ;;  %v5009_v6 = vld [vmem:[#allocation75_spill] sm:$0xff] }
 0x2d9   :  { %v1696_v29 = vpop.f32.mrf.mxu2 }
 0x2da   :  { %v1938_v45 = vpop.f32.mrf.mxu3  ;;  %v1697_v60 = vadd.f32 %v1696_v29, %v1483_v26 }
 0x2db   :  { %v2191_v28 = vpop.f32.mrf.mxu0 }
 0x2dc   :  { %v2192_v52 = vadd.f32 %v2191_v28, %v1921_v10  ;;  %v2380_v35 = vpop.f32.mrf.mxu1  ;;  %v1933_v14 = vadd.f32 %v1932_v41, %v1697_v60  ;;  %v977_v28 = vld [vmem:[%s4745_s2 + $0x80] sm:$0xff] }
 0x2dd   :  { %v1166_v38 = vadd.f32 %v4430_v48, %v977_v28  ;;  %v5000_v48 = vld [vmem:[#allocation32_spill] sm:$0xff] }
 0x2de   :  { %v2377_v23 = vadd.f32 %v2376_v49, %v2192_v52  ;;  %1780 = vmatmul.f32.gmra.mxu2 %v4982_v8  ;;  %2254 = vmatmul.f32.gmra.mxu0 %v4984_v17  ;;  %v1158_v8 = vadd.f32 %v4418_v4, %v976_v51  ;;  %v4997_v4 = vld [vmem:[#allocation30_spill] sm:$0xff]  ;;  %v5001_v26 = vand.u32 4294901760, %v5000_v48 }
 0x2df   :  { %2039 = vmatmul.f32.gmra.mxu3 %v4986_v2  ;;  %2443 = vmatmul.f32.gmra.mxu1 %v4987_v55 }
 0x2e0   :  { %2497 = vst [vmem:[#allocation5 + $0x50] sm:$0xff] %v2377_v23  ;;  %v1495_v29 = vadd.f32 %v4406_v3, %v1158_v8 }
 0x2e1   :  { %v1701_v27 = vpop.f32.mrf.mxu2 }
 0x2e2   :  { %v1944_v25 = vpop.f32.mrf.mxu3  ;;  %v1702_v21 = vadd.f32 %v1701_v27, %v1487_v34  ;;  %v5005_v34 = vld [vmem:[#allocation37_spill] sm:$0xff] }
 0x2e3   :  { %v2195_v19 = vpop.f32.mrf.mxu0 }
 0x2e4   :  { %v2196_v22 = vadd.f32 %v2195_v19, %v1927_v63  ;;  %v2384_v53 = vpop.f32.mrf.mxu1  ;;  %v1939_v57 = vadd.f32 %v1938_v45, %v1702_v21 }
 0x2e6   :  { %v2381_v44 = vadd.f32 %v2380_v35, %v2196_v22  ;;  %1785 = vmatmul.f32.gmra.mxu2 %v4985_v31  ;;  %2258 = vmatmul.f32.gmra.mxu0 %v4987_v55  ;;  %v4998_v35 = vand.u32 4294901760, %v4997_v4  ;;  %v1499_v55 = vadd.f32 %v4420_v50, %v1166_v38  ;;  %v5002_v22 = vld [vmem:[#allocation25_spill] sm:$0xff] }
 0x2e7   :  { %2045 = vmatmul.f32.gmra.mxu3 %v4989_v12  ;;  %2447 = vmatmul.f32.gmra.mxu1 %v4990_v0  ;;  %v5004_v12 = vld [vmem:[#allocation72_spill] sm:$0xff] }
 0x2e8   :  { %2498 = vst [vmem:[#allocation5 + $0x58] sm:$0xff] %v2381_v44 }
 0x2e9   :  { %v1706_v39 = vpop.f32.mrf.mxu2 }
 0x2ea   :  { %v1950_v37 = vpop.f32.mrf.mxu3  ;;  %v1707_v49 = vadd.f32 %v1706_v39, %v1491_v43 }
 0x2eb   :  { %v2199_v32 = vpop.f32.mrf.mxu0 }
 0x2ec   :  { %v2200_v1 = vadd.f32 %v2199_v32, %v1933_v14  ;;  %v2388_v15 = vpop.f32.mrf.mxu1  ;;  %v1945_v17 = vadd.f32 %v1944_v25, %v1707_v49  ;;  %v978_v25 = vld [vmem:[%s4745_s2 + $0x88] sm:$0xff]  ;;  %v5012_v49 = vld [vmem:[#allocation29_spill] sm:$0xff] }
 0x2ee   :  { %v2385_v36 = vadd.f32 %v2384_v53, %v2200_v1  ;;  %1790 = vmatmul.f32.gmra.mxu2 %v4988_v24  ;;  %2262 = vmatmul.f32.gmra.mxu0 %v4990_v0  ;;  %v5003_v53 = vld [vmem:[#allocation74_spill] sm:$0xff]  ;;  %v5006_v1 = vand.u32 4294901760, %v5005_v34 }
 0x2ef   :  { %2051 = vmatmul.f32.gmra.mxu3 %v4992_v58  ;;  %2451 = vmatmul.f32.gmra.mxu1 %v4993_v47  ;;  %v1174_v61 = vadd.f32 %v5003_v53, %v978_v25 }
 0x2f0   :  { %2499 = vst [vmem:[#allocation5 + $0x60] sm:$0xff] %v2385_v36 }
 0x2f1   :  { %v1711_v5 = vpop.f32.mrf.mxu2  ;;  %v1503_v0 = vadd.f32 %v5004_v12, %v1174_v61  ;;  %v983_v12 = vld [vmem:[%s4745_s2 + $0xb0] sm:$0xff] }
 0x2f2   :  { %v1956_v13 = vpop.f32.mrf.mxu3  ;;  %v1712_v20 = vadd.f32 %v1711_v5, %v1495_v29 }
 0x2f3   :  { %v2203_v41 = vpop.f32.mrf.mxu0 }
 0x2f4   :  { %v2204_v33 = vadd.f32 %v2203_v41, %v1939_v57  ;;  %v2392_v54 = vpop.f32.mrf.mxu1  ;;  %v1951_v31 = vadd.f32 %v1950_v37, %v1712_v20  ;;  %v979_v37 = vld [vmem:[%s4745_s2 + $0x90] sm:$0xff]  ;;  %v980_v41 = vld [vmem:[%s4745_s2 + $0x98] sm:$0xff]  ;;  %v5015_v20 = vld [vmem:[#allocation31_spill] sm:$0xff] }
 0x2f5   :  { %v1182_v21 = vadd.f32 %v5008_v16, %v979_v37  ;;  %v5022_v37 = vld [vmem:[#allocation44_spill] sm:$0xff]  ;;  %v5023_v16 = vld [vmem:[#allocation43_spill] sm:$0xff] }
 0x2f6   :  { %v2389_v7 = vadd.f32 %v2388_v15, %v2204_v33  ;;  %1795 = vmatmul.f32.gmra.mxu2 %v4991_v18  ;;  %2266 = vmatmul.f32.gmra.mxu0 %v4993_v47  ;;  %v5007_v15 = vld [vmem:[#allocation27_spill] sm:$0xff] }
 0x2f7   :  { %2057 = vmatmul.f32.gmra.mxu3 %v4995_v59  ;;  %2455 = vmatmul.f32.gmra.mxu1 %v4996_v9  ;;  %v1507_v5 = vadd.f32 %v5009_v6, %v1182_v21 }
 0x2f8   :  { %2500 = vst [vmem:[#allocation5 + $0x68] sm:$0xff] %v2389_v7  ;;  %v5013_v7 = vld [vmem:[#allocation34_spill] sm:$0xff] }
 0x2f9   :  { %v1716_v11 = vpop.f32.mrf.mxu2 }
 0x2fa   :  { %v1962_v42 = vpop.f32.mrf.mxu3  ;;  %v1717_v63 = vadd.f32 %v1716_v11, %v1499_v55 }
 0x2fb   :  { %v2207_v46 = vpop.f32.mrf.mxu0 }
 0x2fc   :  { %v2208_v45 = vadd.f32 %v2207_v46, %v1945_v17  ;;  %v2396_v10 = vpop.f32.mrf.mxu1  ;;  %v1957_v44 = vadd.f32 %v1956_v13, %v1717_v63  ;;  %v5018_v63 = vld [vmem:[#allocation35_spill] sm:$0xff] }
 0x2fe   :  { %v2393_v52 = vadd.f32 %v2392_v54, %v2208_v45  ;;  %1800 = vmatmul.f32.gmra.mxu2 %v4994_v56  ;;  %2270 = vmatmul.f32.gmra.mxu0 %v4996_v9  ;;  %v5010_v54 = vld [vmem:[#allocation41_spill] sm:$0xff]  ;;  %v1190_v56 = vadd.f32 %v5013_v7, %v980_v41  ;;  %v981_v45 = vld [vmem:[%s4745_s2 + $0xa0] sm:$0xff] }
 0x2ff   :  { %2063 = vmatmul.f32.gmra.mxu3 %v4998_v35  ;;  %2459 = vmatmul.f32.gmra.mxu1 %v4999_v62  ;;  %v5011_v51 = vand.u32 4294901760, %v5010_v54 }
 0x300   :  { %2501 = vst [vmem:[#allocation5 + $0x70] sm:$0xff] %v2393_v52  ;;  %v5016_v52 = vld [vmem:[#allocation38_spill] sm:$0xff] }
 0x301   :  { %v1721_v3 = vpop.f32.mrf.mxu2 }
 0x302   :  { %v1968_v23 = vpop.f32.mrf.mxu3  ;;  %v1722_v14 = vadd.f32 %v1721_v3, %v1503_v0 }
 0x303   :  { %v2211_v2 = vpop.f32.mrf.mxu0 }
 0x304   :  { %v2212_v40 = vadd.f32 %v2211_v2, %v1951_v31  ;;  %v2400_v27 = vpop.f32.mrf.mxu1  ;;  %v1963_v58 = vadd.f32 %v1962_v42, %v1722_v14  ;;  %v5014_v42 = vld [vmem:[#allocation33_spill] sm:$0xff]  ;;  %v1214_v14 = vadd.f32 %v5022_v37, %v983_v12 }
 0x305   :  { %v1511_v17 = vadd.f32 %v5014_v42, %v1190_v56  ;;  %v985_v56 = vld [vmem:[%s4745_s2 + $0xc0] sm:$0xff] }
 0x306   :  { %v2397_v19 = vadd.f32 %v2396_v10, %v2212_v40  ;;  %1805 = vmatmul.f32.gmra.mxu2 %v4997_v4  ;;  %2274 = vmatmul.f32.gmra.mxu0 %v4999_v62  ;;  %v1198_v4 = vadd.f32 %v5016_v52, %v981_v45  ;;  %v982_v40 = vld [vmem:[%s4745_s2 + $0xa8] sm:$0xff]  ;;  %v1523_v21 = vadd.f32 %v5023_v16, %v1214_v14  ;;  %v5032_v14 = vld [vmem:[#allocation54_spill] sm:$0xff]  ;;  %v5033_v16 = vld [vmem:[#allocation53_spill] sm:$0xff] }
 0x307   :  { %2069 = vmatmul.f32.gmra.mxu3 %v5001_v26  ;;  %2463 = vmatmul.f32.gmra.mxu1 %v5002_v22  ;;  %v5027_v45 = vld [vmem:[#allocation47_spill] sm:$0xff] }
 0x308   :  { %2502 = vst [vmem:[#allocation5 + $0x78] sm:$0xff] %v2397_v19  ;;  %v5019_v19 = vld [vmem:[#allocation42_spill] sm:$0xff]  ;;  %v986_v52 = vld [vmem:[%s4745_s2 + $0xc8] sm:$0xff] }
 0x309   :  { %v1726_v50 = vpop.f32.mrf.mxu2 }
 0x30a   :  { %v1974_v60 = vpop.f32.mrf.mxu3  ;;  %v1727_v43 = vadd.f32 %v1726_v50, %v1507_v5  ;;  %v5020_v50 = vld [vmem:[#allocation39_spill] sm:$0xff]  ;;  %v5024_v5 = vld [vmem:[#allocation46_spill] sm:$0xff] }
 0x30b   :  { %v2215_v24 = vpop.f32.mrf.mxu0 }
 0x30c   :  { %v2216_v30 = vadd.f32 %v2215_v24, %v1957_v44  ;;  %v2404_v39 = vpop.f32.mrf.mxu1  ;;  %v1969_v8 = vadd.f32 %v1968_v23, %v1727_v43  ;;  %v5017_v23 = vld [vmem:[#allocation36_spill] sm:$0xff] }
 0x30d   :  { %v1515_v31 = vadd.f32 %v5017_v23, %v1198_v4 }
 0x30e   :  { %v2401_v32 = vadd.f32 %v2400_v27, %v2216_v30  ;;  %1810 = vmatmul.f32.gmra.mxu2 %v5000_v48  ;;  %2278 = vmatmul.f32.gmra.mxu0 %v5002_v22  ;;  %v1206_v48 = vadd.f32 %v5019_v19, %v982_v40 }
 0x30f   :  { %2075 = vmatmul.f32.gmra.mxu3 %v5006_v1  ;;  %2467 = vmatmul.f32.gmra.mxu1 %v5007_v15 }
 0x310   :  { %2503 = vst [vmem:[#allocation5 + $0x80] sm:$0xff] %v2401_v32 }
 0x311   :  { %v1731_v36 = vpop.f32.mrf.mxu2 }
 0x312   :  { %v1980_v18 = vpop.f32.mrf.mxu3  ;;  %v1732_v10 = vadd.f32 %v1731_v36, %v1511_v17 }
 0x313   :  { %v2219_v47 = vpop.f32.mrf.mxu0 }
 0x314   :  { %v2220_v13 = vadd.f32 %v2219_v47, %v1963_v58  ;;  %v2408_v57 = vpop.f32.mrf.mxu1  ;;  %v1975_v38 = vadd.f32 %v1974_v60, %v1732_v10  ;;  %v1519_v60 = vadd.f32 %v5020_v50, %v1206_v48  ;;  %v984_v58 = vld [vmem:[%s4745_s2 + $0xb8] sm:$0xff] }
 0x316   :  { %v2405_v33 = vadd.f32 %v2404_v39, %v2220_v13  ;;  %1815 = vmatmul.f32.gmra.mxu2 %v5005_v34  ;;  %2282 = vmatmul.f32.gmra.mxu0 %v5007_v15  ;;  %v5021_v39 = vld [vmem:[#allocation40_spill] sm:$0xff]  ;;  %v1222_v13 = vadd.f32 %v5024_v5, %v984_v58  ;;  %v989_v58 = vld [vmem:[%s4745_s2 + $0xe0] sm:$0xff] }
 0x317   :  { %2081 = vmatmul.f32.gmra.mxu3 %v5011_v51  ;;  %2471 = vmatmul.f32.gmra.mxu1 %v5012_v49  ;;  %v5034_v5 = vld [vmem:[#allocation56_spill] sm:$0xff] }
 0x318   :  { %2504 = vst [vmem:[#allocation5 + $0x88] sm:$0xff] %v2405_v33 }
 0x319   :  { %v1736_v59 = vpop.f32.mrf.mxu2 }
 0x31a   :  { %v1986_v9 = vpop.f32.mrf.mxu3  ;;  %v1737_v27 = vadd.f32 %v1736_v59, %v1515_v31 }
 0x31b   :  { %v2223_v11 = vpop.f32.mrf.mxu0 }
 0x31c   :  { %v2224_v46 = vadd.f32 %v2223_v11, %v1969_v8  ;;  %v2412_v29 = vpop.f32.mrf.mxu1  ;;  %v1981_v53 = vadd.f32 %v1980_v18, %v1737_v27  ;;  %v5026_v8 = vld [vmem:[#allocation48_spill] sm:$0xff] }
 0x31d   :  { %v1230_v11 = vadd.f32 %v5026_v8, %v985_v56  ;;  %v990_v56 = vld [vmem:[%s4745_s2 + $0xe8] sm:$0xff]  ;;  %v5036_v8 = vld [vmem:[#allocation58_spill] sm:$0xff] }
 0x31e   :  { %v2409_v28 = vadd.f32 %v2408_v57, %v2224_v46  ;;  %1820 = vmatmul.f32.gmra.mxu2 %v5010_v54  ;;  %2286 = vmatmul.f32.gmra.mxu0 %v5012_v49  ;;  %v5025_v54 = vld [vmem:[#allocation45_spill] sm:$0xff] }
 0x31f   :  { %2475 = vmatmul.f32.gmra.mxu1 %v5015_v20  ;;  %v1527_v51 = vadd.f32 %v5025_v54, %v1222_v13  ;;  %v1531_v10 = vadd.f32 %v5027_v45, %v1230_v11  ;;  %v1262_v13 = vadd.f32 %v5034_v5, %v989_v58  ;;  %v5035_v54 = vld [vmem:[#allocation55_spill] sm:$0xff]  ;;  %v1270_v11 = vadd.f32 %v5036_v8, %v990_v56  ;;  %v5037_v45 = vld [vmem:[#allocation57_spill] sm:$0xff]  ;;  %v5044_v5 = vld [vmem:[#allocation66_spill] sm:$0xff] }
 0x320   :  { %2505 = vst [vmem:[#allocation5 + $0x90] sm:$0xff] %v2409_v28  ;;  %v994_v58 = vld [vmem:[%s4745_s2 + $0x108] sm:$0xff]  ;;  %v5046_v8 = vld [vmem:[#allocation68_spill] sm:$0xff] }
 0x321   :  { %v1741_v35 = vpop.f32.mrf.mxu2 }
 0x322   :  { %v1992_v62 = vpop.f32.mrf.mxu3  ;;  %v1742_v0 = vadd.f32 %v1741_v35, %v1519_v60  ;;  %v5031_v60 = vld [vmem:[#allocation51_spill] sm:$0xff] }
 0x323   :  { %v2227_v3 = vpop.f32.mrf.mxu0 }
 0x324   :  { %v2228_v2 = vadd.f32 %v2227_v3, %v1975_v38  ;;  %v2416_v55 = vpop.f32.mrf.mxu1  ;;  %v1987_v1 = vadd.f32 %v1986_v9, %v1742_v0  ;;  %v988_v0 = vld [vmem:[%s4745_s2 + $0xd8] sm:$0xff] }
 0x326   :  { %v2413_v25 = vadd.f32 %v2412_v29, %v2228_v2  ;;  %2290 = vmatmul.f32.gmra.mxu0 %v5015_v20  ;;  %v5029_v2 = vld [vmem:[#allocation49_spill] sm:$0xff] }
 0x327   :  { %2479 = vmatmul.f32.gmra.mxu1 %v5018_v63 }
 0x328   :  { %2506 = vst [vmem:[#allocation5 + $0x98] sm:$0xff] %v2413_v25  ;;  %v987_v25 = vld [vmem:[%s4745_s2 + $0xd0] sm:$0xff] }
 0x329   :  { %v1746_v26 = vpop.f32.mrf.mxu2 }
 0x32a   :  { %v1998_v22 = vpop.f32.mrf.mxu3  ;;  %v1747_v47 = vadd.f32 %v1746_v26, %v1523_v21  ;;  %v5030_v26 = vld [vmem:[#allocation52_spill] sm:$0xff] }
 0x32b   :  { %v2231_v61 = vpop.f32.mrf.mxu0 }
 0x32c   :  { %v2232_v44 = vadd.f32 %v2231_v61, %v1981_v53  ;;  %v2420_v24 = vpop.f32.mrf.mxu1  ;;  %v1993_v43 = vadd.f32 %v1992_v62, %v1747_v47  ;;  %v5028_v62 = vld [vmem:[#allocation50_spill] sm:$0xff] }
 0x32d   :  { %v1238_v38 = vadd.f32 %v5028_v62, %v986_v52  ;;  %v991_v52 = vld [vmem:[%s4745_s2 + $0xf0] sm:$0xff] }
 0x32e   :  { %v2417_v30 = vadd.f32 %v2416_v55, %v2232_v44  ;;  %2294 = vmatmul.f32.gmra.mxu0 %v5018_v63  ;;  %v5038_v62 = vld [vmem:[#allocation60_spill] sm:$0xff] }
 0x32f   :  { %2483 = vmatmul.f32.gmra.mxu1 %v5021_v39  ;;  %v1535_v55 = vadd.f32 %v5029_v2, %v1238_v38  ;;  %v1278_v38 = vadd.f32 %v5038_v62, %v991_v52  ;;  %v5039_v2 = vld [vmem:[#allocation59_spill] sm:$0xff]  ;;  %v5048_v62 = vld [vmem:[#allocation70_spill] sm:$0xff] }
 0x330   :  { %2507 = vst [vmem:[#allocation5 + $0xa0] sm:$0xff] %v2417_v30 }
 0x331   :  { %v1751_v32 = vpop.f32.mrf.mxu2 }
 0x332   :  { %v2004_v34 = vpop.f32.mrf.mxu3  ;;  %v1752_v59 = vadd.f32 %v1751_v32, %v1527_v51  ;;  %v1254_v32 = vadd.f32 %v5032_v14, %v988_v0  ;;  %v1547_v51 = vadd.f32 %v5035_v54, %v1262_v13  ;;  %v993_v0 = vld [vmem:[%s4745_s2 + $0x100] sm:$0xff]  ;;  %v5042_v14 = vld [vmem:[#allocation64_spill] sm:$0xff]  ;;  %v1302_v13 = vadd.f32 %v5044_v5, %v994_v58 }
 0x333   :  { %v2235_v15 = vpop.f32.mrf.mxu0 }
 0x334   :  { %v2236_v36 = vadd.f32 %v2235_v15, %v1987_v1  ;;  %v2424_v18 = vpop.f32.mrf.mxu1  ;;  %v1999_v17 = vadd.f32 %v1998_v22, %v1752_v59  ;;  %v1246_v22 = vadd.f32 %v5030_v26, %v987_v25  ;;  %v1543_v21 = vadd.f32 %v5033_v16, %v1254_v32  ;;  %v992_v25 = vld [vmem:[%s4745_s2 + $0xf8] sm:$0xff]  ;;  %v5040_v26 = vld [vmem:[#allocation62_spill] sm:$0xff]  ;;  %v5043_v16 = vld [vmem:[#allocation63_spill] sm:$0xff] }
 0x335   :  { %v1294_v32 = vadd.f32 %v5042_v14, %v993_v0 }
 0x336   :  { %v2421_v6 = vadd.f32 %v2420_v24, %v2236_v36  ;;  %2298 = vmatmul.f32.gmra.mxu0 %v5021_v39  ;;  %v1539_v44 = vadd.f32 %v5031_v60, %v1246_v22  ;;  %v1286_v22 = vadd.f32 %v5040_v26, %v992_v25  ;;  %v5041_v60 = vld [vmem:[#allocation61_spill] sm:$0xff] }
 0x338   :  { %2508 = vst [vmem:[#allocation5 + $0xa8] sm:$0xff] %v2421_v6 }
 0x339   :  { %v1756_v57 = vpop.f32.mrf.mxu2 }
 0x33a   :  { %v2010_v41 = vpop.f32.mrf.mxu3  ;;  %v1757_v4 = vadd.f32 %v1756_v57, %v1531_v10  ;;  %v1551_v10 = vadd.f32 %v5037_v45, %v1270_v11 }
 0x33b   :  { %v2239_v33 = vpop.f32.mrf.mxu0 }
 0x33c   :  { %v2240_v49 = vadd.f32 %v2239_v33, %v1993_v43  ;;  %v2428_v7 = vpop.f32.mrf.mxu1  ;;  %v2005_v23 = vadd.f32 %v2004_v34, %v1757_v4 }
 0x33e   :  { %v2425_v9 = vadd.f32 %v2424_v18, %v2240_v49 }
 0x340   :  { %2509 = vst [vmem:[#allocation5 + $0xb0] sm:$0xff] %v2425_v9 }
 0x341   :  { %v1761_v42 = vpop.f32.mrf.mxu2 }
 0x342   :  { %v2016_v46 = vpop.f32.mrf.mxu3  ;;  %v1762_v19 = vadd.f32 %v1761_v42, %v1535_v55  ;;  %v1555_v55 = vadd.f32 %v5039_v2, %v1278_v38 }
 0x343   :  { %v2243_v29 = vpop.f32.mrf.mxu0 }
 0x344   :  { %v2244_v28 = vadd.f32 %v2243_v29, %v1999_v17  ;;  %v2432_v20 = vpop.f32.mrf.mxu1  ;;  %v2011_v61 = vadd.f32 %v2010_v41, %v1762_v19 }
 0x346   :  { %v2429_v35 = vadd.f32 %v2428_v7, %v2244_v28 }
 0x348   :  { %2510 = vst [vmem:[#allocation5 + $0xb8] sm:$0xff] %v2429_v35 }
 0x349   :  { %v1766_v3 = vpop.f32.mrf.mxu2 }
 0x34a   :  { %v2022_v63 = vpop.f32.mrf.mxu3  ;;  %v1767_v30 = vadd.f32 %v1766_v3, %v1539_v44  ;;  %v1559_v44 = vadd.f32 %v5041_v60, %v1286_v22 }
 0x34b   :  { %v2247_v31 = vpop.f32.mrf.mxu0 }
 0x34c   :  { %v2248_v40 = vadd.f32 %v2247_v31, %v2005_v23  ;;  %v2436_v27 = vpop.f32.mrf.mxu1  ;;  %v2017_v1 = vadd.f32 %v2016_v46, %v1767_v30 }
 0x34e   :  { %v2433_v48 = vadd.f32 %v2432_v20, %v2248_v40 }
 0x350   :  { %2511 = vst [vmem:[#allocation5 + $0xc0] sm:$0xff] %v2433_v48 }
 0x351   :  { %v1771_v53 = vpop.f32.mrf.mxu2 }
 0x352   :  { %v2028_v37 = vpop.f32.mrf.mxu3  ;;  %v1772_v47 = vadd.f32 %v1771_v53, %v1543_v21  ;;  %v1563_v21 = vadd.f32 %v5043_v16, %v1294_v32 }
 0x353   :  { %v2251_v50 = vpop.f32.mrf.mxu0 }
 0x354   :  { %v2252_v24 = vadd.f32 %v2251_v50, %v2011_v61  ;;  %v2440_v12 = vpop.f32.mrf.mxu1  ;;  %v2023_v43 = vadd.f32 %v2022_v63, %v1772_v47 }
 0x356   :  { %v2437_v39 = vadd.f32 %v2436_v27, %v2252_v24 }
 0x358   :  { %2512 = vst [vmem:[#allocation5 + $0xc8] sm:$0xff] %v2437_v39 }
 0x359   :  { %v1776_v34 = vpop.f32.mrf.mxu2 }
 0x35a   :  { %v2034_v57 = vpop.f32.mrf.mxu3  ;;  %v1777_v59 = vadd.f32 %v1776_v34, %v1547_v51 }
 0x35b   :  { %v2255_v15 = vpop.f32.mrf.mxu0 }
 0x35c   :  { %v2256_v36 = vadd.f32 %v2255_v15, %v2017_v1  ;;  %v2444_v18 = vpop.f32.mrf.mxu1  ;;  %v2029_v17 = vadd.f32 %v2028_v37, %v1777_v59 }
 0x35e   :  { %v2441_v6 = vadd.f32 %v2440_v12, %v2256_v36 }
 0x360   :  { %2513 = vst [vmem:[#allocation5 + $0xd0] sm:$0xff] %v2441_v6 }
 0x361   :  { %v1781_v41 = vpop.f32.mrf.mxu2 }
 0x362   :  { %v2040_v46 = vpop.f32.mrf.mxu3  ;;  %v1782_v4 = vadd.f32 %v1781_v41, %v1551_v10 }
 0x363   :  { %v2259_v33 = vpop.f32.mrf.mxu0 }
 0x364   :  { %v2260_v49 = vadd.f32 %v2259_v33, %v2023_v43  ;;  %v2448_v7 = vpop.f32.mrf.mxu1  ;;  %v2035_v23 = vadd.f32 %v2034_v57, %v1782_v4  ;;  %v5045_v33 = vld [vmem:[#allocation65_spill] sm:$0xff] }
 0x365   :  { %v1567_v54 = vadd.f32 %v5045_v33, %v1302_v13 }
 0x366   :  { %v2445_v9 = vadd.f32 %v2444_v18, %v2260_v49 }
 0x368   :  { %2514 = vst [vmem:[#allocation5 + $0xd8] sm:$0xff] %v2445_v9 }
 0x369   :  { %v1786_v42 = vpop.f32.mrf.mxu2 }
 0x36a   :  { %v2046_v63 = vpop.f32.mrf.mxu3  ;;  %v1787_v19 = vadd.f32 %v1786_v42, %v1555_v55 }
 0x36b   :  { %v2263_v29 = vpop.f32.mrf.mxu0 }
 0x36c   :  { %v2264_v28 = vadd.f32 %v2263_v29, %v2029_v17  ;;  %v2452_v20 = vpop.f32.mrf.mxu1  ;;  %v2041_v61 = vadd.f32 %v2040_v46, %v1787_v19  ;;  %v5047_v29 = vld [vmem:[#allocation67_spill] sm:$0xff] }
 0x36e   :  { %v2449_v35 = vadd.f32 %v2448_v7, %v2264_v28  ;;  %v995_v7 = vld [vmem:[%s4745_s2 + $0x110] sm:$0xff]  ;;  %v996_v28 = vld [vmem:[%s4745_s2 + $0x118] sm:$0xff]  ;;  %s2838_s2 = smov [#allocation5]  }
 0x36f   :  { %v1310_v11 = vadd.f32 %v5046_v8, %v995_v7  ;;  %v1318_v38 = vadd.f32 %v5048_v62, %v996_v28  ;;  %s2529_s10 = sshll.u32 %s2838_s2, 4  ;;  %s2530_s10 = int_to_ptr.vmem [resolvable:$true] %s2529_s10 }
 0x370   :  { %2515 = vst [vmem:[#allocation5 + $0xe0] sm:$0xff] %v2449_v35 }
 0x371   :  { %v1791_v3 = vpop.f32.mrf.mxu2  ;;  %v1571_v45 = vadd.f32 %v5047_v29, %v1310_v11 }
 0x372   :  { %v1792_v30 = vadd.f32 %v1791_v3, %v1559_v44  ;;  %v2052_v37 = vpop.f32.mrf.mxu3 }
 0x373   :  { %v2267_v31 = vpop.f32.mrf.mxu0 }
 0x374   :  { %v2268_v40 = vadd.f32 %v2267_v31, %v2035_v23  ;;  %v2456_v27 = vpop.f32.mrf.mxu1  ;;  %v2047_v1 = vadd.f32 %v2046_v63, %v1792_v30  ;;  %v5049_v31 = vld [vmem:[#allocation69_spill] sm:$0xff] }
 0x375   :  { %v1575_v2 = vadd.f32 %v5049_v31, %v1318_v38 }
 0x376   :  { %v2453_v48 = vadd.f32 %v2452_v20, %v2268_v40 }
 0x378   :  { %2516 = vst [vmem:[#allocation5 + $0xe8] sm:$0xff] %v2453_v48 }
 0x379   :  { %v1796_v53 = vpop.f32.mrf.mxu2 }
 0x37a   :  { %v1797_v47 = vadd.f32 %v1796_v53, %v1563_v21  ;;  %v2058_v57 = vpop.f32.mrf.mxu3  ;;  %v5050_v53 = vld [vmem:[#allocation71_spill] sm:$0xff] }
 0x37b   :  { %v2271_v50 = vpop.f32.mrf.mxu0 }
 0x37c   :  { %v2272_v24 = vadd.f32 %v2271_v50, %v2041_v61  ;;  %v2460_v12 = vpop.f32.mrf.mxu1  ;;  %v2053_v41 = vadd.f32 %v2052_v37, %v1797_v47 }
 0x37e   :  { %v2457_v39 = vadd.f32 %v2456_v27, %v2272_v24 }
 0x380   :  { %2517 = vst [vmem:[#allocation5 + $0xf0] sm:$0xff] %v2457_v39  ;;  %v5051_v39 = vld [vmem:[#allocation73_spill] sm:$0xff] }
 0x381   :  { %v1801_v34 = vpop.f32.mrf.mxu2 }
 0x382   :  { %v1802_v59 = vadd.f32 %v1801_v34, %v1567_v54  ;;  %v2064_v17 = vpop.f32.mrf.mxu3 }
 0x383   :  { %v2275_v15 = vpop.f32.mrf.mxu0 }
 0x384   :  { %v2276_v36 = vadd.f32 %v2275_v15, %v2047_v1  ;;  %v2464_v18 = vpop.f32.mrf.mxu1  ;;  %v2059_v42 = vadd.f32 %v2058_v57, %v1802_v59 }
 0x386   :  { %v2461_v6 = vadd.f32 %v2460_v12, %v2276_v36 }
 0x388   :  { %2518 = vst [vmem:[#allocation5 + $0xf8] sm:$0xff] %v2461_v6 }
 0x389   :  { %v1806_v51 = vpop.f32.mrf.mxu2 }
 0x38a   :  { %v1807_v20 = vadd.f32 %v1806_v51, %v1571_v45  ;;  %v2070_v40 = vpop.f32.mrf.mxu3 }
 0x38b   :  { %v2279_v43 = vpop.f32.mrf.mxu0 }
 0x38c   :  { %v2280_v49 = vadd.f32 %v2279_v43, %v2053_v41  ;;  %v2468_v56 = vpop.f32.mrf.mxu1  ;;  %v2065_v3 = vadd.f32 %v2064_v17, %v1807_v20 }
 0x38e   :  { %v2465_v9 = vadd.f32 %v2464_v18, %v2280_v49 }
 0x390   :  { %2519 = vst [vmem:[#allocation5 + $0x100] sm:$0xff] %v2465_v9 }
 0x391   :  { %v1811_v52 = vpop.f32.mrf.mxu2 }
 0x392   :  { %v1812_v27 = vadd.f32 %v1811_v52, %v1575_v2  ;;  %v2076_v60 = vpop.f32.mrf.mxu3 }
 0x393   :  { %v2283_v46 = vpop.f32.mrf.mxu0 }
 0x394   :  { %v2284_v10 = vadd.f32 %v2283_v46, %v2059_v42  ;;  %v2472_v35 = vpop.f32.mrf.mxu1  ;;  %v2071_v48 = vadd.f32 %v2070_v40, %v1812_v27 }
 0x396   :  { %v2469_v4 = vadd.f32 %v2468_v56, %v2284_v10 }
 0x398   :  { %2520 = vst [vmem:[#allocation5 + $0x108] sm:$0xff] %v2469_v4 }
 0x399   :  { %v1816_v63 = vpop.f32.mrf.mxu2 }
 0x39a   :  { %v1817_v61 = vadd.f32 %v1816_v63, %v5050_v53  ;;  %v2082_v32 = vpop.f32.mrf.mxu3 }
 0x39b   :  { %v2287_v23 = vpop.f32.mrf.mxu0 }
 0x39c   :  { %v2288_v55 = vadd.f32 %v2287_v23, %v2065_v3  ;;  %v2476_v19 = vpop.f32.mrf.mxu1  ;;  %v2077_v24 = vadd.f32 %v2076_v60, %v1817_v61 }
 0x39e   :  { %v2473_v25 = vadd.f32 %v2472_v35, %v2288_v55 }
 0x3a0   :  { %2521 = vst [vmem:[#allocation5 + $0x110] sm:$0xff] %v2473_v25 }
 0x3a1   :  { %v1821_v44 = vpop.f32.mrf.mxu2 }
 0x3a2   :  { %v1822_v37 = vadd.f32 %v1821_v44, %v5051_v39 }
 0x3a3   :  { %v2291_v26 = vpop.f32.mrf.mxu0 }
 0x3a4   :  { %v2292_v22 = vadd.f32 %v2291_v26, %v2071_v48  ;;  %v2480_v12 = vpop.f32.mrf.mxu1  ;;  %v2083_v34 = vadd.f32 %v2082_v32, %v1822_v37 }
 0x3a6   :  { %v2477_v50 = vadd.f32 %v2476_v19, %v2292_v22 }
 0x3a8   :  { %2522 = vst [vmem:[#allocation5 + $0x118] sm:$0xff] %v2477_v50 }
 0x3ab   :  { %v2295_v0 = vpop.f32.mrf.mxu0 }
 0x3ac   :  { %v2296_v30 = vadd.f32 %v2295_v0, %v2077_v24  ;;  %v2484_v16 = vpop.f32.mrf.mxu1 }
 0x3ae   :  { %v2481_v14 = vadd.f32 %v2480_v12, %v2296_v30 }
 0x3b0   :  { %2523 = vst [vmem:[#allocation5 + $0x120] sm:$0xff] %v2481_v14 }
 0x3b3   :  { %v2299_v1 = vpop.f32.mrf.mxu0 }
 0x3b4   :  { %v2300_v15 = vadd.f32 %v2299_v1, %v2083_v34 }
 0x3b6   :  { %v2485_v21 = vadd.f32 %v2484_v16, %v2300_v15 }
 0x3b8   :  { %2524 = vst [vmem:[#allocation5 + $0x128] sm:$0xff] %v2485_v21 }
 0x3b9   :  { %2537 = dma.vmem_to_hbm [thread:$0]  %s2530_s10, 4864, %s2532_s13, [#allocation4], %s2832_s17, %s2832_s17, %s2833_s18  }
 0x3ba   :  { %2829 = dma.done.wait [#allocation4], 4864  }
 0x3bb   :  { %2830 = vsyncadd [#allocation4], 4294962432 }
 0x3bc   :  { %2542 = vsyncpa [#allocation3], 1 }
 0x3bd   :  { %2543 = vsyncpa [#allocation4], 1 }

</bundles_post_ra>
